<compile_context>
chip_gen: v7x
topology: tpu7x:2x2x1
jax: 0.10.0
libtpu: 0.0.40
codegen_flags: <defaults>
</compile_context>

<pallas_src>
import functools

import numpy as np
import jax
import jax.numpy as jnp
from jax.experimental import pallas as pl
from jax.experimental.pallas import tpu as pltpu


def _round_up(x, m):
    return ((x + m - 1) // m) * m


def _mlp_diffuse_kernel(xin_ref, w1_ref, b1_ref, w2_ref, b2_ref, w3_ref, b3_ref,
                        out_ref, *, feape, n_feat, n_base, compute_dtype):
    """One batch tile: lane-dense PE -> 3 MXU matmuls -> fused sigmoid heads."""
    slab = xin_ref[...]                                    # (TB, K) f32

    if feape > 0:
        # Lane layout of `slab` (built once in the wrapper):
        #   [0, n_base)                      : xyz | features | zero padding
        #   [n_base, n_base + feape*C)       : features repeated channel-major (sin block)
        #   [n_base + feape*C, n_base + 2fC) : same again (cos block, sin(x + pi/2))
        lane = jax.lax.broadcasted_iota(jnp.int32, slab.shape, 1)
        pe_lane = lane - n_base
        f_idx = jnp.where(pe_lane >= 0, pe_lane % feape, 0)
        # Exact 2**f frequency per lane via a short select chain (scalar consts only).
        freq = jnp.full(slab.shape, 1.0, jnp.float32)
        for f in range(1, feape):
            freq = jnp.where(f_idx == f, np.float32(2.0 ** f), freq)
        phase = jnp.where(pe_lane >= feape * n_feat, np.float32(0.5 * np.pi),
                          np.float32(0.0))
        # Single transcendental over the whole lane-dense slab; identity on base lanes.
        x = jnp.where(pe_lane >= 0, jnp.sin(slab * freq + phase), slab)
    else:
        x = slab

    x = x.astype(compute_dtype)
    h = jnp.dot(x, w1_ref[...], preferred_element_type=jnp.float32) + b1_ref[...]
    h = jnp.maximum(h, 0.0).astype(compute_dtype)
    h = jnp.dot(h, w2_ref[...], preferred_element_type=jnp.float32) + b2_ref[...]
    h = jnp.maximum(h, 0.0).astype(compute_dtype)
    o = jnp.dot(h, w3_ref[...], preferred_element_type=jnp.float32) + b3_ref[...]

    # Per-head pre scale/bias already folded into W3/b3 by the wrapper:
    # epilogue is sigmoid + the 0.999*z + 0.001 clamp on the r1/r2/f0 heads.
    z = 1.0 / (1.0 + jnp.exp(-o))
    col = jax.lax.broadcasted_iota(jnp.int32, z.shape, 1)
    clamp = (col >= 7) & (col <= 9)                        # r1, r2, f0 heads
    out_ref[...] = jnp.where(
        clamp, z * np.float32(1.0 - 0.001) + np.float32(0.001), z
    ).astype(out_ref.dtype)


def mlp_diffuse_pallas(pts, features, params, *, feape=6, tint_bias=-1.0,
                       diffuse_bias=-2.0, diffuse_mul=1.0, roughness_bias=1.0,
                       tile_b=1024, matmul_dtype=jnp.bfloat16):
    w1, b1, w2, b2, w3, b3 = params
    B = pts.shape[0]
    C = features.shape[-1]
    H = w1.shape[1]
    in_mlpC = 3 + C + 2 * feape * C
    assert w1.shape[0] == in_mlpC, (w1.shape, in_mlpC)
    f32 = jnp.float32

    # ---- lane-dense fused MLP input, built once in the wrapper (XLA) --------
    K_pe = 2 * feape * C
    in_pad = max(64, _round_up(in_mlpC, 8))        # aligned contraction dim
    n_base = in_pad - K_pe                         # >= 3 + C by construction

    pts3 = pts[..., :3].astype(f32)
    feat = features.astype(f32)
    base = jnp.concatenate(
        [pts3, feat, jnp.zeros((B, n_base - (3 + C)), f32)], axis=-1)
    if feape > 0:
        rep = jnp.repeat(feat, feape, axis=-1)     # channel-major, matches torch PE order
        xin = jnp.concatenate([base, rep, rep], axis=-1)   # (B, in_pad)
    else:
        xin = base

    # ---- weights: zero-pad W1 rows for the padded base lanes; fold head -----
    # ---- pre-scale/bias into the last layer; pad N to a 128-lane slab. ------
    w1_f = jnp.asarray(w1, f32)
    w1_pad = jnp.concatenate(
        [w1_f[:3 + C], jnp.zeros((n_base - (3 + C), H), f32), w1_f[3 + C:]], axis=0)

    pre_scale = np.array([diffuse_mul] * 3 + [1.0] * 7, np.float32)
    pre_bias = np.array([diffuse_bias] * 3 + [tint_bias] * 3 + [-2.0]
                        + [roughness_bias] * 2 + [3.0], np.float32)
    N_pad = 128
    w3_f = jnp.asarray(w3, f32) * pre_scale[None, :]
    b3_f = jnp.asarray(b3, f32) * pre_scale + pre_bias
    w3_pad = jnp.zeros((H, N_pad), f32).at[:, :10].set(w3_f)
    b3_pad = jnp.zeros((1, N_pad), f32).at[:, :10].set(b3_f.reshape(1, 10))

    w1_k = w1_pad.astype(matmul_dtype)
    w2_k = jnp.asarray(w2, f32).astype(matmul_dtype)
    w3_k = w3_pad.astype(matmul_dtype)
    b1_k = jnp.asarray(b1, f32).reshape(1, H)
    b2_k = jnp.asarray(b2, f32).reshape(1, H)

    # ---- batch tiling --------------------------------------------------------
    TB = _round_up(max(8, min(int(tile_b), _round_up(B, 8))), 8)
    B_pad = _round_up(B, TB)
    xin_p = xin if B_pad == B else jnp.pad(xin, ((0, B_pad - B), (0, 0)))

    kernel = functools.partial(_mlp_diffuse_kernel, feape=feape, n_feat=C,
                               n_base=n_base, compute_dtype=matmul_dtype)

    def resident(shape):
        return pl.BlockSpec(shape, lambda i: (0, 0))       # weights stay in VMEM

    out = pl.pallas_call(
        kernel,
        out_shape=jax.ShapeDtypeStruct((B_pad, N_pad), jnp.float32),
        grid=(B_pad // TB,),
        in_specs=[
            pl.BlockSpec((TB, in_pad), lambda i: (i, 0)),  # fused input tile
            resident((in_pad, H)), resident((1, H)),       # W1 (padded), b1
            resident((H, H)), resident((1, H)),            # W2, b2
            resident((H, N_pad)), resident((1, N_pad)),    # W3 (heads folded), b3
        ],
        out_specs=pl.BlockSpec((TB, N_pad), lambda i: (i, 0)),
        compiler_params=pltpu.CompilerParams(
            dimension_semantics=("parallel",)),
    )(xin_p, w1_k, b1_k, w2_k, b2_k, w3_k, b3_pad)

    heads = out[:B, :10]
    diffuse = heads[:, 0:3]
    tint = heads[:, 3:6]
    extras = dict(ambient=heads[:, 6:7], diffuse=diffuse, r1=heads[:, 7:8],
                  r2=heads[:, 8:9], f0=heads[:, 9:10], tint=tint)
    return diffuse, tint, extras


# ----------------------------- pure-JAX reference ---------------------------

def _positional_encoding_ref(x, freqs):
    fb = 2.0 ** jnp.arange(freqs, dtype=jnp.float32)
    p = (x[..., None] * fb).reshape(x.shape[:-1] + (freqs * x.shape[-1],))
    return jnp.concatenate([jnp.sin(p), jnp.cos(p)], axis=-1)


def _mlp_diffuse_ref(pts, features, params, *, feape=6, tint_bias=-1.0,
                     diffuse_bias=-2.0, diffuse_mul=1.0, roughness_bias=1.0):
    w1, b1, w2, b2, w3, b3 = params
    indata = [pts[..., :3], features, _positional_encoding_ref(features, feape)]
    x = jnp.concatenate(indata, axis=-1)
    h = jnp.maximum(x @ w1 + b1, 0.0)
    h = jnp.maximum(h @ w2 + b2, 0.0)
    o = h @ w3 + b3
    sig = lambda v: 1.0 / (1.0 + jnp.exp(-v))
    ambient = sig(o[..., 6:7] - 2.0)
    r1 = sig(o[..., 7:8] + roughness_bias) * (1 - 0.001) + 0.001
    r2 = sig(o[..., 8:9] + roughness_bias) * (1 - 0.001) + 0.001
    tint = sig(o[..., 3:6] + tint_bias)
    f0 = sig(o[..., 9:10] + 3.0) * (1 - 0.001) + 0.001
    diffuse = sig(diffuse_mul * o[..., :3] + diffuse_bias)
    return diffuse, tint, dict(ambient=ambient, diffuse=diffuse, r1=r1, r2=r2,
                               f0=f0, tint=tint)


if __name__ == "__main__":
    key = jax.random.PRNGKey(0)
    B, C, H, FEAPE = 400, 4, 64, 6
    in_mlpC = 3 + C + 2 * FEAPE * C            # 55

    ks = jax.random.split(key, 8)
    pts = jax.random.normal(ks[0], (B, 4), jnp.float32)        # xyz + size
    features = jax.random.normal(ks[1], (B, C), jnp.float32)

    def xavier(k, shape):
        fan_in, fan_out = shape
        gain = float(np.sqrt(2.0))             # relu gain, as in init_weights
        bound = gain * np.sqrt(6.0 / (fan_in + fan_out))
        return jax.random.uniform(k, shape, jnp.float32, -bound, bound)

    def bias(k, n, fan_in):
        bnd = 1.0 / np.sqrt(fan_in)
        return jax.random.uniform(k, (n,), jnp.float32, -bnd, bnd)

    params = (
        xavier(ks[2], (in_mlpC, H)), bias(ks[5], H, in_mlpC),
        xavier(ks[3], (H, H)),       bias(ks[6], H, H),
        xavier(ks[4], (H, 10)),      bias(ks[7], 10, H),
    )

    d_ref, t_ref, e_ref = _mlp_diffuse_ref(pts, features, params, feape=FEAPE)

    # 1) Pure-f32 matmul path on a multi-step grid with batch padding: tight check
    #    (catches any layout / PE-ordering bug well below the bf16 noise floor).
    d32, t32, e32 = mlp_diffuse_pallas(pts, features, params, feape=FEAPE,
                                       tile_b=128, matmul_dtype=jnp.float32)
    jax.block_until_ready(d32)
    assert d32.shape == (B, 3) and t32.shape == (B, 3)
    np.testing.assert_allclose(np.asarray(d32), np.asarray(d_ref), atol=2e-4, rtol=2e-4)
    np.testing.assert_allclose(np.asarray(t32), np.asarray(t_ref), atol=2e-4, rtol=2e-4)
    for name in ("ambient", "diffuse", "r1", "r2", "f0", "tint"):
        np.testing.assert_allclose(np.asarray(e32[name]), np.asarray(e_ref[name]),
                                   atol=2e-4, rtol=2e-4)

    # 2) Default fast path: bf16 MXU operands with f32 accumulation (looser check
    #    purely for bf16 rounding; layout correctness is covered by the f32 run).
    diffuse, tint, extras = mlp_diffuse_pallas(pts, features, params, feape=FEAPE)
    diffuse = jax.block_until_ready(diffuse)
    tint = jax.block_until_ready(tint)
    assert diffuse.shape == (B, 3) and tint.shape == (B, 3)
    np.testing.assert_allclose(np.asarray(diffuse), np.asarray(d_ref), atol=3e-2, rtol=3e-2)
    np.testing.assert_allclose(np.asarray(tint), np.asarray(t_ref), atol=3e-2, rtol=3e-2)
    for name in ("ambient", "diffuse", "r1", "r2", "f0", "tint"):
        np.testing.assert_allclose(np.asarray(extras[name]), np.asarray(e_ref[name]),
                                   atol=3e-2, rtol=3e-2)

    print("KERNEL_OK")
</pallas_src>

<mosaic_0001>
module attributes {stable_mosaic.version = 11 : i64} {
  func.func @_mlp_diffuse_kernel(%arg0: i32, %arg1: memref<128x64xf32, #tpu.memory_space<vmem>>, %arg2: memref<64x64xf32, #tpu.memory_space<vmem>>, %arg3: memref<1x64xf32, #tpu.memory_space<vmem>>, %arg4: memref<64x64xf32, #tpu.memory_space<vmem>>, %arg5: memref<1x64xf32, #tpu.memory_space<vmem>>, %arg6: memref<64x128xf32, #tpu.memory_space<vmem>>, %arg7: memref<1x128xf32, #tpu.memory_space<vmem>>, %arg8: memref<128x128xf32, #tpu.memory_space<vmem>>) attributes {dimension_semantics = [#tpu.dimension_semantics<parallel>], iteration_bounds = array<i64: 4>, scalar_prefetch = 0 : i64, scratch_operands = 0 : i64, tpu.core_type = #tpu.core_type<tc>, window_params = [{transform_indices = @transform_0, window_bounds = array<i64: 128, 64>}, {pipeline_mode = #tpu.pipeline_mode<synchronous>, transform_indices = @transform_1, window_bounds = array<i64: 64, 64>}, {pipeline_mode = #tpu.pipeline_mode<synchronous>, transform_indices = @transform_2, window_bounds = array<i64: 1, 64>}, {pipeline_mode = #tpu.pipeline_mode<synchronous>, transform_indices = @transform_3, window_bounds = array<i64: 64, 64>}, {pipeline_mode = #tpu.pipeline_mode<synchronous>, transform_indices = @transform_4, window_bounds = array<i64: 1, 64>}, {pipeline_mode = #tpu.pipeline_mode<synchronous>, transform_indices = @transform_5, window_bounds = array<i64: 64, 128>}, {pipeline_mode = #tpu.pipeline_mode<synchronous>, transform_indices = @transform_6, window_bounds = array<i64: 1, 128>}, {transform_indices = @transform_7, window_bounds = array<i64: 128, 128>}]} {
    %c0 = arith.constant 0 : index
    %c0_0 = arith.constant 0 : index
    %0 = vector.load %arg1[%c0, %c0_0] : memref<128x64xf32, #tpu.memory_space<vmem>>, vector<128x64xf32>
    %1 = tpu.iota {dimensions = array<i32: 1>} : vector<128x64xi32>
    %c16_i32 = arith.constant 16 : i32
    %2 = vector.broadcast %c16_i32 : i32 to vector<128x64xi32>
    %3 = arith.subi %1, %2 : vector<128x64xi32>
    %c0_i32 = arith.constant 0 : i32
    %4 = vector.broadcast %c0_i32 : i32 to vector<128x64xi32>
    %5 = arith.cmpi sge, %3, %4 : vector<128x64xi32>
    %c6_i32 = arith.constant 6 : i32
    %c0_i32_1 = arith.constant 0 : i32
    %6 = arith.cmpi eq, %c6_i32, %c0_i32_1 : i32
    %c1_i32 = arith.constant 1 : i32
    %7 = arith.select %6, %c1_i32, %c6_i32 : i32
    %8 = vector.broadcast %7 : i32 to vector<128x64xi32>
    %9 = arith.remsi %3, %8 : vector<128x64xi32>
    %c0_i32_2 = arith.constant 0 : i32
    %10 = vector.broadcast %c0_i32_2 : i32 to vector<128x64xi32>
    %11 = arith.cmpi ne, %9, %10 : vector<128x64xi32>
    %c0_i32_3 = arith.constant 0 : i32
    %12 = vector.broadcast %c0_i32_3 : i32 to vector<128x64xi32>
    %13 = arith.cmpi slt, %9, %12 : vector<128x64xi32>
    %c0_i32_4 = arith.constant 0 : i32
    %14 = arith.cmpi slt, %7, %c0_i32_4 : i32
    %15 = vector.broadcast %14 : i1 to vector<128x64xi1>
    %16 = vector.broadcast %15 : vector<128x64xi1> to vector<128x64xi1>
    %17 = arith.xori %13, %16 : vector<128x64xi1>
    %18 = arith.andi %17, %11 : vector<128x64xi1>
    %19 = vector.broadcast %7 : i32 to vector<128x64xi32>
    %20 = arith.addi %9, %19 : vector<128x64xi32>
    %21 = arith.select %18, %20, %9 : vector<128x64xi1>, vector<128x64xi32>
    %c0_i32_5 = arith.constant 0 : i32
    %22 = vector.broadcast %c0_i32_5 : i32 to vector<128x64xi32>
    %23 = arith.select %5, %21, %22 : vector<128x64xi1>, vector<128x64xi32>
    %cst = arith.constant 1.000000e+00 : f32
    %24 = vector.broadcast %cst : f32 to vector<128x64xf32>
    %c1_i32_6 = arith.constant 1 : i32
    %25 = vector.broadcast %c1_i32_6 : i32 to vector<128x64xi32>
    %26 = arith.cmpi eq, %23, %25 : vector<128x64xi32>
    %cst_7 = arith.constant 2.000000e+00 : f32
    %27 = vector.broadcast %cst_7 : f32 to vector<128x64xf32>
    %28 = arith.select %26, %27, %24 : vector<128x64xi1>, vector<128x64xf32>
    %c2_i32 = arith.constant 2 : i32
    %29 = vector.broadcast %c2_i32 : i32 to vector<128x64xi32>
    %30 = arith.cmpi eq, %23, %29 : vector<128x64xi32>
    %cst_8 = arith.constant 4.000000e+00 : f32
    %31 = vector.broadcast %cst_8 : f32 to vector<128x64xf32>
    %32 = arith.select %30, %31, %28 : vector<128x64xi1>, vector<128x64xf32>
    %c3_i32 = arith.constant 3 : i32
    %33 = vector.broadcast %c3_i32 : i32 to vector<128x64xi32>
    %34 = arith.cmpi eq, %23, %33 : vector<128x64xi32>
    %cst_9 = arith.constant 8.000000e+00 : f32
    %35 = vector.broadcast %cst_9 : f32 to vector<128x64xf32>
    %36 = arith.select %34, %35, %32 : vector<128x64xi1>, vector<128x64xf32>
    %c4_i32 = arith.constant 4 : i32
    %37 = vector.broadcast %c4_i32 : i32 to vector<128x64xi32>
    %38 = arith.cmpi eq, %23, %37 : vector<128x64xi32>
    %cst_10 = arith.constant 1.600000e+01 : f32
    %39 = vector.broadcast %cst_10 : f32 to vector<128x64xf32>
    %40 = arith.select %38, %39, %36 : vector<128x64xi1>, vector<128x64xf32>
    %c5_i32 = arith.constant 5 : i32
    %41 = vector.broadcast %c5_i32 : i32 to vector<128x64xi32>
    %42 = arith.cmpi eq, %23, %41 : vector<128x64xi32>
    %cst_11 = arith.constant 3.200000e+01 : f32
    %43 = vector.broadcast %cst_11 : f32 to vector<128x64xf32>
    %44 = arith.select %42, %43, %40 : vector<128x64xi1>, vector<128x64xf32>
    %c24_i32 = arith.constant 24 : i32
    %45 = vector.broadcast %c24_i32 : i32 to vector<128x64xi32>
    %46 = arith.cmpi sge, %3, %45 : vector<128x64xi32>
    %cst_12 = arith.constant 1.57079637 : f32
    %cst_13 = arith.constant 0.000000e+00 : f32
    %47 = vector.broadcast %cst_12 : f32 to vector<128x64xf32>
    %48 = vector.broadcast %cst_13 : f32 to vector<128x64xf32>
    %49 = arith.select %46, %47, %48 : vector<128x64xi1>, vector<128x64xf32>
    %c0_i32_14 = arith.constant 0 : i32
    %50 = vector.broadcast %c0_i32_14 : i32 to vector<128x64xi32>
    %51 = arith.cmpi sge, %3, %50 : vector<128x64xi32>
    %52 = arith.mulf %0, %44 : vector<128x64xf32>
    %53 = arith.addf %52, %49 : vector<128x64xf32>
    %54 = math.sin %53 : vector<128x64xf32>
    %55 = arith.select %51, %54, %0 : vector<128x64xi1>, vector<128x64xf32>
    %c0_15 = arith.constant 0 : index
    %c0_16 = arith.constant 0 : index
    %56 = vector.load %arg2[%c0_15, %c0_16] : memref<64x64xf32, #tpu.memory_space<vmem>>, vector<64x64xf32>
    %cst_17 = arith.constant dense<0.000000e+00> : vector<128x64xf32>
    %57 = tpu.matmul %55, %56, %cst_17 {dimension_numbers = #tpu.dot_dimension_numbers<[1], [0], [0], [1], [0, 0, 1, 1], [], []>} : vector<128x64xf32>, vector<64x64xf32>, vector<128x64xf32> -> vector<128x64xf32>
    %c0_18 = arith.constant 0 : index
    %c0_19 = arith.constant 0 : index
    %58 = vector.load %arg3[%c0_18, %c0_19] : memref<1x64xf32, #tpu.memory_space<vmem>>, vector<1x64xf32>
    %59 = vector.broadcast %58 : vector<1x64xf32> to vector<128x64xf32>
    %60 = arith.addf %57, %59 : vector<128x64xf32>
    %cst_20 = arith.constant 0.000000e+00 : f32
    %61 = vector.broadcast %cst_20 : f32 to vector<128x64xf32>
    %62 = arith.maximumf %60, %61 : vector<128x64xf32>
    %c0_21 = arith.constant 0 : index
    %c0_22 = arith.constant 0 : index
    %63 = vector.load %arg4[%c0_21, %c0_22] : memref<64x64xf32, #tpu.memory_space<vmem>>, vector<64x64xf32>
    %cst_23 = arith.constant dense<0.000000e+00> : vector<128x64xf32>
    %64 = tpu.matmul %62, %63, %cst_23 {dimension_numbers = #tpu.dot_dimension_numbers<[1], [0], [0], [1], [0, 0, 1, 1], [], []>} : vector<128x64xf32>, vector<64x64xf32>, vector<128x64xf32> -> vector<128x64xf32>
    %c0_24 = arith.constant 0 : index
    %c0_25 = arith.constant 0 : index
    %65 = vector.load %arg5[%c0_24, %c0_25] : memref<1x64xf32, #tpu.memory_space<vmem>>, vector<1x64xf32>
    %66 = vector.broadcast %65 : vector<1x64xf32> to vector<128x64xf32>
    %67 = arith.addf %64, %66 : vector<128x64xf32>
    %cst_26 = arith.constant 0.000000e+00 : f32
    %68 = vector.broadcast %cst_26 : f32 to vector<128x64xf32>
    %69 = arith.maximumf %67, %68 : vector<128x64xf32>
    %c0_27 = arith.constant 0 : index
    %c0_28 = arith.constant 0 : index
    %70 = vector.load %arg6[%c0_27, %c0_28] : memref<64x128xf32, #tpu.memory_space<vmem>>, vector<64x128xf32>
    %cst_29 = arith.constant dense<0.000000e+00> : vector<128x128xf32>
    %71 = tpu.matmul %69, %70, %cst_29 {dimension_numbers = #tpu.dot_dimension_numbers<[1], [0], [0], [1], [0, 0, 1, 1], [], []>} : vector<128x64xf32>, vector<64x128xf32>, vector<128x128xf32> -> vector<128x128xf32>
    %c0_30 = arith.constant 0 : index
    %c0_31 = arith.constant 0 : index
    %72 = vector.load %arg7[%c0_30, %c0_31] : memref<1x128xf32, #tpu.memory_space<vmem>>, vector<1x128xf32>
    %73 = vector.broadcast %72 : vector<1x128xf32> to vector<128x128xf32>
    %74 = arith.addf %71, %73 : vector<128x128xf32>
    %cst_32 = arith.constant 0.000000e+00 : f32
    %75 = vector.broadcast %cst_32 : f32 to vector<128x128xf32>
    %76 = arith.subf %75, %74 : vector<128x128xf32>
    %77 = math.exp %76 : vector<128x128xf32>
    %cst_33 = arith.constant 1.000000e+00 : f32
    %78 = vector.broadcast %cst_33 : f32 to vector<128x128xf32>
    %79 = arith.addf %78, %77 : vector<128x128xf32>
    %cst_34 = arith.constant 1.000000e+00 : f32
    %80 = vector.broadcast %cst_34 : f32 to vector<128x128xf32>
    %81 = arith.divf %80, %79 : vector<128x128xf32>
    %82 = tpu.iota {dimensions = array<i32: 1>} : vector<128x128xi32>
    %c7_i32 = arith.constant 7 : i32
    %83 = vector.broadcast %c7_i32 : i32 to vector<128x128xi32>
    %84 = arith.cmpi sge, %82, %83 : vector<128x128xi32>
    %c9_i32 = arith.constant 9 : i32
    %85 = vector.broadcast %c9_i32 : i32 to vector<128x128xi32>
    %86 = arith.cmpi sle, %82, %85 : vector<128x128xi32>
    %87 = arith.andi %84, %86 : vector<128x128xi1>
    %cst_35 = arith.constant 9.990000e-01 : f32
    %88 = vector.broadcast %cst_35 : f32 to vector<128x128xf32>
    %89 = arith.mulf %81, %88 : vector<128x128xf32>
    %cst_36 = arith.constant 1.000000e-03 : f32
    %90 = vector.broadcast %cst_36 : f32 to vector<128x128xf32>
    %91 = arith.addf %89, %90 : vector<128x128xf32>
    %92 = arith.select %87, %91, %81 : vector<128x128xi1>, vector<128x128xf32>
    %c0_37 = arith.constant 0 : index
    %c0_38 = arith.constant 0 : index
    %93 = vector.load %arg8[%c0_37, %c0_38] : memref<128x128xf32, #tpu.memory_space<vmem>>, vector<128x128xf32>
    tpu.vector_store %arg8[%c0_37, %c0_38], %92 {strides = array<i32>} : memref<128x128xf32, #tpu.memory_space<vmem>>, vector<128x128xf32>,
    return
  }
  func.func @transform_0(%arg0: i32) -> (i32, i32) {
    %c0_i32 = arith.constant 0 : i32
    %c0_i32_0 = arith.constant 0 : i32
    return %arg0, %c0_i32 : i32, i32
  }
  func.func @transform_1(%arg0: i32) -> (i32, i32) {
    %c0_i32 = arith.constant 0 : i32
    %c0_i32_0 = arith.constant 0 : i32
    %c0_i32_1 = arith.constant 0 : i32
    return %c0_i32, %c0_i32_0 : i32, i32
  }
  func.func @transform_2(%arg0: i32) -> (i32, i32) {
    %c0_i32 = arith.constant 0 : i32
    %c0_i32_0 = arith.constant 0 : i32
    %c0_i32_1 = arith.constant 0 : i32
    return %c0_i32, %c0_i32_0 : i32, i32
  }
  func.func @transform_3(%arg0: i32) -> (i32, i32) {
    %c0_i32 = arith.constant 0 : i32
    %c0_i32_0 = arith.constant 0 : i32
    %c0_i32_1 = arith.constant 0 : i32
    return %c0_i32, %c0_i32_0 : i32, i32
  }
  func.func @transform_4(%arg0: i32) -> (i32, i32) {
    %c0_i32 = arith.constant 0 : i32
    %c0_i32_0 = arith.constant 0 : i32
    %c0_i32_1 = arith.constant 0 : i32
    return %c0_i32, %c0_i32_0 : i32, i32
  }
  func.func @transform_5(%arg0: i32) -> (i32, i32) {
    %c0_i32 = arith.constant 0 : i32
    %c0_i32_0 = arith.constant 0 : i32
    %c0_i32_1 = arith.constant 0 : i32
    return %c0_i32, %c0_i32_0 : i32, i32
  }
  func.func @transform_6(%arg0: i32) -> (i32, i32) {
    %c0_i32 = arith.constant 0 : i32
    %c0_i32_0 = arith.constant 0 : i32
    %c0_i32_1 = arith.constant 0 : i32
    return %c0_i32, %c0_i32_0 : i32, i32
  }
  func.func @transform_7(%arg0: i32) -> (i32, i32) {
    %c0_i32 = arith.constant 0 : i32
    %c0_i32_0 = arith.constant 0 : i32
    return %arg0, %c0_i32 : i32, i32
  }
}

</mosaic_0001>

<bundles_post_ra>
// kernel: tpu_custom_call.1
= control target key start
LH: loop header
LB: loop body
LE: loop exit
PB: predicated region body
PF: predicated region fallthrough
CT: control target
= control target key end

     0   :  { %12 = vsyncpa [#allocation3], 0  ;;  %s5427_s0 = inlined_call_operand.vmem [shape: f32[512,64], index: 0, kind: input, shape index: {}]   ;;  %s5428_s1 = inlined_call_operand.vmem [shape: f32[64,64], index: 1, kind: input, shape index: {}]   ;;  %s5429_s2 = inlined_call_operand.vmem [shape: f32[1,64], index: 2, kind: input, shape index: {}]   ;;  %s5430_s3 = inlined_call_operand.vmem [shape: f32[64,64], index: 3, kind: input, shape index: {}]   ;;  %s5431_s4 = inlined_call_operand.vmem [shape: f32[1,64], index: 4, kind: input, shape index: {}]   ;;  %s5432_s5 = inlined_call_operand.vmem [shape: f32[64,128], index: 5, kind: input, shape index: {}]   ;;  %s5433_s6 = inlined_call_operand.vmem [shape: f32[1,128], index: 6, kind: input, shape index: {}]   ;;  %s5434_s7 = inlined_call_operand.hbm [shape: f32[512,128], index: 7, kind: output, shape index: {}]  }
   0x1   :  { %14 = vsyncpa [#allocation3 + $0x1], 0  ;;  %s3678_s24 = smov 0   ;;  %s3680_s25 = smov 0  }
   0x2   :  { %s3682_s26 = smov 0   ;;  %s3684_s27 = smov 0  }
   0x3 LB: > { %s3699_s28 = sadd.s32 4294967295, %s3625_s27   ;;  %s2937_s29 = sadd.s32 4294967294, %s3625_s27   ;;  %s3625_s27 = sphi %s3684_s27, %s5470_s27   ;;  %s3621_s26 = sphi %s3682_s26, %s5469_s26   ;;  %s3617_s25 = sphi %s3680_s25, %s5468_s25   ;;  %s3613_s24 = sphi %s3678_s24, %s5467_s24  }
   0x4   : > { %s3703_s30 = sadd.s32 1, %s3625_s27   ;;  %s179_s8 = sadd.s32 1, %s3621_s26 }
   0x5   : > { %s176_s9 = ssub.s32 %s3625_s27, %s3703_s30  ;;  %p189_p0 = scmp.ne.s32.totalorder %s3621_s26, %s3617_s25 }
   0x6   : > { %p177_p1 = scmp.eq.s32.totalorder %s176_s9, 0  ;;  %p190_p2 = scmp.eq.s32.totalorder %s3699_s28, 3 }
   0x7   : > { %p195_p3 = scmp.ne.s32.totalorder %s3617_s25, %s3613_s24  ;;  %p196_p4 = scmp.eq.s32.totalorder %s2937_s29, 3 }
   0x8   : > { %s3714_s10 = scalar_select %p177_p1, %s3621_s26, %s179_s8  }
   0x9   : > { %p3716_p5 = por %p190_p2, %p189_p0  ;;  %p3720_p6 = por %p196_p4, %p195_p3 }
   0xa   : > { %p2940_p7 = scmp.ge.s32.totalorder %s3625_s27, 1  ;;  %p241_p8 = scmp.lt.s32.totalorder %s3625_s27, 5 }
   0xc   : > { %p242_p9 = pnand %p2940_p7, %p241_p8 }
   0xd   : > { %v2041_v0 = vld [vmem:[%s5428_s1] sm:$0xff] (!%p242_p9)  ;;  %v2042_v1 = vld [vmem:[%s5428_s1 + $0x8] sm:$0xff] (!%p242_p9)  ;;  %v2043_v2 = vld [vmem:[%s5428_s1 + $0x10] sm:$0xff] (!%p242_p9)  ;;  %v296_v3 = vlaneseq (!%p242_p9)  ;;  %s2942_s15 = sshll.u32 (!%p242_p9), %s3699_s28, 4  ;;  %v3627_v27 = vmov (!%p242_p9), 1.0   ;;  %v3628_v36 = vmov (!%p242_p9), 0.0  }
   0xe   : > { %245 = sbr.rel (%p242_p9) target bundleno = 1190 (0x4a6), region = 48  ;;  %v3259_v4 = vpack.c.bf16 (!%p242_p9), %v2042_v1, %v2041_v0  ;;  %v2044_v5 = vld [vmem:[%s5428_s1 + $0x18] sm:$0xff] (!%p242_p9)  ;;  %v2045_v7 = vld [vmem:[%s5428_s1 + $0x20] sm:$0xff] (!%p242_p9)  ;;  %v2046_v8 = vld [vmem:[%s5428_s1 + $0x28] sm:$0xff] (!%p242_p9)  ;;  %p274_p10 = scmp.lt.s32.totalorder (!%p242_p9), %s2942_s15, 63 }
   0xf   : > { %v3263_v6 = vpack.c.bf16 (!%p242_p9), %v2044_v5, %v2043_v2  ;;  %v3744_v9 = vand.u32 (!%p242_p9), 127, %v296_v3  ;;  %v3267_v11 = vpack.c.bf16 (!%p242_p9), %v2046_v8, %v2045_v7  ;;  %v2047_v12 = vld [vmem:[%s5428_s1 + $0x30] sm:$0xff] (!%p242_p9)  ;;  %v2048_v13 = vld [vmem:[%s5428_s1 + $0x38] sm:$0xff] (!%p242_p9)  ;;  %s3066_s20 = sshll.u32 (!%p242_p9), %s3699_s28, 11  ;;  %s3635_s8 = smov (!%p242_p9), [#allocation2]  }
  0x10   : > { %3260 = vmatprep.subr.bf16.mxu0 (!%p242_p9), %v3259_v4  ;;  %3307 = vmatprep.subr.bf16.mxu1 (!%p242_p9), %v3259_v4  ;;  %v3271_v16 = vpack.c.bf16 (!%p242_p9), %v2048_v13, %v2047_v12  ;;  %s5374_s23 = scalar_lea.hbm (!%p242_p9), %s5434_s7, %s3066_s20  ;;  %s3567_s9 = sshll.u32 (!%p242_p9), %s3635_s8, 4  ;;  %s3568_s9 = int_to_ptr.vmem [resolvable:$false] %s3567_s9 }
  0x11   : > { %3262 = vmatpush3.bf16.msra.mxu0 (!%p242_p9), %v3259_v4  ;;  %v3747_v10 = vadd.s32 (!%p242_p9), 4294967280, %v3744_v9  ;;  %3311 = vmatpush3.bf16.msra.mxu1 (!%p242_p9), %v3259_v4  ;;  %s3569_s13 = scalar_lea.vmem (!%p242_p9), %s3568_s9, 4096 }
  0x12   : > { %3264 = vmatprep.subr.bf16.mxu0 (!%p242_p9), %v3263_v6  ;;  %3308 = vmatprep.subr.bf16.mxu1 (!%p242_p9), %v3263_v6 }
  0x13   : > { %v301_v14 = vsub.s32 (!%p242_p9), 0, %v3747_v10  ;;  %vm300_vm0 = vcmp.lt.s32.totalorder (!%p242_p9), %v3747_v10, 0  ;;  %vm299_vm1 = vcmp.ge.s32.totalorder (!%p242_p9), %v3747_v10, 0  ;;  %vm327_vm10 = vcmp.ge.s32.totalorder (!%p242_p9), %v3747_v10, 24 }
  0x14   : > { %v3783_v37 = vsel (!%p242_p9), %vm327_vm10, 1.5707964, %v3628_v36 }
  0x15   : > { %3266 = vmatpush3.bf16.msra.mxu0 %v3263_v6  ;;  %v2945_v15 = vmin.u32 %v3747_v10, %v301_v14  ;;  %3312 = vmatpush3.bf16.msra.mxu1 %v3263_v6  ;;  %s5472_s15 = smov (!%p274_p10, %s2942_s15), 63 }
  0x16   : > { %3268 = vmatprep.subr.bf16.mxu0 %v3267_v11  ;;  %3309 = vmatprep.subr.bf16.mxu1 %v3267_v11  ;;  %s2943_s16 = sshll.u32 %s5472_s15, 3 }
  0x17   : > { %v3757_v17 = vmul.u32.u64.low 2863311531, %v2945_v15  ;;  %v3758_v18 = vmul.u32.u64.high 2863311531, %v2945_v15, %v3757_v17  ;;  %s3769_s19 = scalar_lea.vmem %s5427_s0, %s2943_s16  ;;  %s270_s16 = sand.u32 1, %s3617_s25  }
  0x18   : > { %v3773_v30 = vld [vmem:[%s3769_s19] sm:$0xff]  ;;  %v3776_v32 = vld [vmem:[%s3769_s19 + $0x8] sm:$0xff]  ;;  %v3779_v33 = vld [vmem:[%s3769_s19 + $0x10] sm:$0xff]  ;;  %v3629_v17 = vmov 683565275   ;;  %s2941_s17 = sshll.u32 %s270_s16, 7 }
  0x19   : > { %3270 = vmatpush3.bf16.msra.mxu0 %v3267_v11  ;;  %3313 = vmatpush3.bf16.msra.mxu1 %v3267_v11  ;;  %v306_v19 = vshrl.u32 %v3758_v18, 2  ;;  %v283_v50 = vld [vmem:[%s3769_s19 + $0x18] sm:$0xff]  ;;  %v284_v58 = vld [vmem:[%s3769_s19 + $0x20] sm:$0xff]  ;;  %v285_v61 = vld [vmem:[%s3769_s19 + $0x28] sm:$0xff]  ;;  %s5319_s18 = scalar_lea.vmem [#allocation2], %s2941_s17  ;;  %s5386_s28 = scalar_lea.sflag [#allocation3], %s270_s16 }
  0x1a   : > { %3272 = vmatprep.subr.bf16.mxu0 %v3271_v16  ;;  %3310 = vmatprep.subr.bf16.mxu1 %v3271_v16  ;;  %s2875_s21 = sshll.u32 %s5319_s18, 4  ;;  %s5376_s21 = int_to_ptr.vmem [resolvable:$true] %s2875_s21 }
  0x1b   : > { %v307_v20 = vmul.u32 6, %v306_v19  ;;  %v3630_v19 = vmov 2475754826   ;;  %s3563_s29 = scalar_lea.vmem %s5376_s21, 2048  ;;  %p3570_p0 = scmp.lt.s32.totalorder %s5376_s21, %s3568_s9 }
  0x1c   : > { %p3564_p11 = scmp.ne.s32.totalorder %s5376_s21, %s3563_s29  ;;  %p3571_p1 = scmp.lt.s32.totalorder %s3569_s13, %s3563_s29 }
  0x1d   : > { %3274 = vmatpush3.bf16.msra.mxu0 %v3271_v16  ;;  %3314 = vmatpush3.bf16.msra.mxu1 %v3271_v16  ;;  %v308_v21 = vsub.s32 %v2945_v15, %v307_v20 }
  0x1e   : > { %p3565_p12 = pnand %p3564_p11, %p3716_p5  ;;  %p3572_p2 = por %p3571_p1, %p3570_p0 }
  0x1f   : > { %v309_v22 = vsub.s32 0, %v308_v21 }
  0x20   : > { %p3566_p13 = pneg %p3565_p12 }
  0x21   : > { %v310_v23 = vsel %vm300_vm0, %v309_v22, %v308_v21  ;;  %v3631_v21 = vmov 2131351028  }
  0x22   : > { %vm311_vm2 = vcmp.ne.s32.totalorder %v310_v23, 0  ;;  %vm312_vm3 = vcmp.lt.s32.totalorder %v310_v23, 0  ;;  %v314_v24 = vadd.s32 6, %v310_v23  ;;  %p3573_p3 = pnand %p3572_p2, %p3566_p13 }
  0x23   : > { %vm313_vm4 = vmand %vm312_vm3, %vm311_vm2 }
  0x24   : > { %v315_v25 = vsel %vm313_vm4, %v314_v24, %v310_v23  ;;  %v3632_v23 = vmov 2102212464  }
  0x25   : > { %v316_v26 = vsel %vm299_vm1, %v315_v25, 0  ;;  %v3633_v25 = vmov 920167782  }
  0x26   : > { %vm317_vm5 = vcmp.eq.s32.totalorder %v316_v26, 1  ;;  %vm319_vm6 = vcmp.eq.s32.totalorder %v316_v26, 2  ;;  %vm321_vm7 = vcmp.eq.s32.totalorder %v316_v26, 3  ;;  %vm323_vm8 = vcmp.eq.s32.totalorder %v316_v26, 4 }
  0x27   : > { %v318_v28 = vsel %vm317_vm5, 2.0, %v3627_v27  ;;  %vm325_vm9 = vcmp.eq.s32.totalorder %v316_v26, 5 }
  0x28   : > { %v320_v29 = vsel %vm319_vm6, 4.0, %v318_v28 }
  0x29   : > { %v322_v31 = vsel %vm321_vm7, 8.0, %v320_v29 }
  0x2a   : > { %v324_v34 = vsel %vm323_vm8, 16.0, %v322_v31 }
  0x2b   : > { %v3781_v35 = vsel %vm325_vm9, 32.0, %v324_v34 }
  0x2c   : > { %v329_v38 = vmul.f32 %v3781_v35, %v3773_v30  ;;  %v330_v39 = vmul.f32 %v3781_v35, %v3776_v32  ;;  %v331_v40 = vmul.f32 %v3781_v35, %v3779_v33  ;;  %v332_v57 = vmul.f32 %v3781_v35, %v283_v50 }
  0x2d   : > { %v3815_v2 = vmul.f32 %v3781_v35, %v284_v58  ;;  %v3821_v5 = vmul.f32 %v3781_v35, %v285_v61 }
  0x2e   : > { %v3792_v41 = vadd.f32 %v329_v38, %v3783_v37  ;;  %v3795_v42 = vadd.f32 %v330_v39, %v3783_v37  ;;  %v3798_v43 = vadd.f32 %v331_v40, %v3783_v37  ;;  %v3818_v4 = vadd.f32 %v332_v57, %v3783_v37 }
  0x2f   : > { %v3634_v38 = vmov 1326507024  }
  0x30   : > { %v361_v44 = vand.u32 2147483647, %v3792_v41  ;;  %v364_v45 = vand.u32 2139095040, %v3792_v41  ;;  %v465_v46 = vand.u32 2147483647, %v3795_v42  ;;  %v468_v47 = vand.u32 2139095040, %v3795_v42 }
  0x31   : > { %v572_v53 = vand.u32 2139095040, %v3798_v43  ;;  %v569_v0 = vand.u32 2147483647, %v3798_v43  ;;  %vm363_vm8 = vcmp.lt.s32.totalorder %v3792_v41, 0 }
  0x32   : > { %v365_v48 = vshrl.u32 %v364_v45, 23  ;;  %v368_v49 = vand.u32 8388607, %v361_v44  ;;  %v469_v51 = vshrl.u32 %v468_v47, 23  ;;  %v472_v52 = vand.u32 8388607, %v465_v46 }
  0x33   : > { %v573_v56 = vshrl.u32 %v572_v53, 23  ;;  %v3829_v14 = vand.u32 8388607, %v569_v0  ;;  %vm3924_vm10 = vcmp.le.f32.partialorder %v361_v44, 0.7853982 }
  0x34   : > { %v2946_v54 = vadd.s32 4294967169, %v365_v48  ;;  %v2950_v55 = vadd.s32 4294967169, %v469_v51  ;;  %v369_v59 = vor.u32 8388608, %v368_v49  ;;  %v473_v62 = vor.u32 8388608, %v472_v52 }
  0x35   : > { %v2954_v1 = vadd.s32 4294967169, %v573_v56 }
  0x36   : > { %v371_v60 = vadd.s32 1, %v2946_v54  ;;  %v475_v63 = vadd.s32 1, %v2950_v55  ;;  %v3823_v8 = vshll.u32 %v369_v59, 8  ;;  %v3825_v13 = vshll.u32 %v473_v62, 8 }
  0x37   : > { %v3831_v15 = vadd.s32 1, %v2954_v1 }
  0x38   : > { %vm372_vm11 = vcmp.gt.s32.totalorder %v371_v60, 0  ;;  %vm476_vm12 = vcmp.gt.s32.totalorder %v475_v63, 0 }
  0x39   : > { %v373_v3 = vsel %vm372_vm11, %v371_v60, 0  ;;  %v477_v11 = vsel %vm476_vm12, %v475_v63, 0  ;;  %vm580_vm2 = vcmp.gt.s32.totalorder %v3831_v15, 0 }
  0x3a   : > { %v374_v6 = vshrl.u32 %v373_v3, 5  ;;  %v375_v7 = vand.u32 31, %v373_v3  ;;  %v479_v12 = vand.u32 31, %v477_v11  ;;  %v3838_v27 = vshrl.u32 %v477_v11, 5 }
  0x3c   : > { %v376_v16 = vsub.s32 32, %v375_v7  ;;  %v378_v18 = vshll.u32 %v3629_v17, %v375_v7  ;;  %v381_v20 = vshll.u32 %v3630_v19, %v375_v7  ;;  %v384_v22 = vshll.u32 %v3631_v21, %v375_v7 }
  0x3d   : > { %v387_v24 = vshll.u32 %v3632_v23, %v375_v7  ;;  %v390_v26 = vshll.u32 %v3633_v25, %v375_v7  ;;  %vm393_vm13 = vcmp.lt.s32.totalorder %v374_v6, 1  ;;  %vm394_vm14 = vcmp.lt.s32.totalorder %v374_v6, 2 }
  0x3e   : > { %v377_v28 = vshrl.u32 %v3629_v17, %v376_v16  ;;  %v379_v29 = vshrl.u32 %v3630_v19, %v376_v16  ;;  %v382_v31 = vshrl.u32 %v3631_v21, %v376_v16  ;;  %v385_v34 = vshrl.u32 %v3632_v23, %v376_v16 }
  0x3f   : > { %v388_v36 = vshrl.u32 %v3633_v25, %v376_v16  ;;  %v391_v39 = vshrl.u32 %v3634_v38, %v376_v16  ;;  %vm396_vm15 = vcmp.lt.s32.totalorder %v374_v6, 4  ;;  %v480_v48 = vsub.s32 32, %v479_v12 }
  0x40   : > { %v380_v40 = vor.u32 %v379_v29, %v378_v18  ;;  %v383_v45 = vor.u32 %v382_v31, %v381_v20  ;;  %v386_v47 = vor.u32 %v385_v34, %v384_v22  ;;  %vm395_vm0 = vcmp.lt.s32.totalorder %v374_v6, 3 }
  0x41   : > { %v389_v49 = vor.u32 %v388_v36, %v387_v24  ;;  %v392_v50 = vor.u32 %v391_v39, %v390_v26  ;;  %v482_v51 = vshll.u32 %v3629_v17, %v479_v12  ;;  %v485_v59 = vshll.u32 %v3630_v19, %v479_v12 }
  0x42   : > { %v397_v52 = vsel %vm393_vm13, %v377_v28, %v380_v40  ;;  %v398_v53 = vsel %vm396_vm15, %v386_v47, 2102212464  ;;  %v401_v54 = vsel %vm393_vm13, %v380_v40, %v383_v45  ;;  %v405_v55 = vsel %vm393_vm13, %v383_v45, %v386_v47 }
  0x43   : > { %v399_v56 = vsel %vm395_vm0, %v383_v45, %v398_v53  ;;  %v402_v57 = vsel %vm396_vm15, %v389_v49, 920167782  ;;  %v406_v58 = vsel %vm396_vm15, %v392_v50, 1326507024  ;;  %v481_v62 = vshrl.u32 %v3629_v17, %v480_v48 }
  0x44   : > { %v403_v60 = vsel %vm395_vm0, %v386_v47, %v402_v57  ;;  %v407_v61 = vsel %vm395_vm0, %v389_v49, %v406_v58  ;;  %v483_v63 = vshrl.u32 %v3630_v19, %v480_v48  ;;  %v400_v1 = vsel %vm394_vm14, %v397_v52, %v399_v56 }
  0x45   : > { %v404_v3 = vsel %vm394_vm14, %v401_v54, %v403_v60  ;;  %v408_v7 = vsel %vm394_vm14, %v405_v55, %v407_v61  ;;  %v486_v11 = vshrl.u32 %v3631_v21, %v480_v48  ;;  %v488_v28 = vshll.u32 %v3631_v21, %v479_v12 }
  0x46   : > { %v3859_v16 = vmul.u32.u64.low %v3823_v8, %v408_v7  ;;  %v3860_v18 = vmul.u32.u64.high %v3823_v8, %v408_v7, %v3859_v16  ;;  %v3863_v20 = vmul.u32.u64.low %v3823_v8, %v404_v3  ;;  %v3864_v22 = vmul.u32.u64.high %v3823_v8, %v404_v3, %v3863_v20 }
  0x47   : > { %v484_v24 = vor.u32 %v483_v63, %v482_v51  ;;  %v487_v26 = vor.u32 %v486_v11, %v485_v59  ;;  %v489_v29 = vshrl.u32 %v3632_v23, %v480_v48  ;;  %v491_v6 = vshll.u32 %v3632_v23, %v479_v12 }
  0x48   : > { %v492_v31 = vshrl.u32 %v3633_v25, %v480_v48  ;;  %v494_v34 = vshll.u32 %v3633_v25, %v479_v12  ;;  %v495_v36 = vshrl.u32 %v3634_v38, %v480_v48  ;;  %v416_v39 = vmul.u32 %v3823_v8, %v400_v1 }
  0x49   : > { %v490_v40 = vor.u32 %v489_v29, %v488_v28  ;;  %vm497_vm3 = vcmp.lt.s32.totalorder %v3838_v27, 1  ;;  %vm498_vm4 = vcmp.lt.s32.totalorder %v3838_v27, 2  ;;  %vm418_vm5 = vc.u32 %v3860_v18, %v3863_v20 }
  0x4a   : > { %v419_v45 = vadd.s32 1, %v3864_v22  ;;  %v493_v47 = vor.u32 %v492_v31, %v491_v6  ;;  %vm499_vm6 = vcmp.lt.s32.totalorder %v3838_v27, 3  ;;  %v496_v49 = vor.u32 %v495_v36, %v494_v34 }
  0x4b   : > { %vm500_vm7 = vcmp.lt.s32.totalorder %v3838_v27, 4  ;;  %v501_v12 = vsel %vm497_vm3, %v481_v62, %v484_v24  ;;  %v505_v48 = vsel %vm497_vm3, %v484_v24, %v487_v26  ;;  %v509_v52 = vsel %vm497_vm3, %v487_v26, %v490_v40 }
  0x4c   : > { %v420_v8 = vsel %vm418_vm5, %v419_v45, %v3864_v22  ;;  %v502_v50 = vsel %vm500_vm7, %v490_v40, 2102212464  ;;  %v506_v51 = vsel %vm500_vm7, %v493_v47, 920167782  ;;  %v510_v56 = vsel %vm500_vm7, %v496_v49, 1326507024 }
  0x4d   : > { %v421_v53 = vadd.s32 %v420_v8, %v416_v39  ;;  %v503_v54 = vsel %vm499_vm6, %v487_v26, %v502_v50  ;;  %v507_v55 = vsel %vm499_vm6, %v490_v40, %v506_v51  ;;  %v511_v59 = vsel %vm499_vm6, %v493_v47, %v510_v56 }
  0x4e   : > { %v504_v57 = vsel %vm498_vm4, %v501_v12, %v503_v54  ;;  %v508_v58 = vsel %vm498_vm4, %v505_v48, %v507_v55  ;;  %v581_v60 = vsel %vm580_vm2, %v3831_v15, 0  ;;  %v512_v62 = vsel %vm498_vm4, %v509_v52, %v511_v59 }
  0x4f   : > { %v422_v61 = vadd.s32 536870912, %v421_v53  ;;  %v3892_v63 = vmul.u32.u64.low %v3825_v13, %v508_v58  ;;  %v3893_v1 = vmul.u32.u64.high %v3825_v13, %v508_v58, %v3892_v63  ;;  %v577_v11 = vor.u32 8388608, %v3829_v14 }
  0x50   : > { %v3897_v3 = vmul.u32.u64.low %v3825_v13, %v512_v62  ;;  %v3898_v7 = vmul.u32.u64.high %v3825_v13, %v512_v62, %v3897_v3  ;;  %v673_v16 = vand.u32 2147483647, %v3818_v4  ;;  %v583_v24 = vand.u32 31, %v581_v60 }
  0x51   : > { %v423_v22 = vshrl.u32 %v422_v61, 30  ;;  %v520_v15 = vmul.u32 %v3825_v13, %v504_v57  ;;  %v3905_v27 = vadd.f32 %v3815_v2, %v3783_v37  ;;  %v3909_v26 = vadd.f32 %v3821_v5, %v3783_v37 }
  0x52   : > { %v523_v29 = vadd.s32 1, %v3893_v1  ;;  %v584_v14 = vsub.s32 32, %v583_v24  ;;  %vm522_vm9 = vc.u32 %v3898_v7, %v3892_v63  ;;  %v3915_v6 = vshll.u32 %v577_v11, 8 }
  0x53   : > { %v424_v28 = vshll.u32 %v423_v22, 30  ;;  %v676_v13 = vand.u32 2139095040, %v3818_v4  ;;  %v3920_v2 = vand.u32 8388607, %v673_v16  ;;  %v447_v34 = vsub.s32 4, %v423_v22 }
  0x54   : > { %v524_v36 = vsel %vm522_vm9, %v523_v29, %v3893_v1  ;;  %v582_v39 = vshrl.u32 %v581_v60, 5  ;;  %v586_v45 = vshll.u32 %v3629_v17, %v583_v24  ;;  %v587_v47 = vshrl.u32 %v3630_v19, %v584_v14 }
  0x55   : > { %v3928_v31 = vsub.s32 %v421_v53, %v424_v28  ;;  %v525_v40 = vadd.s32 %v524_v36, %v520_v15  ;;  %v589_v49 = vshll.u32 %v3630_v19, %v583_v24  ;;  %v590_v44 = vshrl.u32 %v3631_v21, %v584_v14 }
  0x56   : > { %v592_v48 = vshll.u32 %v3631_v21, %v583_v24  ;;  %v593_v8 = vshrl.u32 %v3632_v23, %v584_v14  ;;  %v417_v50 = vadd.s32 %v3863_v20, %v3860_v18  ;;  %v595_v52 = vshll.u32 %v3632_v23, %v583_v24 }
  0x57   : > { %v427_v12 = vsub.s32 0, %v3928_v31  ;;  %v526_v51 = vadd.s32 536870912, %v525_v40  ;;  %v677_v53 = vshrl.u32 %v676_v13, 23  ;;  %v448_v55 = vsel %vm363_vm8, %v447_v34, %v423_v22 }
  0x58   : > { %v596_v56 = vshrl.u32 %v3633_v25, %v584_v14  ;;  %vm604_vm11 = vcmp.lt.s32.totalorder %v582_v39, 4  ;;  %v585_v58 = vshrl.u32 %v3629_v17, %v584_v14  ;;  %v598_v59 = vshll.u32 %v3633_v25, %v583_v24 }
  0x59   : > { %v2947_v54 = vmin.u32 %v427_v12, %v3928_v31  ;;  %v3945_v57 = vshrl.u32 %v526_v51, 30  ;;  %v599_v18 = vshrl.u32 %v3634_v38, %v584_v14  ;;  %v588_v60 = vor.u32 %v587_v47, %v586_v45 }
  0x5a   : > { %v591_v61 = vor.u32 %v590_v44, %v589_v49  ;;  %v594_v62 = vor.u32 %v593_v8, %v592_v48  ;;  %v597_v3 = vor.u32 %v596_v56, %v595_v52  ;;  %vm601_vm12 = vcmp.lt.s32.totalorder %v582_v39, 1 }
  0x5b   : > { %v429_v20 = vclz %v2947_v54  ;;  %v528_v1 = vshll.u32 %v3945_v57, 30  ;;  %vm603_vm13 = vcmp.lt.s32.totalorder %v582_v39, 3  ;;  %v600_v22 = vor.u32 %v599_v18, %v598_v59 }
  0x5c   : > { %v606_v15 = vsel %vm604_vm11, %v594_v62, 2102212464  ;;  %v2958_v28 = vadd.s32 4294967169, %v677_v53  ;;  %v450_v29 = vsel %vm3924_vm10, 0, %v448_v55  ;;  %vm602_vm14 = vcmp.lt.s32.totalorder %v582_v39, 2 }
  0x5d   : > { %v2948_v11 = vadd.s32 4294967294, %v429_v20  ;;  %v3954_v24 = vsub.s32 %v525_v40, %v528_v1  ;;  %v610_v14 = vsel %vm604_vm11, %v597_v3, 920167782  ;;  %v605_v13 = vsel %vm601_vm12, %v585_v58, %v588_v60 }
  0x5e   : > { %v609_v34 = vsel %vm601_vm12, %v588_v60, %v591_v61  ;;  %v611_v36 = vsel %vm603_vm13, %v594_v62, %v610_v14  ;;  %v607_v49 = vsel %vm603_vm13, %v591_v61, %v606_v15  ;;  %v613_v12 = vsel %vm601_vm12, %v591_v61, %v594_v62 }
  0x5f   : > { %vm2949_vm15 = vcmp.lt.s32.totalorder %v2948_v11, 0  ;;  %v531_v47 = vsub.s32 0, %v3954_v24  ;;  %v614_v8 = vsel %vm604_vm11, %v600_v22, 1326507024  ;;  %vm467_vm0 = vcmp.lt.s32.totalorder %v3795_v42, 0 }
  0x60   : > { %v432_v45 = vsel %vm2949_vm15, 0, %v2948_v11  ;;  %v612_v52 = vsel %vm602_vm14, %v609_v34, %v611_v36  ;;  %v615_v53 = vsel %vm603_vm13, %v597_v3, %v614_v8  ;;  %v683_v58 = vadd.s32 1, %v2958_v28 }
  0x61   : > { %v433_v44 = vsub.s32 32, %v432_v45  ;;  %v434_v40 = vshll.u32 %v3928_v31, %v432_v45  ;;  %v437_v48 = vsub.s32 4294967266, %v432_v45  ;;  %v2951_v51 = vmin.u32 %v531_v47, %v3954_v24 }
  0x62   : > { %v616_v56 = vsel %vm602_vm14, %v613_v12, %v615_v53  ;;  %v454_v59 = vadd.s32 3, %v450_v29  ;;  %v608_v31 = vsel %vm602_vm14, %v605_v13, %v607_v49  ;;  %v681_v20 = vor.u32 8388608, %v3920_v2 }
  0x63   : > { %v435_v54 = vshrl.u32 %v417_v50, %v433_v44  ;;  %v438_v55 = vadd.s32 127, %v437_v48  ;;  %v533_v18 = vclz %v2951_v51  ;;  %vm684_vm2 = vcmp.gt.s32.totalorder %v683_v58, 0 }
  0x64   : > { %v3973_v62 = vmul.u32.u64.low %v3915_v6, %v616_v56  ;;  %v3974_v1 = vmul.u32.u64.high %v3915_v6, %v616_v56, %v3973_v62  ;;  %v3977_v3 = vmul.u32.u64.low %v3915_v6, %v612_v52  ;;  %v3978_v50 = vmul.u32.u64.high %v3915_v6, %v612_v52, %v3977_v3 }
  0x65   : > { %v436_v60 = vor.u32 %v435_v54, %v434_v40  ;;  %v439_v61 = vshll.u32 %v438_v55, 23  ;;  %v2952_v11 = vadd.s32 4294967294, %v533_v18  ;;  %v551_v39 = vsub.s32 4, %v3945_v57 }
  0x66   : > { %v685_v28 = vsel %vm684_vm2, %v683_v58, 0  ;;  %v3982_v29 = vand.u32 3, %v454_v59  ;;  %v521_v14 = vadd.s32 %v3892_v63, %v3898_v7  ;;  %v624_v45 = vmul.u32 %v3915_v6, %v608_v31 }
  0x67   : > { %v440_v22 = vor.u32 4788187, %v439_v61  ;;  %v443_v15 = vcvt.s32.f32 %v436_v60  ;;  %vm2953_vm3 = vcmp.lt.s32.totalorder %v2952_v11, 0  ;;  %v687_v13 = vand.u32 31, %v685_v28 }
  0x68   : > { %v536_v36 = vsel %vm2953_vm3, 0, %v2952_v11  ;;  %vm626_vm4 = vc.u32 %v3974_v1, %v3977_v3  ;;  %vm3991_vm5 = vcmp.le.f32.partialorder %v465_v46, 0.7853982  ;;  %v627_v63 = vadd.s32 1, %v3978_v50 }
  0x69   : > { %v441_v34 = vand.u32 2147483647, %v440_v22  ;;  %v537_v49 = vsub.s32 32, %v536_v36  ;;  %v538_v12 = vshll.u32 %v3954_v24, %v536_v36  ;;  %v541_v44 = vsub.s32 4294967266, %v536_v36 }
  0x6a   : > { %v552_v6 = vsel %vm467_vm0, %v551_v39, %v3945_v57  ;;  %v4000_v40 = vshrl.u32 %v685_v28, 5  ;;  %v688_v48 = vsub.s32 32, %v687_v13  ;;  %v628_v46 = vsel %vm626_vm4, %v627_v63, %v3978_v50 }
  0x6b   : > { %v444_v7 = vmul.f32 %v443_v15, %v441_v34  ;;  %v539_v8 = vshrl.u32 %v521_v14, %v537_v49  ;;  %v542_v51 = vadd.s32 127, %v541_v44  ;;  %v690_v52 = vshll.u32 %v3629_v17, %v687_v13 }
  0x6c   : > { %v629_v54 = vadd.s32 %v628_v46, %v624_v45  ;;  %v691_v24 = vshrl.u32 %v3630_v19, %v688_v48  ;;  %v693_v55 = vshll.u32 %v3630_v19, %v687_v13  ;;  %v694_v59 = vshrl.u32 %v3631_v21, %v688_v48 }
  0x6d   : > { %v445_v53 = vxor.u32 2147483648, %v444_v7  ;;  %v540_v56 = vor.u32 %v539_v8, %v538_v12  ;;  %v543_v58 = vshll.u32 %v542_v51, 23  ;;  %v696_v57 = vshll.u32 %v3631_v21, %v687_v13 }
  0x6e   : > { %v630_v31 = vadd.s32 536870912, %v629_v54  ;;  %v697_v60 = vshrl.u32 %v3632_v23, %v688_v48  ;;  %v699_v61 = vshll.u32 %v3632_v23, %v687_v13  ;;  %v692_v22 = vor.u32 %v691_v24, %v690_v52 }
  0x6f   : > { %v446_v18 = vsel %vm363_vm8, %v445_v53, %v444_v7  ;;  %v544_v11 = vor.u32 4788187, %v543_v58  ;;  %v547_v50 = vcvt.s32.f32 %v540_v56  ;;  %v695_v39 = vor.u32 %v694_v59, %v693_v55 }
  0x70   : > { %v449_v62 = vsel %vm3924_vm10, %v3792_v41, %v446_v18  ;;  %v631_v15 = vshrl.u32 %v630_v31, 30  ;;  %v700_v28 = vshrl.u32 %v3633_v25, %v688_v48  ;;  %v702_v34 = vshll.u32 %v3633_v25, %v687_v13 }
  0x71   : > { %3430 = vcosq.f32 %v449_v62  ;;  %v545_v14 = vand.u32 2147483647, %v544_v11  ;;  %v703_v36 = vshrl.u32 %v3634_v38, %v688_v48  ;;  %v554_v45 = vsel %vm3991_vm5, 0, %v552_v6 }
  0x72   : > { %3432 = vsinq.f32 %v449_v62  ;;  %v632_v49 = vshll.u32 %v631_v15, 30  ;;  %v701_v5 = vor.u32 %v700_v28, %v699_v61  ;;  %vm705_vm6 = vcmp.lt.s32.totalorder %v4000_v40, 1 }
  0x73   : > { %v548_v12 = vmul.f32 %v547_v50, %v545_v14  ;;  %v689_v44 = vshrl.u32 %v3629_v17, %v688_v48  ;;  %v698_v63 = vor.u32 %v697_v60, %v696_v57  ;;  %v4024_v7 = vshll.u32 %v681_v20, 8 }
  0x74   : > { %vm456_vm7 = vcmp.lt.s32.totalorder %v3982_v29, 2  ;;  %vm571_vm8 = vcmp.lt.s32.totalorder %v3798_v43, 0  ;;  %v4028_v13 = vsub.s32 %v629_v54, %v632_v49  ;;  %v704_v8 = vor.u32 %v703_v36, %v702_v34 }
  0x75   : > { %vm707_vm9 = vcmp.lt.s32.totalorder %v4000_v40, 3  ;;  %vm708_vm10 = vcmp.lt.s32.totalorder %v4000_v40, 4  ;;  %vm453_vm11 = vweird.f32 %v3792_v41  ;;  %v549_v6 = vxor.u32 2147483648, %v548_v12 }
  0x76   : > { %vm706_vm12 = vcmp.lt.s32.totalorder %v4000_v40, 2  ;;  %v710_v2 = vsel %vm708_vm10, %v698_v63, 2102212464  ;;  %v713_v20 = vsel %vm705_vm6, %v692_v22, %v695_v39  ;;  %v558_v48 = vadd.s32 3, %v554_v45 }
  0x77   : > { %v635_v51 = vsub.s32 0, %v4028_v13  ;;  %v655_v46 = vsub.s32 4, %v631_v15  ;;  %v714_v52 = vsel %vm708_vm10, %v701_v5, 920167782  ;;  %vm2056_vm13 = vcmask 523264  }
  0x78   : > { %v550_v53 = vsel %vm467_vm0, %v549_v6, %v548_v12  ;;  %v709_v54 = vsel %vm705_vm6, %v689_v44, %v692_v22  ;;  %v711_v24 = vsel %vm707_vm9, %v695_v39, %v710_v2  ;;  %v715_v55 = vsel %vm707_vm9, %v698_v63, %v714_v52 }
  0x79   : > { %v553_v56 = vsel %vm3991_vm5, %v3795_v42, %v550_v53  ;;  %v2955_v58 = vmin.u32 %v635_v51, %v4028_v13  ;;  %v716_v59 = vsel %vm706_vm12, %v713_v20, %v715_v55  ;;  %v717_v57 = vsel %vm705_vm6, %v695_v39, %v698_v63 }
  0x7a   : > { %3434 = vcosq.f32 %v553_v56  ;;  %v718_v18 = vsel %vm708_vm10, %v704_v8, 1326507024  ;;  %v4060_v31 = vmul.u32.u64.low %v4024_v7, %v716_v59  ;;  %v4061_v60 = vmul.u32.u64.high %v4024_v7, %v716_v59, %v4060_v31 }
  0x7b   : > { %v3431_v61 = vpop.eup %3430  ;;  %vm457_vm14 = vcmp.eq.s32.totalorder %v3982_v29, 0  ;;  %vm460_vm15 = vcmp.eq.s32.totalorder %v3982_v29, 2  ;;  %3436 = vsinq.f32 %v553_v56  ;;  %v637_v47 = vclz %v2955_v58 }
  0x7c   : > { %v3433_v62 = vpop.eup %3432  ;;  %v461_v11 = vxor.u32 2147483648, %v3431_v61  ;;  %v559_v50 = vand.u32 3, %v558_v48  ;;  %v712_v22 = vsel %vm706_vm12, %v709_v54, %v711_v24  ;;  %v719_v39 = vsel %vm707_vm9, %v701_v5, %v718_v18 }
  0x7d   : > { %v458_v28 = vxor.u32 2147483648, %v3433_v62  ;;  %v625_v14 = vadd.s32 %v3977_v3, %v3974_v1  ;;  %v2956_v34 = vadd.s32 4294967294, %v637_v47  ;;  %v720_v36 = vsel %vm706_vm12, %v717_v57, %v719_v39 }
  0x7e   : > { %v462_v45 = vsel %vm460_vm15, %v461_v11, %v3433_v62  ;;  %v656_v49 = vsel %vm571_vm8, %v655_v46, %v631_v15  ;;  %v4077_v12 = vmul.u32.u64.low %v4024_v7, %v720_v36  ;;  %v4078_v44 = vmul.u32.u64.high %v4024_v7, %v720_v36, %v4077_v12  ;;  %v286_v11 = vld [vmem:[%s3769_s19 + $0x30] sm:$0xff] }
  0x7f   : > { %v459_v63 = vsel %vm457_vm14, %v3431_v61, %v458_v28  ;;  %vm557_vm0 = vweird.f32 %v3795_v42  ;;  %vm2957_vm2 = vcmp.lt.s32.totalorder %v2956_v34, 0  ;;  %v728_v1 = vmul.u32 %v4024_v7, %v712_v22 }
  0x80   : > { %v731_v3 = vadd.s32 1, %v4061_v60  ;;  %v463_v40 = vsel %vm456_vm7, %v459_v63, %v462_v45  ;;  %v640_v5 = vsel %vm2957_vm2, 0, %v2956_v34  ;;  %v777_v15 = vand.u32 2147483647, %v3905_v27 }
  0x81   : > { %v780_v8 = vand.u32 2139095040, %v3905_v27  ;;  %v464_v6 = vsel %vm453_vm11, nan, %v463_v40  ;;  %v641_v2 = vsub.s32 32, %v640_v5  ;;  %v642_v20 = vshll.u32 %v4028_v13, %v640_v5 }
  0x82   : > { %v645_v48 = vsub.s32 4294967266, %v640_v5  ;;  %v2025_v7 = vsel %vm299_vm1, %v464_v6, %v3773_v30  ;;  %vm4097_vm3 = vcmp.le.f32.partialorder %v569_v0, 0.7853982  ;;  %vm730_vm4 = vc.u32 %v4078_v44, %v4060_v31 }
  0x83   : > { %v781_v51 = vshrl.u32 %v780_v8, 23  ;;  %3155 = vmatprep.mubr.msk.f32.mxu0 %vm2056_vm13, %v2025_v7  ;;  %vm564_vm5 = vcmp.eq.s32.totalorder %v559_v50, 2  ;;  %v643_v41 = vshrl.u32 %v625_v14, %v641_v2  ;;  %v732_v46 = vsel %vm730_vm4, %v731_v3, %v4061_v60 }
  0x84   : > { %v646_v13 = vadd.s32 127, %v645_v48  ;;  %v3435_v52 = vpop.eup %3434  ;;  %v658_v30 = vsel %vm4097_vm3, 0, %v656_v49  ;;  %v733_v53 = vadd.s32 %v732_v46, %v728_v1  ;;  %v784_v54 = vand.u32 8388607, %v777_v15 }
  0x85   : > { %v2962_v0 = vadd.s32 4294967169, %v781_v51  ;;  %v3437_v24 = vpop.eup %3436  ;;  %vm561_vm6 = vcmp.eq.s32.totalorder %v559_v50, 0  ;;  %v565_v55 = vxor.u32 2147483648, %v3435_v52  ;;  %v644_v56 = vor.u32 %v643_v41, %v642_v20 }
  0x86   : > { %v647_v58 = vshll.u32 %v646_v13, 23  ;;  %vm560_vm7 = vcmp.lt.s32.totalorder %v559_v50, 2  ;;  %v562_v59 = vxor.u32 2147483648, %v3437_v24  ;;  %v734_v57 = vadd.s32 536870912, %v733_v53 }
  0x87   : > { %v787_v18 = vadd.s32 1, %v2962_v0  ;;  %v566_v60 = vsel %vm564_vm5, %v565_v55, %v3437_v24  ;;  %v651_v47 = vcvt.s32.f32 %v644_v56  ;;  %v662_v62 = vadd.s32 3, %v658_v30 }
  0x88   : > { %v648_v61 = vor.u32 4788187, %v647_v58  ;;  %v563_v22 = vsel %vm561_vm6, %v3435_v52, %v562_v59  ;;  %v735_v39 = vshrl.u32 %v734_v57, 30  ;;  %v785_v28 = vor.u32 8388608, %v784_v54 }
  0x89   : > { %vm788_vm9 = vcmp.gt.s32.totalorder %v787_v18, 0  ;;  %v567_v14 = vsel %vm560_vm7, %v563_v22, %v566_v60  ;;  %v881_v45 = vand.u32 2147483647, %v3909_v26  ;;  %vm675_vm10 = vcmp.lt.s32.totalorder %v3818_v4, 0 }
  0x8a   : > { %v649_v34 = vand.u32 2147483647, %v648_v61  ;;  %v789_v36 = vsel %vm788_vm9, %v787_v18, 0  ;;  %v568_v49 = vsel %vm557_vm0, nan, %v567_v14  ;;  %v736_v50 = vshll.u32 %v735_v39, 30 }
  0x8b   : > { %v4116_v12 = vmul.f32 %v3781_v35, %v286_v11  ;;  %v2026_v63 = vsel %vm299_vm1, %v568_v49, %v3776_v32  ;;  %v4121_v3 = vand.u32 3, %v662_v62  ;;  %v791_v40 = vand.u32 31, %v789_v36 }
  0x8c   : > { %v652_v1 = vmul.f32 %v651_v47, %v649_v34  ;;  %3156 = vmatmul.mubr.msk.f32.vlgmr.msra.gmra.mrb[0].mxu0 %vm2056_vm13, %v2026_v63  ;;  %v729_v42 = vadd.s32 %v4060_v31, %v4078_v44  ;;  %v4126_v5 = vsub.s32 %v733_v53, %v736_v50  ;;  %v4128_v8 = vshll.u32 %v785_v28, 8 }
  0x8d   : > { %v884_v6 = vand.u32 2139095040, %v3909_v26  ;;  %v759_v20 = vsub.s32 4, %v735_v39  ;;  %v792_v48 = vsub.s32 32, %v791_v40  ;;  %v4133_v32 = vand.u32 8388607, %v881_v45 }
  0x8e   : > { %v653_v2 = vxor.u32 2147483648, %v652_v1  ;;  %v739_v7 = vsub.s32 0, %v4126_v5  ;;  %v790_v51 = vshrl.u32 %v789_v36, 5  ;;  %v794_v41 = vshll.u32 %v3629_v17, %v791_v40 }
  0x8f   : > { %v797_v31 = vshll.u32 %v3630_v19, %v791_v40  ;;  %v795_v13 = vshrl.u32 %v3630_v19, %v792_v48  ;;  %v798_v46 = vshrl.u32 %v3631_v21, %v792_v48  ;;  %v800_v52 = vshll.u32 %v3631_v21, %v791_v40 }
  0x90   : > { %v654_v44 = vsel %vm571_vm8, %v653_v2, %v652_v1  ;;  %vm4148_vm11 = vcmp.le.f32.partialorder %v673_v16, 0.7853982  ;;  %v2959_v0 = vmin.u32 %v739_v7, %v4126_v5  ;;  %v801_v54 = vshrl.u32 %v3632_v23, %v792_v48 }
  0x91   : > { %v657_v30 = vsel %vm4097_vm3, %v3798_v43, %v654_v44  ;;  %v885_v24 = vshrl.u32 %v884_v6, 23  ;;  %v4156_v55 = vsel %vm675_vm10, %v759_v20, %v735_v39  ;;  %v793_v56 = vshrl.u32 %v3629_v17, %v792_v48 }
  0x92   : > { %3438 = vcosq.f32 %v657_v30  ;;  %v803_v29 = vshll.u32 %v3632_v23, %v791_v40  ;;  %v741_v58 = vclz %v2959_v0  ;;  %v796_v16 = vor.u32 %v795_v13, %v794_v41 }
  0x93   : > { %3440 = vsinq.f32 %v657_v30  ;;  %v799_v59 = vor.u32 %v798_v46, %v797_v31  ;;  %vm668_vm8 = vcmp.eq.s32.totalorder %v4121_v3, 2  ;;  %v802_v57 = vor.u32 %v801_v54, %v800_v52 }
  0x94   : > { %v804_v18 = vshrl.u32 %v3633_v25, %v792_v48  ;;  %v806_v60 = vshll.u32 %v3633_v25, %v791_v40  ;;  %vm809_vm12 = vcmp.lt.s32.totalorder %v790_v51, 1  ;;  %vm665_vm14 = vcmp.eq.s32.totalorder %v4121_v3, 0 }
  0x95   : > { %v2960_v61 = vadd.s32 4294967294, %v741_v58  ;;  %v807_v47 = vshrl.u32 %v3634_v38, %v792_v48  ;;  %vm810_vm15 = vcmp.lt.s32.totalorder %v790_v51, 2  ;;  %vm812_vm0 = vcmp.lt.s32.totalorder %v790_v51, 4 }
  0x96   : > { %vm664_vm2 = vcmp.lt.s32.totalorder %v4121_v3, 2  ;;  %v805_v62 = vor.u32 %v804_v18, %v803_v29  ;;  %vm811_vm3 = vcmp.lt.s32.totalorder %v790_v51, 3  ;;  %v813_v11 = vsel %vm809_vm12, %v793_v56, %v796_v16 }
  0x97   : > { %v814_v22 = vsel %vm812_vm0, %v802_v57, 2102212464  ;;  %vm661_vm4 = vweird.f32 %v3798_v43  ;;  %vm2961_vm5 = vcmp.lt.s32.totalorder %v2960_v61, 0  ;;  %v808_v39 = vor.u32 %v807_v47, %v806_v60 }
  0x98   : > { %v815_v28 = vsel %vm811_vm3, %v799_v59, %v814_v22  ;;  %v817_v14 = vsel %vm809_vm12, %v796_v16, %v799_v59  ;;  %v744_v34 = vsel %vm2961_vm5, 0, %v2960_v61  ;;  %v818_v36 = vsel %vm812_vm0, %v805_v62, 920167782 }
  0x99   : > { %v821_v49 = vsel %vm809_vm12, %v799_v59, %v802_v57  ;;  %v2966_v50 = vadd.s32 4294967169, %v885_v24  ;;  %v745_v63 = vsub.s32 32, %v744_v34  ;;  %v746_v1 = vshll.u32 %v4126_v5, %v744_v34 }
  0x9a   : > { %v749_v40 = vsub.s32 4294967266, %v744_v34  ;;  %v819_v6 = vsel %vm811_vm3, %v802_v57, %v818_v36  ;;  %v762_v2 = vsel %vm4148_vm11, 0, %v4156_v55  ;;  %v816_v20 = vsel %vm810_vm15, %v813_v11, %v815_v28 }
  0x9b   : > { %v820_v48 = vsel %vm810_vm15, %v817_v14, %v819_v6  ;;  %v822_v7 = vsel %vm812_vm0, %v808_v39, 1326507024  ;;  %v747_v41 = vshrl.u32 %v729_v42, %v745_v63  ;;  %v891_v13 = vadd.s32 1, %v2966_v50 }
  0x9c   : > { %v750_v31 = vadd.s32 127, %v749_v40  ;;  %v823_v44 = vsel %vm811_vm3, %v805_v62, %v822_v7  ;;  %v3439_v46 = vpop.eup %3438  ;;  %v4184_v52 = vmul.u32.u64.low %v4128_v8, %v820_v48  ;;  %v4185_v30 = vmul.u32.u64.high %v4128_v8, %v820_v48, %v4184_v52 }
  0x9d   : > { %v824_v5 = vsel %vm810_vm15, %v821_v49, %v823_v44  ;;  %v889_v0 = vor.u32 8388608, %v4133_v32  ;;  %v3441_v54 = vpop.eup %3440  ;;  %v669_v24 = vxor.u32 2147483648, %v3439_v46  ;;  %v748_v55 = vor.u32 %v747_v41, %v746_v1 }
  0x9e   : > { %v751_v56 = vshll.u32 %v750_v31, 23  ;;  %vm892_vm6 = vcmp.gt.s32.totalorder %v891_v13, 0  ;;  %v666_v42 = vxor.u32 2147483648, %v3441_v54  ;;  %v832_v60 = vmul.u32 %v4128_v8, %v816_v20 }
  0x9f   : > { %v4190_v29 = vmul.u32.u64.low %v4128_v8, %v824_v5  ;;  %v4191_v58 = vmul.u32.u64.high %v4128_v8, %v824_v5, %v4190_v29  ;;  %v893_v16 = vsel %vm892_vm6, %v891_v13, 0  ;;  %v670_v51 = vsel %vm668_vm8, %v669_v24, %v3441_v54 }
  0xa0   : > { %v752_v59 = vor.u32 4788187, %v751_v56  ;;  %v755_v57 = vcvt.s32.f32 %v748_v55  ;;  %v4195_v18 = vshrl.u32 %v893_v16, 5  ;;  %v667_v32 = vsel %vm665_vm14, %v3439_v46, %v666_v42 }
  0xa1   : > { %v835_v61 = vadd.s32 1, %v4185_v30  ;;  %v895_v47 = vand.u32 31, %v893_v16  ;;  %v671_v62 = vsel %vm664_vm2, %v667_v32, %v670_v51  ;;  %v766_v22 = vadd.s32 3, %v762_v2 }
  0xa2   : > { %v753_v11 = vand.u32 2147483647, %v752_v59  ;;  %v4203_v39 = vshll.u32 %v889_v0, 8  ;;  %v672_v28 = vsel %vm661_vm4, nan, %v671_v62  ;;  %vm834_vm7 = vc.u32 %v4191_v58, %v4184_v52 }
  0xa3   : > { %v896_v14 = vsub.s32 32, %v895_v47  ;;  %vm913_vm9 = vcmp.lt.s32.totalorder %v4195_v18, 1  ;;  %v2027_v8 = vsel %vm299_vm1, %v672_v28, %v3779_v33  ;;  %v836_v3 = vsel %vm834_vm7, %v835_v61, %v4185_v30 }
  0xa4   : > { %v756_v34 = vmul.f32 %v755_v57, %v753_v11  ;;  %v898_v36 = vshll.u32 %v3629_v17, %v895_v47  ;;  %3158 = vmatprep.mubr.msk.f32.mxu0 %vm2056_vm13, %v2027_v8  ;;  %v837_v49 = vadd.s32 %v836_v3, %v832_v60  ;;  %v901_v63 = vshll.u32 %v3630_v19, %v895_v47 }
  0xa5   : > { %v897_v43 = vshrl.u32 %v3629_v17, %v896_v14  ;;  %v899_v50 = vshrl.u32 %v3630_v19, %v896_v14  ;;  %v902_v40 = vshrl.u32 %v3631_v21, %v896_v14  ;;  %v904_v6 = vshll.u32 %v3631_v21, %v895_v47 }
  0xa6   : > { %v757_v1 = vxor.u32 2147483648, %v756_v34  ;;  %v905_v33 = vshrl.u32 %v3632_v23, %v896_v14  ;;  %v838_v2 = vadd.s32 536870912, %v837_v49  ;;  %v907_v48 = vshll.u32 %v3632_v23, %v895_v47 }
  0xa7   : > { %v900_v20 = vor.u32 %v899_v50, %v898_v36  ;;  %v908_v7 = vshrl.u32 %v3633_v25, %v896_v14  ;;  %v903_v31 = vor.u32 %v902_v40, %v901_v63  ;;  %v910_v13 = vshll.u32 %v3633_v25, %v895_v47 }
  0xa8   : > { %v758_v41 = vsel %vm675_vm10, %v757_v1, %v756_v34  ;;  %v906_v44 = vor.u32 %v905_v33, %v904_v6  ;;  %v839_v5 = vshrl.u32 %v838_v2, 30  ;;  %v911_v0 = vshrl.u32 %v3634_v38, %v896_v14 }
  0xa9   : > { %v761_v46 = vsel %vm4148_vm11, %v3818_v4, %v758_v41  ;;  %v909_v30 = vor.u32 %v908_v7, %v907_v48  ;;  %vm914_vm8 = vcmp.lt.s32.totalorder %v4195_v18, 2  ;;  %vm915_vm12 = vcmp.lt.s32.totalorder %v4195_v18, 3 }
  0xaa   : > { %3442 = vcosq.f32 %v761_v46  ;;  %vm916_vm14 = vcmp.lt.s32.totalorder %v4195_v18, 4  ;;  %v840_v54 = vshll.u32 %v839_v5, 30  ;;  %v912_v24 = vor.u32 %v911_v0, %v910_v13 }
  0xab   : > { %3444 = vsinq.f32 %v761_v46  ;;  %v917_v55 = vsel %vm913_vm9, %v897_v43, %v900_v20  ;;  %v863_v56 = vsub.s32 4, %v839_v5  ;;  %v918_v53 = vsel %vm916_vm14, %v906_v44, 2102212464  ;;  %v4290_v46 = vld [vmem:[%s3769_s19 + $0x38] sm:$0xff] }
  0xac   : > { %v921_v42 = vsel %vm913_vm9, %v900_v20, %v903_v31  ;;  %v922_v29 = vsel %vm916_vm14, %v909_v30, 920167782  ;;  %v4238_v16 = vsub.s32 %v837_v49, %v840_v54  ;;  %v919_v51 = vsel %vm915_vm12, %v903_v31, %v918_v53 }
  0xad   : > { %v923_v59 = vsel %vm915_vm12, %v906_v44, %v922_v29  ;;  %v925_v57 = vsel %vm913_vm9, %v903_v31, %v906_v44  ;;  %v926_v60 = vsel %vm916_vm14, %v912_v24, 1326507024  ;;  %v4250_v61 = vadd.f32 %v4116_v12, %v3783_v37  ;;  %v3558_v29 = vld [vmem:[%s3769_s19 + $0x18] sm:$0xff] }
  0xae   : > { %v924_v32 = vsel %vm914_vm8, %v921_v42, %v923_v59  ;;  %v767_v47 = vand.u32 3, %v766_v22  ;;  %vm779_vm10 = vcmp.lt.s32.totalorder %v3905_v27, 0  ;;  %v843_v62 = vsub.s32 0, %v4238_v16 }
  0xaf   : > { %v927_v11 = vsel %vm915_vm12, %v909_v30, %v926_v60  ;;  %v920_v28 = vsel %vm914_vm8, %v917_v55, %v919_v51  ;;  %v4261_v8 = vmul.u32.u64.low %v4203_v39, %v924_v32  ;;  %v4262_v34 = vmul.u32.u64.high %v4203_v39, %v924_v32, %v4261_v8 }
  0xb0   : > { %v928_v14 = vsel %vm914_vm8, %v925_v57, %v927_v11  ;;  %v2963_v12 = vmin.u32 %v843_v62, %v4238_v16  ;;  %v864_v22 = vsel %vm779_vm10, %v863_v56, %v839_v5  ;;  %vm765_vm11 = vweird.f32 %v3818_v4 }
  0xb1   : > { %v4268_v3 = vmul.u32.u64.low %v4203_v39, %v928_v14  ;;  %v4269_v36 = vmul.u32.u64.high %v4203_v39, %v928_v14, %v4268_v3  ;;  %vm4274_vm15 = vcmp.le.f32.partialorder %v777_v15, 0.7853982  ;;  %v988_v49 = vand.u32 2139095040, %v4250_v61 }
  0xb2   : > { %vm768_vm0 = vcmp.lt.s32.totalorder %v767_v47, 2  ;;  %vm772_vm2 = vcmp.eq.s32.totalorder %v767_v47, 2  ;;  %v845_v43 = vclz %v2963_v12  ;;  %v936_v50 = vmul.u32 %v4203_v39, %v920_v28 }
  0xb3   : > { %v866_v1 = vsel %vm4274_vm15, 0, %v864_v22  ;;  %v939_v40 = vadd.s32 1, %v4262_v34  ;;  %v985_v6 = vand.u32 2147483647, %v4250_v61  ;;  %v989_v15 = vshrl.u32 %v988_v49, 23 }
  0xb4   : > { %v3443_v63 = vpop.eup %3442  ;;  %vm769_vm3 = vcmp.eq.s32.totalorder %v767_v47, 0  ;;  %v2964_v20 = vadd.s32 4294967294, %v845_v43  ;;  %vm938_vm4 = vc.u32 %v4269_v36, %v4261_v8  ;;  %v833_v39 = vadd.s32 %v4184_v52, %v4191_v58 }
  0xb5   : > { %v3445_v33 = vpop.eup %3444  ;;  %v773_v2 = vxor.u32 2147483648, %v3443_v63  ;;  %v940_v7 = vsel %vm938_vm4, %v939_v40, %v4262_v34  ;;  %v2970_v41 = vadd.s32 4294967169, %v989_v15  ;;  %v870_v44 = vadd.s32 3, %v866_v1 }
  0xb6   : > { %v770_v48 = vxor.u32 2147483648, %v3445_v33  ;;  %vm2965_vm5 = vcmp.lt.s32.totalorder %v2964_v20, 0  ;;  %v941_v13 = vadd.s32 %v940_v7, %v936_v50  ;;  %v992_v0 = vand.u32 8388607, %v985_v6 }
  0xb7   : > { %v774_v31 = vsel %vm772_vm2, %v773_v2, %v3445_v33  ;;  %v848_v30 = vsel %vm2965_vm5, 0, %v2964_v20  ;;  %v995_v54 = vadd.s32 1, %v2970_v41  ;;  %v336_v42 = vmul.f32 %v3781_v35, %v4290_v46 }
  0xb8   : > { %v771_v5 = vsel %vm769_vm3, %v3443_v63, %v770_v48  ;;  %v849_v52 = vsub.s32 32, %v848_v30  ;;  %v850_v58 = vshll.u32 %v4238_v16, %v848_v30  ;;  %v853_v55 = vsub.s32 4294967266, %v848_v30 }
  0xb9   : > { %v775_v24 = vsel %vm768_vm0, %v771_v5, %v774_v31  ;;  %v942_v53 = vadd.s32 536870912, %v941_v13  ;;  %vm996_vm6 = vcmp.gt.s32.totalorder %v995_v54, 0  ;;  %vm883_vm7 = vcmp.lt.s32.totalorder %v3909_v26, 0 }
  0xba   : > { %v776_v56 = vsel %vm765_vm11, nan, %v775_v24  ;;  %v851_v59 = vshrl.u32 %v833_v39, %v849_v52  ;;  %v854_v57 = vadd.s32 127, %v853_v55  ;;  %v997_v32 = vsel %vm996_vm6, %v995_v54, 0 }
  0xbb   : > { %v2028_v51 = vsel %vm299_vm1, %v776_v56, %v3558_v29  ;;  %v943_v60 = vshrl.u32 %v942_v53, 30  ;;  %v999_v16 = vand.u32 31, %v997_v32  ;;  %v4305_v4 = vand.u32 3, %v870_v44 }
  0xbc   : > { %3159 = vmatmul.mubr.msk.f32.gmra.mrb[2].mxu0 %vm2056_vm13, %v2028_v51  ;;  %v852_v47 = vor.u32 %v851_v59, %v850_v58  ;;  %v855_v62 = vshll.u32 %v854_v57, 23  ;;  %v993_v28 = vor.u32 8388608, %v992_v0  ;;  %v937_v22 = vadd.s32 %v4261_v8, %v4269_v36 }
  0xbd   : > { %v944_v11 = vshll.u32 %v943_v60, 30  ;;  %v1000_v14 = vsub.s32 32, %v999_v16  ;;  %v4309_v3 = vadd.f32 %v336_v42, %v3783_v37  ;;  %v967_v43 = vsub.s32 4, %v943_v60 }
  0xbe   : > { %v856_v34 = vor.u32 4788187, %v855_v62  ;;  %v859_v12 = vcvt.s32.f32 %v852_v47  ;;  %v998_v50 = vshrl.u32 %v997_v32, 5  ;;  %v1002_v63 = vshll.u32 %v3629_v17, %v999_v16 }
  0xbf   : > { %v945_v49 = vsub.s32 %v941_v13, %v944_v11  ;;  %v1003_v40 = vshrl.u32 %v3630_v19, %v1000_v14  ;;  %v1005_v15 = vshll.u32 %v3630_v19, %v999_v16  ;;  %v1006_v33 = vshrl.u32 %v3631_v21, %v1000_v14 }
  0xc0   : > { %v857_v1 = vand.u32 2147483647, %v856_v34  ;;  %v1008_v20 = vshll.u32 %v3631_v21, %v999_v16  ;;  %v1009_v8 = vshrl.u32 %v3632_v23, %v1000_v14  ;;  %v1011_v36 = vshll.u32 %v3632_v23, %v999_v16 }
  0xc1   : > { %v947_v2 = vsub.s32 0, %v945_v49  ;;  %v1012_v39 = vshrl.u32 %v3633_v25, %v1000_v14  ;;  %v4319_v7 = vshll.u32 %v993_v28, 8  ;;  %v1092_v41 = vand.u32 2139095040, %v4309_v3 }
  0xc2   : > { %v860_v48 = vmul.f32 %v859_v12, %v857_v1  ;;  %v1001_v44 = vshrl.u32 %v3629_v17, %v1000_v14  ;;  %v1014_v13 = vshll.u32 %v3633_v25, %v999_v16  ;;  %v1015_v5 = vshrl.u32 %v3634_v38, %v1000_v14 }
  0xc3   : > { %v2967_v31 = vmin.u32 %v947_v2, %v945_v49  ;;  %v1004_v0 = vor.u32 %v1003_v40, %v1002_v63  ;;  %v1007_v54 = vor.u32 %v1006_v33, %v1005_v15  ;;  %v1013_v24 = vor.u32 %v1012_v39, %v1011_v36 }
  0xc4   : > { %v861_v30 = vxor.u32 2147483648, %v860_v48  ;;  %v968_v58 = vsel %vm883_vm7, %v967_v43, %v943_v60  ;;  %v1010_v55 = vor.u32 %v1009_v8, %v1008_v20  ;;  %vm1017_vm9 = vcmp.lt.s32.totalorder %v998_v50, 1 }
  0xc5   : > { %v949_v52 = vclz %v2967_v31  ;;  %v1016_v53 = vor.u32 %v1015_v5, %v1014_v13  ;;  %vm1019_vm8 = vcmp.lt.s32.totalorder %v998_v50, 3  ;;  %vm1020_vm12 = vcmp.lt.s32.totalorder %v998_v50, 4 }
  0xc6   : > { %v862_v56 = vsel %vm779_vm10, %v861_v30, %v860_v48  ;;  %vm1018_vm14 = vcmp.lt.s32.totalorder %v998_v50, 2  ;;  %v1022_v51 = vsel %vm1020_vm12, %v1010_v55, 2102212464  ;;  %v1021_v59 = vsel %vm1017_vm9, %v1001_v44, %v1004_v0 }
  0xc7   : > { %v865_v42 = vsel %vm4274_vm15, %v3905_v27, %v862_v56  ;;  %v2968_v29 = vadd.s32 4294967294, %v949_v52  ;;  %v1025_v57 = vsel %vm1017_vm9, %v1004_v0, %v1007_v54  ;;  %v1026_v32 = vsel %vm1020_vm12, %v1013_v24, 920167782 }
  0xc8   : > { %3446 = vcosq.f32 %v865_v42  ;;  %v1023_v60 = vsel %vm1019_vm8, %v1007_v54, %v1022_v51  ;;  %v1027_v16 = vsel %vm1019_vm8, %v1010_v55, %v1026_v32  ;;  %v1029_v62 = vsel %vm1017_vm9, %v1007_v54, %v1010_v55 }
  0xc9   : > { %3448 = vsinq.f32 %v865_v42  ;;  %vm2969_vm10 = vcmp.lt.s32.totalorder %v2968_v29, 0  ;;  %v1028_v18 = vsel %vm1018_vm14, %v1025_v57, %v1027_v16  ;;  %v1030_v11 = vsel %vm1020_vm12, %v1016_v53, 1326507024 }
  0xca   : > { %v952_v47 = vsel %vm2969_vm10, 0, %v2968_v29  ;;  %v1031_v12 = vsel %vm1019_vm8, %v1013_v24, %v1030_v11  ;;  %v1024_v43 = vsel %vm1018_vm14, %v1021_v59, %v1023_v60  ;;  %vm4355_vm11 = vcmp.le.f32.partialorder %v881_v45, 0.7853982  ;;  %v4368_v45 = vld [vmem:[%s3769_s19 + $0x40] sm:$0xff] }
  0xcb   : > { %v953_v28 = vsub.s32 32, %v952_v47  ;;  %v954_v14 = vshll.u32 %v945_v49, %v952_v47  ;;  %v957_v34 = vsub.s32 4294967266, %v952_v47  ;;  %v1032_v63 = vsel %vm1018_vm14, %v1029_v62, %v1031_v12 }
  0xcc   : > { %v4345_v1 = vmul.u32.u64.low %v4319_v7, %v1028_v18  ;;  %v4346_v40 = vmul.u32.u64.high %v4319_v7, %v1028_v18, %v4345_v1  ;;  %v4350_v2 = vmul.u32.u64.low %v4319_v7, %v1032_v63  ;;  %v4351_v20 = vmul.u32.u64.high %v4319_v7, %v1032_v63, %v4350_v2 }
  0xcd   : > { %v955_v15 = vshrl.u32 %v937_v22, %v953_v28  ;;  %v958_v33 = vadd.s32 127, %v957_v34  ;;  %v1093_v49 = vshrl.u32 %v1092_v41, 23  ;;  %v1040_v48 = vmul.u32 %v4319_v7, %v1024_v43 }
  0xce   : > { %vm869_vm15 = vweird.f32 %v3905_v27  ;;  %v970_v22 = vsel %vm4355_vm11, 0, %v968_v58  ;;  %v1043_v39 = vadd.s32 1, %v4346_v40  ;;  %vm872_vm0 = vcmp.lt.s32.totalorder %v4305_v4, 2 }
  0xcf   : > { %v956_v50 = vor.u32 %v955_v15, %v954_v14  ;;  %v959_v36 = vshll.u32 %v958_v33, 23  ;;  %v2974_v31 = vadd.s32 4294967169, %v1093_v49  ;;  %vm1042_vm2 = vc.u32 %v4351_v20, %v4345_v1  ;;  %v3559_v14 = vld [vmem:[%s3769_s19 + $0x20] sm:$0xff] }
  0xd0   : > { %vm873_vm3 = vcmp.eq.s32.totalorder %v4305_v4, 0  ;;  %vm876_vm4 = vcmp.eq.s32.totalorder %v4305_v4, 2  ;;  %v1044_v7 = vsel %vm1042_vm2, %v1043_v39, %v4346_v40  ;;  %v974_v24 = vadd.s32 3, %v970_v22 }
  0xd1   : > { %v960_v41 = vor.u32 4788187, %v959_v36  ;;  %v963_v44 = vcvt.s32.f32 %v956_v50  ;;  %v1099_v5 = vadd.s32 1, %v2974_v31  ;;  %v1045_v52 = vadd.s32 %v1044_v7, %v1040_v48 }
  0xd2   : > { %v3447_v13 = vpop.eup %3446  ;;  %v1089_v55 = vand.u32 2147483647, %v4309_v3  ;;  %v337_v56 = vmul.f32 %v3781_v35, %v4368_v45  ;;  %v4380_v16 = vand.u32 3, %v974_v24  ;;  %vm987_vm8 = vcmp.lt.s32.totalorder %v4250_v61, 0 }
  0xd3   : > { %v3449_v30 = vpop.eup %3448  ;;  %v877_v0 = vxor.u32 2147483648, %v3447_v13  ;;  %v961_v54 = vand.u32 2147483647, %v960_v41  ;;  %vm1100_vm5 = vcmp.gt.s32.totalorder %v1099_v5, 0  ;;  %v1046_v29 = vadd.s32 536870912, %v1045_v52 }
  0xd4   : > { %v874_v58 = vxor.u32 2147483648, %v3449_v30  ;;  %v1101_v51 = vsel %vm1100_vm5, %v1099_v5, 0  ;;  %v1096_v62 = vand.u32 8388607, %v1089_v55  ;;  %v4389_v28 = vadd.f32 %v337_v56, %v3783_v37 }
  0xd5   : > { %v878_v53 = vsel %vm876_vm4, %v877_v0, %v3449_v30  ;;  %v964_v42 = vmul.f32 %v963_v44, %v961_v54  ;;  %v1103_v57 = vand.u32 31, %v1101_v51  ;;  %v4382_v47 = vshrl.u32 %v1046_v29, 30 }
  0xd6   : > { %v875_v59 = vsel %vm873_vm3, %v3447_v13, %v874_v58  ;;  %v1102_v2 = vshrl.u32 %v1101_v51, 5  ;;  %v1097_v50 = vor.u32 8388608, %v1096_v62  ;;  %v1196_v48 = vand.u32 2139095040, %v4389_v28 }
  0xd7   : > { %v879_v32 = vsel %vm872_vm0, %v875_v59, %v878_v53  ;;  %v965_v60 = vxor.u32 2147483648, %v964_v42  ;;  %v1104_v11 = vsub.s32 32, %v1103_v57  ;;  %v1048_v12 = vshll.u32 %v4382_v47, 30 }
  0xd8   : > { %v880_v18 = vsel %vm869_vm15, nan, %v879_v32  ;;  %v1106_v43 = vshll.u32 %v3629_v17, %v1103_v57  ;;  %v1109_v40 = vshll.u32 %v3630_v19, %v1103_v57  ;;  %v1112_v49 = vshll.u32 %v3631_v21, %v1103_v57 }
  0xd9   : > { %v2029_v4 = vsel %vm299_vm1, %v880_v18, %v3559_v14  ;;  %v966_v34 = vsel %vm883_vm7, %v965_v60, %v964_v42  ;;  %v1107_v63 = vshrl.u32 %v3630_v19, %v1104_v11  ;;  %v1110_v15 = vshrl.u32 %v3631_v21, %v1104_v11 }
  0xda   : > { %3161 = vmatprep.mubr.msk.f32.mxu0 %vm2056_vm13, %v2029_v4  ;;  %v969_v27 = vsel %vm4355_vm11, %v3909_v26, %v966_v34  ;;  %v4405_v33 = vsub.s32 %v1045_v52, %v1048_v12  ;;  %v1105_v36 = vshrl.u32 %v3629_v17, %v1104_v11  ;;  %vm980_vm6 = vcmp.eq.s32.totalorder %v4380_v16, 2 }
  0xdb   : > { %3450 = vcosq.f32 %v969_v27  ;;  %v1108_v22 = vor.u32 %v1107_v63, %v1106_v43  ;;  %v1113_v39 = vshrl.u32 %v3632_v23, %v1104_v11  ;;  %v1115_v31 = vshll.u32 %v3632_v23, %v1103_v57 }
  0xdc   : > { %3452 = vsinq.f32 %v969_v27  ;;  %v1051_v8 = vsub.s32 0, %v4405_v33  ;;  %vm977_vm7 = vcmp.eq.s32.totalorder %v4380_v16, 0  ;;  %v1111_v41 = vor.u32 %v1110_v15, %v1109_v40 }
  0xdd   : > { %v1116_v44 = vshrl.u32 %v3633_v25, %v1104_v11  ;;  %v1118_v13 = vshll.u32 %v3633_v25, %v1103_v57  ;;  %v1119_v7 = vshrl.u32 %v3634_v38, %v1104_v11  ;;  %vm976_vm9 = vcmp.lt.s32.totalorder %v4380_v16, 2 }
  0xde   : > { %v1041_v5 = vadd.s32 %v4345_v1, %v4351_v20  ;;  %v2971_v30 = vmin.u32 %v1051_v8, %v4405_v33  ;;  %v1114_v0 = vor.u32 %v1113_v39, %v1112_v49  ;;  %vm1121_vm12 = vcmp.lt.s32.totalorder %v1102_v2, 1 }
  0xdf   : > { %vm973_vm14 = vweird.f32 %v3909_v26  ;;  %v1117_v54 = vor.u32 %v1116_v44, %v1115_v31  ;;  %v1120_v24 = vor.u32 %v1119_v7, %v1118_v13  ;;  %vm1123_vm10 = vcmp.lt.s32.totalorder %v1102_v2, 3 }
  0xe0   : > { %vm1124_vm11 = vcmp.lt.s32.totalorder %v1102_v2, 4  ;;  %v1053_v52 = vclz %v2971_v30  ;;  %vm1122_vm15 = vcmp.lt.s32.totalorder %v1102_v2, 2  ;;  %v1137_v58 = vshll.u32 %v1097_v50, 8 }
  0xe1   : > { %v1197_v56 = vshrl.u32 %v1196_v48, 23  ;;  %v1125_v53 = vsel %vm1121_vm12, %v1105_v36, %v1108_v22  ;;  %v1126_v42 = vsel %vm1124_vm11, %v1114_v0, 2102212464  ;;  %v1129_v1 = vsel %vm1121_vm12, %v1108_v22, %v1111_v41 }
  0xe2   : > { %v1130_v20 = vsel %vm1124_vm11, %v1117_v54, 920167782  ;;  %v2972_v29 = vadd.s32 4294967294, %v1053_v52  ;;  %v1127_v51 = vsel %vm1123_vm10, %v1111_v41, %v1126_v42  ;;  %v1133_v57 = vsel %vm1121_vm12, %v1111_v41, %v1114_v0 }
  0xe3   : > { %v1131_v59 = vsel %vm1123_vm10, %v1114_v0, %v1130_v20  ;;  %v1071_v32 = vsub.s32 4, %v4382_v47  ;;  %v1128_v60 = vsel %vm1122_vm15, %v1125_v53, %v1127_v51  ;;  %v1134_v62 = vsel %vm1124_vm11, %v1120_v24, 1326507024  ;;  %v3560_v24 = vld [vmem:[%s3769_s19 + $0x28] sm:$0xff] }
  0xe4   : > { %v1132_v18 = vsel %vm1122_vm15, %v1129_v1, %v1131_v59  ;;  %vm2973_vm0 = vcmp.lt.s32.totalorder %v2972_v29, 0  ;;  %v1135_v14 = vsel %vm1123_vm10, %v1117_v54, %v1134_v62  ;;  %v2978_v40 = vadd.s32 4294967169, %v1197_v56 }
  0xe5   : > { %v3451_v11 = vpop.eup %3450  ;;  %v4436_v4 = vmul.u32.u64.low %v1137_v58, %v1132_v18  ;;  %v4437_v34 = vmul.u32.u64.high %v1137_v58, %v1132_v18, %v4436_v4  ;;  %v1056_v27 = vsel %vm2973_vm0, 0, %v2972_v29  ;;  %v1136_v63 = vsel %vm1122_vm15, %v1133_v57, %v1135_v14 }
  0xe6   : > { %v3453_v12 = vpop.eup %3452  ;;  %v981_v43 = vxor.u32 2147483648, %v3451_v11  ;;  %v1057_v49 = vsub.s32 32, %v1056_v27  ;;  %v1058_v50 = vshll.u32 %v4405_v33, %v1056_v27  ;;  %v1061_v36 = vsub.s32 4294967266, %v1056_v27 }
  0xe7   : > { %v978_v15 = vxor.u32 2147483648, %v3453_v12  ;;  %v1072_v8 = vsel %vm987_vm8, %v1071_v32, %v4382_v47  ;;  %v4447_v22 = vmul.u32.u64.low %v1137_v58, %v1136_v63  ;;  %v4448_v39 = vmul.u32.u64.high %v1137_v58, %v1136_v63, %v4447_v22 }
  0xe8   : > { %v982_v48 = vsel %vm980_vm6, %v981_v43, %v3453_v12  ;;  %v1059_v31 = vshrl.u32 %v1041_v5, %v1057_v49  ;;  %v1062_v41 = vadd.s32 127, %v1061_v36  ;;  %v1147_v33 = vadd.s32 1, %v4437_v34 }
  0xe9   : > { %v979_v2 = vsel %vm977_vm7, %v3451_v11, %v978_v15  ;;  %vm4457_vm2 = vcmp.le.f32.partialorder %v985_v6, 0.7853982  ;;  %v1144_v47 = vmul.u32 %v1137_v58, %v1128_v60  ;;  %v1203_v7 = vadd.s32 1, %v2978_v40  ;;  %v4472_v6 = vld [vmem:[%s3769_s19 + $0x48] sm:$0xff] }
  0xea   : > { %v983_v44 = vsel %vm976_vm9, %v979_v2, %v982_v48  ;;  %v1060_v0 = vor.u32 %v1059_v31, %v1058_v50  ;;  %v1063_v5 = vshll.u32 %v1062_v41, 23  ;;  %v1193_v54 = vand.u32 2147483647, %v4389_v28 }
  0xeb   : > { %v984_v30 = vsel %vm973_vm14, nan, %v983_v44  ;;  %v1074_v52 = vsel %vm4457_vm2, 0, %v1072_v8  ;;  %vm1146_vm3 = vc.u32 %v4448_v39, %v4436_v4  ;;  %vm1204_vm4 = vcmp.gt.s32.totalorder %v1203_v7, 0 }
  0xec   : > { %v2030_v16 = vsel %vm299_vm1, %v984_v30, %v3560_v24  ;;  %v1064_v26 = vor.u32 4788187, %v1063_v5  ;;  %v1067_v58 = vcvt.s32.f32 %v1060_v0  ;;  %v1148_v56 = vsel %vm1146_vm3, %v1147_v33, %v4437_v34 }
  0xed   : > { %3162 = vmatmul.mubr.msk.f32.gmra.mrb[4].mxu0 %vm2056_vm13, %v2030_v16  ;;  %v1205_v53 = vsel %vm1204_vm4, %v1203_v7, 0  ;;  %v1149_v42 = vadd.s32 %v1148_v56, %v1144_v47  ;;  %v1078_v29 = vadd.s32 3, %v1074_v52  ;;  %v1200_v51 = vand.u32 8388607, %v1193_v54 }
  0xee   : > { %v1207_v1 = vand.u32 31, %v1205_v53  ;;  %v1065_v20 = vand.u32 2147483647, %v1064_v26  ;;  %v338_v59 = vmul.f32 %v3781_v35, %v4472_v6  ;;  %v1206_v32 = vshrl.u32 %v1205_v53, 5 }
  0xef   : > { %v1150_v57 = vadd.s32 536870912, %v1149_v42  ;;  %v1201_v48 = vor.u32 8388608, %v1200_v51  ;;  %v4501_v30 = vand.u32 3, %v1078_v29  ;;  %vm4515_vm12 = vcmp.le.f32.partialorder %v1089_v55, 0.7853982 }
  0xf0   : > { %v1208_v60 = vsub.s32 32, %v1207_v1  ;;  %v1210_v18 = vshll.u32 %v3629_v17, %v1207_v1  ;;  %v1068_v62 = vmul.f32 %v1067_v58, %v1065_v20  ;;  %v1213_v11 = vshll.u32 %v3630_v19, %v1207_v1 }
  0xf1   : > { %v1216_v14 = vshll.u32 %v3631_v21, %v1207_v1  ;;  %v1219_v34 = vshll.u32 %v3632_v23, %v1207_v1  ;;  %v1151_v12 = vshrl.u32 %v1150_v57, 30  ;;  %v1222_v63 = vshll.u32 %v3633_v25, %v1207_v1 }
  0xf2   : > { %v1211_v43 = vshrl.u32 %v3630_v19, %v1208_v60  ;;  %v1214_v27 = vshrl.u32 %v3631_v21, %v1208_v60  ;;  %v1069_v40 = vxor.u32 2147483648, %v1068_v62  ;;  %v1217_v15 = vshrl.u32 %v3632_v23, %v1208_v60 }
  0xf3   : > { %v1220_v49 = vshrl.u32 %v3633_v25, %v1208_v60  ;;  %v1223_v50 = vshrl.u32 %v3634_v38, %v1208_v60  ;;  %v1152_v36 = vshll.u32 %v1151_v12, 30  ;;  %v1209_v8 = vshrl.u32 %v3629_v17, %v1208_v60 }
  0xf4   : > { %v4492_v22 = vadd.f32 %v338_v59, %v3783_v37  ;;  %v1070_v2 = vsel %vm987_vm8, %v1069_v40, %v1068_v62  ;;  %v1212_v31 = vor.u32 %v1211_v43, %v1210_v18  ;;  %v1215_v41 = vor.u32 %v1214_v27, %v1213_v11 }
  0xf5   : > { %v1221_v33 = vor.u32 %v1220_v49, %v1219_v34  ;;  %v1073_v44 = vsel %vm4457_vm2, %v4250_v61, %v1070_v2  ;;  %v4499_v47 = vsub.s32 %v1149_v42, %v1152_v36  ;;  %v1218_v7 = vor.u32 %v1217_v15, %v1216_v14 }
  0xf6   : > { %vm1225_vm5 = vcmp.lt.s32.totalorder %v1206_v32, 1  ;;  %3454 = vcosq.f32 %v1073_v44  ;;  %v1224_v0 = vor.u32 %v1223_v50, %v1222_v63  ;;  %vm1227_vm6 = vcmp.lt.s32.totalorder %v1206_v32, 3 }
  0xf7   : > { %3456 = vsinq.f32 %v1073_v44  ;;  %v1155_v5 = vsub.s32 0, %v4499_v47  ;;  %vm1226_vm7 = vcmp.lt.s32.totalorder %v1206_v32, 2  ;;  %vm1228_vm9 = vcmp.lt.s32.totalorder %v1206_v32, 4 }
  0xf8   : > { %v1230_v24 = vsel %vm1228_vm9, %v1218_v7, 2102212464  ;;  %v1233_v16 = vsel %vm1225_vm5, %v1212_v31, %v1215_v41  ;;  %v1234_v52 = vsel %vm1228_vm9, %v1221_v33, 920167782  ;;  %v1241_v13 = vshll.u32 %v1201_v48, 8 }
  0xf9   : > { %v2975_v26 = vmin.u32 %v1155_v5, %v4499_v47  ;;  %v1229_v58 = vsel %vm1225_vm5, %v1209_v8, %v1212_v31  ;;  %v1235_v56 = vsel %vm1227_vm6, %v1218_v7, %v1234_v52  ;;  %v1300_v53 = vand.u32 2139095040, %v4492_v22 }
  0xfa   : > { %v1231_v42 = vsel %vm1227_vm6, %v1215_v41, %v1230_v24  ;;  %v1236_v1 = vsel %vm1226_vm7, %v1233_v16, %v1235_v56  ;;  %v1237_v20 = vsel %vm1225_vm5, %v1215_v41, %v1218_v7  ;;  %v1238_v29 = vsel %vm1228_vm9, %v1224_v0, 1326507024 }
  0xfb   : > { %vm1077_vm8 = vweird.f32 %v4250_v61  ;;  %vm1091_vm14 = vcmp.lt.s32.totalorder %v4309_v3, 0  ;;  %v1157_v59 = vclz %v2975_v26  ;;  %v1175_v57 = vsub.s32 4, %v1151_v12 }
  0xfc   : > { %vm1080_vm10 = vcmp.lt.s32.totalorder %v4501_v30, 2  ;;  %v1239_v60 = vsel %vm1227_vm6, %v1221_v33, %v1238_v29  ;;  %v4522_v18 = vmul.u32.u64.low %v1241_v13, %v1236_v1  ;;  %v4523_v62 = vmul.u32.u64.high %v1241_v13, %v1236_v1, %v4522_v18  ;;  %v3561_v1 = vld [vmem:[%s3769_s19 + $0x30] sm:$0xff] }
  0xfd   : > { %v2976_v11 = vadd.s32 4294967294, %v1157_v59  ;;  %v1232_v14 = vsel %vm1226_vm7, %v1229_v58, %v1231_v42  ;;  %v1240_v55 = vsel %vm1226_vm7, %v1237_v20, %v1239_v60  ;;  %v1301_v34 = vshrl.u32 %v1300_v53, 23 }
  0xfe   : > { %vm1081_vm11 = vcmp.eq.s32.totalorder %v4501_v30, 0  ;;  %vm1084_vm15 = vcmp.eq.s32.totalorder %v4501_v30, 2  ;;  %v4530_v43 = vmul.u32.u64.low %v1241_v13, %v1240_v55  ;;  %v4531_v27 = vmul.u32.u64.high %v1241_v13, %v1240_v55, %v4530_v43 }
  0xff   : > { %v1145_v63 = vadd.s32 %v4436_v4, %v4448_v39  ;;  %vm2977_vm0 = vcmp.lt.s32.totalorder %v2976_v11, 0  ;;  %v1176_v40 = vsel %vm1091_vm14, %v1175_v57, %v1151_v12  ;;  %v2982_v15 = vadd.s32 4294967169, %v1301_v34 }
 0x100   : > { %v3455_v49 = vpop.eup %3454  ;;  %v1160_v50 = vsel %vm2977_vm0, 0, %v2976_v11  ;;  %v1248_v32 = vmul.u32 %v1241_v13, %v1232_v14  ;;  %v1251_v36 = vadd.s32 1, %v4523_v62  ;;  %v1297_v48 = vand.u32 2147483647, %v4492_v22 }
 0x101   : > { %v3457_v8 = vpop.eup %3456  ;;  %v1085_v2 = vxor.u32 2147483648, %v3455_v49  ;;  %v1161_v31 = vsub.s32 32, %v1160_v50  ;;  %v1162_v41 = vshll.u32 %v4499_v47, %v1160_v50  ;;  %v1165_v33 = vsub.s32 4294967266, %v1160_v50 }
 0x102   : > { %v1082_v44 = vxor.u32 2147483648, %v3457_v8  ;;  %v1178_v4 = vsel %vm4515_vm12, 0, %v1176_v40  ;;  %vm1250_vm2 = vc.u32 %v4531_v27, %v4522_v18  ;;  %v1307_v39 = vadd.s32 1, %v2982_v15  ;;  %v4568_v15 = vld [vmem:[%s3769_s19 + $0x50] sm:$0xff] }
 0x103   : > { %v1086_v12 = vsel %vm1084_vm15, %v1085_v2, %v3457_v8  ;;  %v1163_v7 = vshrl.u32 %v1145_v63, %v1161_v31  ;;  %v1166_v0 = vadd.s32 127, %v1165_v33  ;;  %v1252_v5 = vsel %vm1250_vm2, %v1251_v36, %v4523_v62 }
 0x104   : > { %v1083_v47 = vsel %vm1081_vm11, %v3455_v49, %v1082_v44  ;;  %v1253_v24 = vadd.s32 %v1252_v5, %v1248_v32  ;;  %v1304_v16 = vand.u32 8388607, %v1297_v48  ;;  %vm1308_vm3 = vcmp.gt.s32.totalorder %v1307_v39, 0 }
 0x105   : > { %v1087_v52 = vsel %vm1080_vm10, %v1083_v47, %v1086_v12  ;;  %v1164_v13 = vor.u32 %v1163_v7, %v1162_v41  ;;  %v1167_v26 = vshll.u32 %v1166_v0, 23  ;;  %v1309_v58 = vsel %vm1308_vm3, %v1307_v39, 0 }
 0x106   : > { %v1088_v56 = vsel %vm1077_vm8, nan, %v1087_v52  ;;  %v1254_v53 = vadd.s32 536870912, %v1253_v24  ;;  %v1311_v42 = vand.u32 31, %v1309_v58  ;;  %v1182_v57 = vadd.s32 3, %v1178_v4 }
 0x107   : > { %v2031_v20 = vsel %vm299_vm1, %v1088_v56, %v3561_v1  ;;  %v1168_v29 = vor.u32 4788187, %v1167_v26  ;;  %v1171_v59 = vcvt.s32.f32 %v1164_v13  ;;  %v1305_v60 = vor.u32 8388608, %v1304_v16 }
 0x108   : > { %3164 = vmatprep.mubr.msk.f32.mxu0 %vm2056_vm13, %v2031_v20  ;;  %v4559_v30 = vshrl.u32 %v1254_v53, 30  ;;  %v1312_v62 = vsub.s32 32, %v1311_v42  ;;  %v1310_v14 = vshrl.u32 %v1309_v58, 5  ;;  %v1314_v61 = vshll.u32 %v3629_v17, %v1311_v42 }
 0x109   : > { %v1169_v11 = vand.u32 2147483647, %v1168_v29  ;;  %v1317_v55 = vshll.u32 %v3630_v19, %v1311_v42  ;;  %v1320_v63 = vshll.u32 %v3631_v21, %v1311_v42  ;;  %v1323_v40 = vshll.u32 %v3632_v23, %v1311_v42 }
 0x10a   : > { %v1256_v34 = vshll.u32 %v4559_v30, 30  ;;  %v1315_v43 = vshrl.u32 %v3630_v19, %v1312_v62  ;;  %v1318_v50 = vshrl.u32 %v3631_v21, %v1312_v62  ;;  %v1321_v32 = vshrl.u32 %v3632_v23, %v1312_v62 }
 0x10b   : > { %v1172_v49 = vmul.f32 %v1171_v59, %v1169_v11  ;;  %v1324_v36 = vshrl.u32 %v3633_v25, %v1312_v62  ;;  %v1326_v2 = vshll.u32 %v3633_v25, %v1311_v42  ;;  %v1327_v31 = vshrl.u32 %v3634_v38, %v1312_v62 }
 0x10c   : > { %v4573_v8 = vsub.s32 %v1253_v24, %v1256_v34  ;;  %v4577_v33 = vand.u32 3, %v1182_v57  ;;  %v4579_v44 = vshll.u32 %v1305_v60, 8  ;;  %v339_v4 = vmul.f32 %v3781_v35, %v4568_v15 }
 0x10d   : > { %v1173_v41 = vxor.u32 2147483648, %v1172_v49  ;;  %v1313_v12 = vshrl.u32 %v3629_v17, %v1312_v62  ;;  %v1316_v7 = vor.u32 %v1315_v43, %v1314_v61  ;;  %v1319_v0 = vor.u32 %v1318_v50, %v1317_v55 }
 0x10e   : > { %v1259_v39 = vsub.s32 0, %v4573_v8  ;;  %vm1195_vm4 = vcmp.lt.s32.totalorder %v4389_v28, 0  ;;  %v1322_v47 = vor.u32 %v1321_v32, %v1320_v63  ;;  %v1325_v24 = vor.u32 %v1324_v36, %v1323_v40 }
 0x10f   : > { %v1174_v5 = vsel %vm1091_vm14, %v1173_v41, %v1172_v49  ;;  %vm1329_vm5 = vcmp.lt.s32.totalorder %v1310_v14, 1  ;;  %v1328_v13 = vor.u32 %v1327_v31, %v1326_v2  ;;  %vm1332_vm6 = vcmp.lt.s32.totalorder %v1310_v14, 4 }
 0x110   : > { %v1177_v16 = vsel %vm4515_vm12, %v4309_v3, %v1174_v5  ;;  %v2979_v52 = vmin.u32 %v1259_v39, %v4573_v8  ;;  %vm1330_vm7 = vcmp.lt.s32.totalorder %v1310_v14, 2  ;;  %vm1331_vm9 = vcmp.lt.s32.totalorder %v1310_v14, 3 }
 0x111   : > { %3458 = vcosq.f32 %v1177_v16  ;;  %v1334_v26 = vsel %vm1332_vm6, %v1322_v47, 2102212464  ;;  %vm4595_vm8 = vcmp.le.f32.partialorder %v1193_v54, 0.7853982  ;;  %v1333_v51 = vsel %vm1329_vm5, %v1313_v12, %v1316_v7  ;;  %v4636_v12 = vld [vmem:[%s3769_s19 + $0x58] sm:$0xff] }
 0x112   : > { %3460 = vsinq.f32 %v1177_v16  ;;  %v1261_v56 = vclz %v2979_v52  ;;  %v1337_v53 = vsel %vm1329_vm5, %v1316_v7, %v1319_v0  ;;  %v1335_v42 = vsel %vm1331_vm9, %v1319_v0, %v1334_v26 }
 0x113   : > { %v1338_v1 = vsel %vm1332_vm6, %v1325_v24, 920167782  ;;  %v1341_v20 = vsel %vm1329_vm5, %v1319_v0, %v1322_v47  ;;  %v4605_v29 = vadd.f32 %v339_v4, %v3783_v37  ;;  %v1279_v54 = vsub.s32 4, %v4559_v30 }
 0x114   : > { %v2980_v59 = vadd.s32 4294967294, %v1261_v56  ;;  %v1339_v57 = vsel %vm1331_vm9, %v1322_v47, %v1338_v1  ;;  %v1342_v60 = vsel %vm1332_vm6, %v1328_v13, 1326507024  ;;  %v1249_v62 = vadd.s32 %v4522_v18, %v4531_v27 }
 0x115   : > { %v1336_v11 = vsel %vm1330_vm7, %v1333_v51, %v1335_v42  ;;  %v1340_v61 = vsel %vm1330_vm7, %v1337_v53, %v1339_v57  ;;  %v1343_v55 = vsel %vm1331_vm9, %v1325_v24, %v1342_v60  ;;  %vm1181_vm12 = vweird.f32 %v4309_v3  ;;  %v292_v57 = vld [vmem:[%s3769_s19 + $0x60] sm:$0xff] }
 0x116   : > { %vm2981_vm14 = vcmp.lt.s32.totalorder %v2980_v59, 0  ;;  %v1344_v34 = vsel %vm1330_vm7, %v1341_v20, %v1343_v55  ;;  %v4618_v43 = vmul.u32.u64.low %v4579_v44, %v1340_v61  ;;  %v4619_v63 = vmul.u32.u64.high %v4579_v44, %v1340_v61, %v4618_v43 }
 0x117   : > { %v1264_v40 = vsel %vm2981_vm14, 0, %v2980_v59  ;;  %v4622_v49 = vmul.u32.u64.low %v4579_v44, %v1344_v34  ;;  %v4623_v18 = vmul.u32.u64.high %v4579_v44, %v1344_v34, %v4622_v49  ;;  %v1404_v27 = vand.u32 2139095040, %v4605_v29 }
 0x118   : > { %v1265_v50 = vsub.s32 32, %v1264_v40  ;;  %v1266_v32 = vshll.u32 %v4573_v8, %v1264_v40  ;;  %v1269_v36 = vsub.s32 4294967266, %v1264_v40  ;;  %v1280_v14 = vsel %vm1195_vm4, %v1279_v54, %v4559_v30 }
 0x119   : > { %vm1184_vm10 = vcmp.lt.s32.totalorder %v4577_v33, 2  ;;  %vm1185_vm11 = vcmp.eq.s32.totalorder %v4577_v33, 0  ;;  %v1352_v2 = vmul.u32 %v4579_v44, %v1336_v11  ;;  %v1405_v31 = vshrl.u32 %v1404_v27, 23 }
 0x11a   : > { %vm1188_vm15 = vcmp.eq.s32.totalorder %v4577_v33, 2  ;;  %v1267_v41 = vshrl.u32 %v1249_v62, %v1265_v50  ;;  %v1270_v4 = vadd.s32 127, %v1269_v36  ;;  %v1355_v39 = vadd.s32 1, %v4619_v63 }
 0x11b   : > { %v3459_v8 = vpop.eup %3458  ;;  %v1282_v7 = vsel %vm4595_vm8, 0, %v1280_v14  ;;  %vm1354_vm0 = vc.u32 %v4623_v18, %v4618_v43  ;;  %v1401_v30 = vand.u32 2147483647, %v4605_v29  ;;  %v2986_v0 = vadd.s32 4294967169, %v1405_v31 }
 0x11c   : > { %v3461_v5 = vpop.eup %3460  ;;  %v1189_v44 = vxor.u32 2147483648, %v3459_v8  ;;  %v1268_v47 = vor.u32 %v1267_v41, %v1266_v32  ;;  %v1271_v24 = vshll.u32 %v1270_v4, 23  ;;  %v1356_v16 = vsel %vm1354_vm0, %v1355_v39, %v4619_v63 }
 0x11d   : > { %v1186_v52 = vxor.u32 2147483648, %v3461_v5  ;;  %v1357_v13 = vadd.s32 %v1356_v16, %v1352_v2  ;;  %v1411_v26 = vadd.s32 1, %v2986_v0  ;;  %v340_v56 = vmul.f32 %v3781_v35, %v4636_v12 }
 0x11e   : > { %v1190_v51 = vsel %vm1188_vm15, %v1189_v44, %v3461_v5  ;;  %v1272_v53 = vor.u32 4788187, %v1271_v24  ;;  %v1275_v42 = vcvt.s32.f32 %v1268_v47  ;;  %v1286_v1 = vadd.s32 3, %v1282_v7 }
 0x11f   : > { %v1187_v20 = vsel %vm1185_vm11, %v3459_v8, %v1186_v52  ;;  %v1358_v59 = vadd.s32 536870912, %v1357_v13  ;;  %v1408_v54 = vand.u32 8388607, %v1401_v30  ;;  %vm1412_vm2 = vcmp.gt.s32.totalorder %v1411_v26, 0 }
 0x120   : > { %v1191_v60 = vsel %vm1184_vm10, %v1187_v20, %v1190_v51  ;;  %v1273_v62 = vand.u32 2147483647, %v1272_v53  ;;  %v1413_v11 = vsel %vm1412_vm2, %v1411_v26, 0  ;;  %v4661_v49 = vand.u32 3, %v1286_v1 }
 0x121   : > { %v1192_v61 = vsel %vm1181_vm12, nan, %v1191_v60  ;;  %v4656_v55 = vshrl.u32 %v1358_v59, 30  ;;  %v1415_v34 = vand.u32 31, %v1413_v11  ;;  %v4664_v27 = vmul.f32 %v3781_v35, %v292_v57 }
 0x122   : > { %v2032_v63 = vsel %vm299_vm1, %v1192_v61, %v4290_v46  ;;  %v1276_v40 = vmul.f32 %v1275_v42, %v1273_v62  ;;  %v1409_v50 = vor.u32 8388608, %v1408_v54  ;;  %v4669_v32 = vadd.f32 %v340_v56, %v3783_v37 }
 0x123   : > { %3165 = vmatmul.mubr.msk.f32.gmra.mrb[6].mxu0 %vm2056_vm13, %v2032_v63  ;;  %v1360_v33 = vshll.u32 %v4656_v55, 30  ;;  %v1416_v3 = vsub.s32 32, %v1415_v34  ;;  %v4672_v14 = vadd.s32 %v4618_v43, %v4623_v18  ;;  %v1414_v46 = vshrl.u32 %v1413_v11, 5 }
 0x124   : > { %v1277_v36 = vxor.u32 2147483648, %v1276_v40  ;;  %v1418_v2 = vshll.u32 %v3629_v17, %v1415_v34  ;;  %v1421_v4 = vshll.u32 %v3630_v19, %v1415_v34  ;;  %v1424_v39 = vshll.u32 %v3631_v21, %v1415_v34 }
 0x125   : > { %v4675_v31 = vsub.s32 %v1357_v13, %v1360_v33  ;;  %v1419_v41 = vshrl.u32 %v3630_v19, %v1416_v3  ;;  %v1422_v7 = vshrl.u32 %v3631_v21, %v1416_v3  ;;  %v1425_v0 = vshrl.u32 %v3632_v23, %v1416_v3 }
 0x126   : > { %v1278_v8 = vsel %vm1195_vm4, %v1277_v36, %v1276_v40  ;;  %v1427_v43 = vshll.u32 %v3632_v23, %v1415_v34  ;;  %v1505_v44 = vand.u32 2147483647, %v4669_v32  ;;  %v1508_v47 = vand.u32 2139095040, %v4669_v32 }
 0x127   : > { %v1281_v18 = vsel %vm4595_vm8, %v4389_v28, %v1278_v8  ;;  %v1363_v5 = vsub.s32 0, %v4675_v31  ;;  %v1417_v24 = vshrl.u32 %v3629_v17, %v1416_v3  ;;  %v1420_v16 = vor.u32 %v1419_v41, %v1418_v2 }
 0x128   : > { %3462 = vcosq.f32 %v1281_v18  ;;  %v1428_v52 = vshrl.u32 %v3633_v25, %v1416_v3  ;;  %v1423_v26 = vor.u32 %v1422_v7, %v1421_v4  ;;  %v1430_v56 = vshll.u32 %v3633_v25, %v1415_v34 }
 0x129   : > { %3464 = vsinq.f32 %v1281_v18  ;;  %v2983_v13 = vmin.u32 %v1363_v5, %v4675_v31  ;;  %vm1299_vm3 = vcmp.lt.s32.totalorder %v4492_v22, 0  ;;  %v1426_v58 = vor.u32 %v1425_v0, %v1424_v39 }
 0x12a   : > { %v1429_v51 = vor.u32 %v1428_v52, %v1427_v43  ;;  %v1431_v53 = vshrl.u32 %v3634_v38, %v1416_v3  ;;  %vm1433_vm4 = vcmp.lt.s32.totalorder %v1414_v46, 1  ;;  %vm1289_vm5 = vcmp.eq.s32.totalorder %v4661_v49, 0 }
 0x12b   : > { %v1365_v42 = vclz %v2983_v13  ;;  %vm1434_vm6 = vcmp.lt.s32.totalorder %v1414_v46, 2  ;;  %v1449_v1 = vshll.u32 %v1409_v50, 8  ;;  %v1509_v20 = vshrl.u32 %v1508_v47, 23 }
 0x12c   : > { %vm1288_vm7 = vcmp.lt.s32.totalorder %v4661_v49, 2  ;;  %v1432_v59 = vor.u32 %v1431_v53, %v1430_v56  ;;  %vm1435_vm9 = vcmp.lt.s32.totalorder %v1414_v46, 3  ;;  %vm1436_vm8 = vcmp.lt.s32.totalorder %v1414_v46, 4 }
 0x12d   : > { %v1437_v54 = vsel %vm1433_vm4, %v1417_v24, %v1420_v16  ;;  %vm1285_vm12 = vweird.f32 %v4389_v28  ;;  %vm4703_vm14 = vcmp.le.f32.partialorder %v1297_v48, 0.7853982  ;;  %v2984_v60 = vadd.s32 4294967294, %v1365_v42 }
 0x12e   : > { %v1438_v62 = vsel %vm1436_vm8, %v1426_v58, 2102212464  ;;  %v1441_v11 = vsel %vm1433_vm4, %v1420_v16, %v1423_v26  ;;  %v1442_v61 = vsel %vm1436_vm8, %v1429_v51, 920167782  ;;  %v1445_v40 = vsel %vm1433_vm4, %v1423_v26, %v1426_v58 }
 0x12f   : > { %v1439_v34 = vsel %vm1435_vm9, %v1423_v26, %v1438_v62  ;;  %v1443_v63 = vsel %vm1435_vm9, %v1426_v58, %v1442_v61  ;;  %v1446_v33 = vsel %vm1436_vm8, %v1432_v59, 1326507024  ;;  %vm2985_vm10 = vcmp.lt.s32.totalorder %v2984_v60, 0 }
 0x130   : > { %v1383_v50 = vsub.s32 4, %v4656_v55  ;;  %v1444_v48 = vsel %vm1434_vm6, %v1441_v11, %v1443_v63  ;;  %v1447_v3 = vsel %vm1435_vm9, %v1429_v51, %v1446_v33  ;;  %v1368_v36 = vsel %vm2985_vm10, 0, %v2984_v60 }
 0x131   : > { %v1448_v2 = vsel %vm1434_vm6, %v1445_v40, %v1447_v3  ;;  %v4715_v41 = vmul.u32.u64.low %v1449_v1, %v1444_v48  ;;  %v4716_v4 = vmul.u32.u64.high %v1449_v1, %v1444_v48, %v4715_v41  ;;  %v1369_v39 = vsub.s32 32, %v1368_v36 }
 0x132   : > { %v1370_v8 = vshll.u32 %v4675_v31, %v1368_v36  ;;  %v1373_v7 = vsub.s32 4294967266, %v1368_v36  ;;  %v1440_v0 = vsel %vm1434_vm6, %v1437_v54, %v1439_v34  ;;  %v3463_v43 = vpop.eup %3462  ;;  %vm1292_vm11 = vcmp.eq.s32.totalorder %v4661_v49, 2 }
 0x133   : > { %v4722_v18 = vmul.u32.u64.low %v1449_v1, %v1448_v2  ;;  %v4723_v5 = vmul.u32.u64.high %v1449_v1, %v1448_v2, %v4722_v18  ;;  %v2990_v47 = vadd.s32 4294967169, %v1509_v20  ;;  %v3465_v24 = vpop.eup %3464  ;;  %v1293_v16 = vxor.u32 2147483648, %v3463_v43 }
 0x134   : > { %v1371_v52 = vshrl.u32 %v4672_v14, %v1369_v39  ;;  %v1374_v13 = vadd.s32 127, %v1373_v7  ;;  %v1384_v26 = vsel %vm1299_vm3, %v1383_v50, %v4656_v55  ;;  %v1290_v31 = vxor.u32 2147483648, %v3465_v24 }
 0x135   : > { %v1456_v56 = vmul.u32 %v1449_v1, %v1440_v0  ;;  %v1459_v46 = vadd.s32 1, %v4716_v4  ;;  %v1515_v58 = vadd.s32 1, %v2990_v47  ;;  %v1294_v51 = vsel %vm1292_vm11, %v1293_v16, %v3465_v24 }
 0x136   : > { %v1372_v53 = vor.u32 %v1371_v52, %v1370_v8  ;;  %v1375_v42 = vshll.u32 %v1374_v13, 23  ;;  %v1512_v20 = vand.u32 8388607, %v1505_v44  ;;  %v1291_v59 = vsel %vm1289_vm5, %v3463_v43, %v1290_v31 }
 0x137   : > { %v1386_v14 = vsel %vm4703_vm14, 0, %v1384_v26  ;;  %vm1458_vm15 = vc.u32 %v4723_v5, %v4715_v41  ;;  %vm1516_vm0 = vcmp.gt.s32.totalorder %v1515_v58, 0  ;;  %v1295_v55 = vsel %vm1288_vm7, %v1291_v59, %v1294_v51 }
 0x138   : > { %v1376_v1 = vor.u32 4788187, %v1375_v42  ;;  %v1379_v54 = vcvt.s32.f32 %v1372_v53  ;;  %v1460_v60 = vsel %vm1458_vm15, %v1459_v46, %v4716_v4  ;;  %v1296_v62 = vsel %vm1285_vm12, nan, %v1295_v55 }
 0x139   : > { %v1461_v11 = vadd.s32 %v1460_v60, %v1456_v56  ;;  %v1517_v61 = vsel %vm1516_vm0, %v1515_v58, 0  ;;  %v2033_v34 = vsel %vm299_vm1, %v1296_v62, %v4368_v45  ;;  %v1390_v33 = vadd.s32 3, %v1386_v14 }
 0x13a   : > { %v1377_v63 = vand.u32 2147483647, %v1376_v1  ;;  %v1519_v40 = vand.u32 31, %v1517_v61  ;;  %3167 = vmatprep.mubr.msk.f32.mxu1 %vm2056_vm13, %v2033_v34  ;;  %v4749_v50 = vadd.f32 %v4664_v27, %v3783_v37  ;;  %v1513_v3 = vor.u32 8388608, %v1512_v20 }
 0x13b   : > { %v1462_v49 = vadd.s32 536870912, %v1461_v11  ;;  %v1518_v18 = vshrl.u32 %v1517_v61, 5  ;;  %v4762_v52 = vand.u32 3, %v1390_v33  ;;  %vm1389_vm6 = vweird.f32 %v4492_v22 }
 0x13c   : > { %v1380_v48 = vmul.f32 %v1379_v54, %v1377_v63  ;;  %v1520_v28 = vsub.s32 32, %v1519_v40  ;;  %v1522_v36 = vshll.u32 %v3629_v17, %v1519_v40  ;;  %v1525_v4 = vshll.u32 %v3630_v19, %v1519_v40 }
 0x13d   : > { %v1463_v2 = vshrl.u32 %v1462_v49, 30  ;;  %v1528_v45 = vshll.u32 %v3631_v21, %v1519_v40  ;;  %v1531_v39 = vshll.u32 %v3632_v23, %v1519_v40  ;;  %v1534_v27 = vshll.u32 %v3633_v25, %v1519_v40 }
 0x13e   : > { %v1381_v8 = vxor.u32 2147483648, %v1380_v48  ;;  %v1523_v7 = vshrl.u32 %v3630_v19, %v1520_v28  ;;  %v1526_v0 = vshrl.u32 %v3631_v21, %v1520_v28  ;;  %v1529_v47 = vshrl.u32 %v3632_v23, %v1520_v28 }
 0x13f   : > { %v1464_v43 = vshll.u32 %v1463_v2, 30  ;;  %v1532_v24 = vshrl.u32 %v3633_v25, %v1520_v28  ;;  %v1521_v13 = vshrl.u32 %v3629_v17, %v1520_v28  ;;  %v1535_v26 = vshrl.u32 %v3634_v38, %v1520_v28 }
 0x140   : > { %v1382_v16 = vsel %vm1299_vm3, %v1381_v8, %v1380_v48  ;;  %v1524_v46 = vor.u32 %v1523_v7, %v1522_v36  ;;  %v1527_v58 = vor.u32 %v1526_v0, %v1525_v4  ;;  %v1530_v51 = vor.u32 %v1529_v47, %v1528_v45 }
 0x141   : > { %v1385_v31 = vsel %vm4703_vm14, %v4492_v22, %v1382_v16  ;;  %v4769_v56 = vsub.s32 %v1461_v11, %v1464_v43  ;;  %v1533_v53 = vor.u32 %v1532_v24, %v1531_v39  ;;  %v1536_v42 = vor.u32 %v1535_v26, %v1534_v27 }
 0x142   : > { %3466 = vcosq.f32 %v1385_v31  ;;  %vm1537_vm2 = vcmp.lt.s32.totalorder %v1518_v18, 1  ;;  %v1553_v59 = vshll.u32 %v1513_v3, 8  ;;  %vm1538_vm3 = vcmp.lt.s32.totalorder %v1518_v18, 2 }
 0x143   : > { %3468 = vsinq.f32 %v1385_v31  ;;  %v1467_v20 = vsub.s32 0, %v4769_v56  ;;  %vm1539_vm4 = vcmp.lt.s32.totalorder %v1518_v18, 3  ;;  %vm1540_vm5 = vcmp.lt.s32.totalorder %v1518_v18, 4 }
 0x144   : > { %v1612_v14 = vand.u32 2139095040, %v4749_v50  ;;  %v1541_v55 = vsel %vm1537_vm2, %v1521_v13, %v1524_v46  ;;  %v1542_v1 = vsel %vm1540_vm5, %v1530_v51, 2102212464  ;;  %v1545_v54 = vsel %vm1537_vm2, %v1524_v46, %v1527_v58 }
 0x145   : > { %v2987_v57 = vmin.u32 %v1467_v20, %v4769_v56  ;;  %v1543_v60 = vsel %vm1539_vm4, %v1527_v58, %v1542_v1  ;;  %v1546_v62 = vsel %vm1540_vm5, %v1533_v53, 920167782  ;;  %v1549_v11 = vsel %vm1537_vm2, %v1527_v58, %v1530_v51 }
 0x146   : > { %v1550_v61 = vsel %vm1540_vm5, %v1536_v42, 1326507024  ;;  %vm4778_vm7 = vcmp.le.f32.partialorder %v1401_v30, 0.7853982  ;;  %vm1403_vm9 = vcmp.lt.s32.totalorder %v4605_v29, 0  ;;  %v1487_v40 = vsub.s32 4, %v1463_v2 }
 0x147   : > { %v1469_v63 = vclz %v2987_v57  ;;  %vm1392_vm8 = vcmp.lt.s32.totalorder %v4762_v52, 2  ;;  %v1547_v33 = vsel %vm1539_vm4, %v1530_v51, %v1546_v62  ;;  %v1551_v49 = vsel %vm1539_vm4, %v1533_v53, %v1550_v61  ;;  %v4807_v42 = vld [vmem:[%s3769_s19 + $0x68] sm:$0xff] }
 0x148   : > { %v1613_v48 = vshrl.u32 %v1612_v14, 23  ;;  %v1544_v28 = vsel %vm1538_vm3, %v1541_v55, %v1543_v60  ;;  %v1548_v36 = vsel %vm1538_vm3, %v1545_v54, %v1547_v33  ;;  %v1552_v30 = vsel %vm1538_vm3, %v1549_v11, %v1551_v49 }
 0x149   : > { %v2988_v3 = vadd.s32 4294967294, %v1469_v63  ;;  %v4789_v4 = vmul.u32.u64.low %v1553_v59, %v1552_v30  ;;  %v4790_v45 = vmul.u32.u64.high %v1553_v59, %v1552_v30, %v4789_v4  ;;  %v1457_v7 = vadd.s32 %v4715_v41, %v4723_v5 }
 0x14a   : > { %v4792_v39 = vmul.u32.u64.low %v1553_v59, %v1548_v36  ;;  %v4793_v8 = vmul.u32.u64.high %v1553_v59, %v1548_v36, %v4792_v39  ;;  %v1488_v0 = vsel %vm1403_vm9, %v1487_v40, %v1463_v2  ;;  %v2994_v27 = vadd.s32 4294967169, %v1613_v48 }
 0x14b   : > { %vm2989_vm12 = vcmp.lt.s32.totalorder %v2988_v3, 0  ;;  %vm1393_vm14 = vcmp.eq.s32.totalorder %v4762_v52, 0  ;;  %vm1396_vm10 = vcmp.eq.s32.totalorder %v4762_v52, 2  ;;  %v1560_v47 = vmul.u32 %v1553_v59, %v1544_v28 }
 0x14c   : > { %v3467_v43 = vpop.eup %3466  ;;  %v1472_v18 = vsel %vm2989_vm12, 0, %v2988_v3  ;;  %v1490_v5 = vsel %vm4778_vm7, 0, %v1488_v0  ;;  %vm1562_vm11 = vc.u32 %v4790_v45, %v4792_v39  ;;  %v1563_v2 = vadd.s32 1, %v4793_v8 }
 0x14d   : > { %v3469_v24 = vpop.eup %3468  ;;  %v1397_v16 = vxor.u32 2147483648, %v3467_v43  ;;  %v1473_v13 = vsub.s32 32, %v1472_v18  ;;  %v1474_v26 = vshll.u32 %v4769_v56, %v1472_v18  ;;  %v1477_v31 = vsub.s32 4294967266, %v1472_v18 }
 0x14e   : > { %v1394_v41 = vxor.u32 2147483648, %v3469_v24  ;;  %v1619_v53 = vadd.s32 1, %v2994_v27  ;;  %v1564_v56 = vsel %vm1562_vm11, %v1563_v2, %v4793_v8  ;;  %v1609_v59 = vand.u32 2147483647, %v4749_v50 }
 0x14f   : > { %v1398_v46 = vsel %vm1396_vm10, %v1397_v16, %v3469_v24  ;;  %v1475_v58 = vshrl.u32 %v1457_v7, %v1473_v13  ;;  %v1478_v51 = vadd.s32 127, %v1477_v31  ;;  %v1565_v1 = vadd.s32 %v1564_v56, %v1560_v47 }
 0x150   : > { %v1395_v20 = vsel %vm1393_vm14, %v3467_v43, %v1394_v41  ;;  %v1494_v60 = vadd.s32 3, %v1490_v5  ;;  %vm1620_vm15 = vcmp.gt.s32.totalorder %v1619_v53, 0  ;;  %v342_v62 = vmul.f32 %v3781_v35, %v4807_v42 }
 0x151   : > { %v1399_v14 = vsel %vm1392_vm8, %v1395_v20, %v1398_v46  ;;  %v1476_v57 = vor.u32 %v1475_v58, %v1474_v26  ;;  %v1479_v55 = vshll.u32 %v1478_v51, 23  ;;  %v1566_v40 = vadd.s32 536870912, %v1565_v1 }
 0x152   : > { %v1400_v54 = vsel %vm1389_vm6, nan, %v1399_v14  ;;  %v1616_v52 = vand.u32 8388607, %v1609_v59  ;;  %v1621_v33 = vsel %vm1620_vm15, %v1619_v53, 0  ;;  %v4827_v3 = vand.u32 3, %v1494_v60 }
 0x153   : > { %v2034_v11 = vsel %vm299_vm1, %v1400_v54, %v4472_v6  ;;  %v1480_v61 = vor.u32 4788187, %v1479_v55  ;;  %v1483_v63 = vcvt.s32.f32 %v1476_v57  ;;  %v4825_v49 = vshrl.u32 %v1566_v40, 30 }
 0x154   : > { %3168 = vmatmul.mubr.msk.f32.vlgmr.msra.gmra.mrb[0].mxu1 %vm2056_vm13, %v2034_v11  ;;  %v1623_v48 = vand.u32 31, %v1621_v33  ;;  %v4831_v6 = vadd.f32 %v342_v62, %v3783_v37  ;;  %v4834_v4 = vadd.s32 %v4792_v39, %v4790_v45  ;;  %v1617_v8 = vor.u32 8388608, %v1616_v52 }
 0x155   : > { %v1481_v22 = vand.u32 2147483647, %v1480_v61  ;;  %v1568_v36 = vshll.u32 %v4825_v49, 30  ;;  %v1622_v24 = vshrl.u32 %v1621_v33, 5  ;;  %vm1507_vm0 = vcmp.lt.s32.totalorder %v4669_v32, 0 }
 0x156   : > { %v1624_v30 = vsub.s32 32, %v1623_v48  ;;  %v1626_v7 = vshll.u32 %v3629_v17, %v1623_v48  ;;  %v1629_v0 = vshll.u32 %v3630_v19, %v1623_v48  ;;  %v1632_v18 = vshll.u32 %v3631_v21, %v1623_v48 }
 0x157   : > { %v1484_v28 = vmul.f32 %v1483_v63, %v1481_v22  ;;  %v4838_v43 = vsub.s32 %v1565_v1, %v1568_v36  ;;  %v1635_v47 = vshll.u32 %v3632_v23, %v1623_v48  ;;  %v1716_v41 = vand.u32 2139095040, %v4831_v6 }
 0x158   : > { %v1627_v16 = vshrl.u32 %v3630_v19, %v1624_v30  ;;  %v1630_v13 = vshrl.u32 %v3631_v21, %v1624_v30  ;;  %v1633_v45 = vshrl.u32 %v3632_v23, %v1624_v30  ;;  %v1636_v31 = vshrl.u32 %v3633_v25, %v1624_v30 }
 0x159   : > { %v1485_v27 = vxor.u32 2147483648, %v1484_v28  ;;  %v1571_v26 = vsub.s32 0, %v4838_v43  ;;  %v1625_v2 = vshrl.u32 %v3629_v17, %v1624_v30  ;;  %v1638_v56 = vshll.u32 %v3633_v25, %v1623_v48 }
 0x15a   : > { %v1628_v46 = vor.u32 %v1627_v16, %v1626_v7  ;;  %v1631_v58 = vor.u32 %v1630_v13, %v1629_v0  ;;  %v1634_v53 = vor.u32 %v1633_v45, %v1632_v18  ;;  %v1637_v20 = vor.u32 %v1636_v31, %v1635_v47  ;;  %v4883_v16 = vld [vmem:[%s3769_s19 + $0x70] sm:$0xff] }
 0x15b   : > { %v1486_v39 = vsel %vm1403_vm9, %v1485_v27, %v1484_v28  ;;  %v2991_v51 = vmin.u32 %v1571_v26, %v4838_v43  ;;  %v1639_v14 = vshrl.u32 %v3634_v38, %v1624_v30  ;;  %vm1641_vm2 = vcmp.lt.s32.totalorder %v1622_v24, 1 }
 0x15c   : > { %v1489_v5 = vsel %vm4778_vm7, %v4605_v29, %v1486_v39  ;;  %vm1500_vm3 = vcmp.eq.s32.totalorder %v4827_v3, 2  ;;  %v4859_v57 = vshll.u32 %v1617_v8, 8  ;;  %v1713_v55 = vand.u32 2147483647, %v4831_v6 }
 0x15d   : > { %3470 = vcosq.f32 %v1489_v5  ;;  %v1573_v34 = vclz %v2991_v51  ;;  %v1717_v1 = vshrl.u32 %v1716_v41, 23  ;;  %vm1497_vm4 = vcmp.eq.s32.totalorder %v4827_v3, 0 }
 0x15e   : > { %3472 = vsinq.f32 %v1489_v5  ;;  %v1640_v54 = vor.u32 %v1639_v14, %v1638_v56  ;;  %vm1642_vm5 = vcmp.lt.s32.totalorder %v1622_v24, 2  ;;  %vm1643_vm6 = vcmp.lt.s32.totalorder %v1622_v24, 3 }
 0x15f   : > { %vm1644_vm7 = vcmp.lt.s32.totalorder %v1622_v24, 4  ;;  %vm1496_vm9 = vcmp.lt.s32.totalorder %v4827_v3, 2  ;;  %vm4866_vm8 = vcmp.le.f32.partialorder %v1505_v44, 0.7853982  ;;  %v2992_v62 = vadd.s32 4294967294, %v1573_v34  ;;  %v4921_v3 = vpop.f32.mrb[0].mxu0 }
 0x160   : > { %v1645_v11 = vsel %vm1641_vm2, %v1625_v2, %v1628_v46  ;;  %v1646_v61 = vsel %vm1644_vm7, %v1634_v53, 2102212464  ;;  %v1649_v63 = vsel %vm1641_vm2, %v1628_v46, %v1631_v58  ;;  %vm1493_vm12 = vweird.f32 %v4605_v29 }
 0x161   : > { %v1647_v40 = vsel %vm1643_vm6, %v1631_v58, %v1646_v61  ;;  %v1650_v52 = vsel %vm1644_vm7, %v1637_v20, 920167782  ;;  %v1653_v33 = vsel %vm1641_vm2, %v1631_v58, %v1634_v53  ;;  %v1654_v22 = vsel %vm1644_vm7, %v1640_v54, 1326507024 }
 0x162   : > { %vm2993_vm14 = vcmp.lt.s32.totalorder %v2992_v62, 0  ;;  %v1591_v44 = vsub.s32 4, %v4825_v49  ;;  %v1651_v48 = vsel %vm1643_vm6, %v1634_v53, %v1650_v52  ;;  %v1655_v28 = vsel %vm1643_vm6, %v1637_v20, %v1654_v22 }
 0x163   : > { %v1576_v36 = vsel %vm2993_vm14, 0, %v2992_v62  ;;  %v1648_v30 = vsel %vm1642_vm5, %v1645_v11, %v1647_v40  ;;  %v1652_v8 = vsel %vm1642_vm5, %v1649_v63, %v1651_v48  ;;  %v1656_v7 = vsel %vm1642_vm5, %v1653_v33, %v1655_v28 }
 0x164   : > { %v1577_v0 = vsub.s32 32, %v1576_v36  ;;  %v1578_v27 = vshll.u32 %v4838_v43, %v1576_v36  ;;  %v1581_v18 = vsub.s32 4294967266, %v1576_v36  ;;  %v2998_v47 = vadd.s32 4294967169, %v1717_v1 }
 0x165   : > { %v4886_v13 = vmul.u32.u64.low %v4859_v57, %v1656_v7  ;;  %v4887_v45 = vmul.u32.u64.high %v4859_v57, %v1656_v7, %v4886_v13  ;;  %v4890_v39 = vmul.u32.u64.low %v4859_v57, %v1652_v8  ;;  %v4891_v26 = vmul.u32.u64.high %v4859_v57, %v1652_v8, %v4890_v39 }
 0x166   : > { %v1579_v24 = vshrl.u32 %v4834_v4, %v1577_v0  ;;  %v1582_v41 = vadd.s32 127, %v1581_v18  ;;  %v1592_v43 = vsel %vm1507_vm0, %v1591_v44, %v4825_v49  ;;  %v1723_v5 = vadd.s32 1, %v2998_v47 }
 0x167   : > { %v3471_v31 = vpop.eup %3470  ;;  %v1664_v58 = vmul.u32 %v4859_v57, %v1648_v30  ;;  %v1720_v51 = vand.u32 8388607, %v1713_v55  ;;  %v343_v53 = vmul.f32 %v3781_v35, %v4883_v16  ;;  %v1594_v49 = vsel %vm4866_vm8, 0, %v1592_v43 }
 0x168   : > { %v3473_v2 = vpop.eup %3472  ;;  %v1501_v46 = vxor.u32 2147483648, %v3471_v31  ;;  %v1580_v56 = vor.u32 %v1579_v24, %v1578_v27  ;;  %v1583_v14 = vshll.u32 %v1582_v41, 23  ;;  %vm1724_vm10 = vcmp.gt.s32.totalorder %v1723_v5, 0  ;;  %v4926_v27 = vpop.f32.mrb[1].mxu0 }
 0x169   : > { %v1498_v20 = vxor.u32 2147483648, %v3473_v2  ;;  %vm1666_vm11 = vc.u32 %v4887_v45, %v4890_v39  ;;  %v1667_v34 = vadd.s32 1, %v4891_v26  ;;  %v1725_v62 = vsel %vm1724_vm10, %v1723_v5, 0 }
 0x16a   : > { %v1502_v4 = vsel %vm1500_vm3, %v1501_v46, %v3473_v2  ;;  %v1584_v1 = vor.u32 4788187, %v1583_v14  ;;  %v1587_v54 = vcvt.s32.f32 %v1580_v56  ;;  %v1721_v63 = vor.u32 8388608, %v1720_v51 }
 0x16b   : > { %v1499_v57 = vsel %vm1497_vm4, %v3471_v31, %v1498_v20  ;;  %v1668_v61 = vsel %vm1666_vm11, %v1667_v34, %v4891_v26  ;;  %v1727_v40 = vand.u32 31, %v1725_v62  ;;  %v1598_v22 = vadd.s32 3, %v1594_v49 }
 0x16c   : > { %v1503_v11 = vsel %vm1496_vm9, %v1499_v57, %v1502_v4  ;;  %v1585_v33 = vand.u32 2147483647, %v1584_v1  ;;  %v1669_v44 = vadd.s32 %v1668_v61, %v1664_v58  ;;  %v1726_v28 = vshrl.u32 %v1725_v62, 5 }
 0x16d   : > { %v1504_v52 = vsel %vm1493_vm12, nan, %v1503_v11  ;;  %v1728_v36 = vsub.s32 32, %v1727_v40  ;;  %v1730_v30 = vshll.u32 %v3629_v17, %v1727_v40  ;;  %v1733_v29 = vshll.u32 %v3630_v19, %v1727_v40 }
 0x16e   : > { %v2035_v48 = vsel %vm299_vm1, %v1504_v52, %v4568_v15  ;;  %v1588_v8 = vmul.f32 %v1587_v54, %v1585_v33  ;;  %v1670_v7 = vadd.s32 536870912, %v1669_v44  ;;  %v1736_v0 = vshll.u32 %v3631_v21, %v1727_v40 }
 0x16f   : > { %3170 = vmatprep.mubr.msk.f32.mxu1 %vm2056_vm13, %v2035_v48  ;;  %v1731_v18 = vshrl.u32 %v3630_v19, %v1728_v36  ;;  %v1734_v15 = vshrl.u32 %v3631_v21, %v1728_v36  ;;  %v1737_v47 = vshrl.u32 %v3632_v23, %v1728_v36  ;;  %v1739_v13 = vshll.u32 %v3632_v23, %v1727_v40 }
 0x170   : > { %v1589_v26 = vxor.u32 2147483648, %v1588_v8  ;;  %v4932_v31 = vshrl.u32 %v1670_v7, 30  ;;  %v1740_v24 = vshrl.u32 %v3633_v25, %v1728_v36  ;;  %v1742_v41 = vshll.u32 %v3633_v25, %v1727_v40  ;;  %v2266_v7 = vld [vmem:[%s5430_s3] sm:$0xff] }
 0x171   : > { %v4936_v43 = vand.u32 3, %v1598_v22  ;;  %v1729_v5 = vshrl.u32 %v3629_v17, %v1728_v36  ;;  %v1743_v2 = vshrl.u32 %v3634_v38, %v1728_v36  ;;  %v4941_v46 = vadd.f32 %v343_v53, %v3783_v37 }
 0x172   : > { %v1590_v58 = vsel %vm1507_vm0, %v1589_v26, %v1588_v8  ;;  %v1672_v51 = vshll.u32 %v4932_v31, 30  ;;  %v1732_v20 = vor.u32 %v1731_v18, %v1730_v30  ;;  %v1735_v56 = vor.u32 %v1734_v15, %v1733_v29  ;;  %v2267_v29 = vld [vmem:[%s5430_s3 + $0x8] sm:$0xff]  ;;  %v2269_v26 = vld [vmem:[%s5430_s3 + $0x18] sm:$0xff] }
 0x173   : > { %v1593_v14 = vsel %vm4866_vm8, %v4669_v32, %v1590_v58  ;;  %v1741_v4 = vor.u32 %v1740_v24, %v1739_v13  ;;  %v1744_v49 = vor.u32 %v1743_v2, %v1742_v41  ;;  %vm1745_vm15 = vcmp.lt.s32.totalorder %v1726_v28, 1  ;;  %v2268_v13 = vld [vmem:[%s5430_s3 + $0x10] sm:$0xff] }
 0x174   : > { %3474 = vcosq.f32 %v1593_v14  ;;  %v4949_v34 = vsub.s32 %v1669_v44, %v1672_v51  ;;  %v1738_v57 = vor.u32 %v1737_v47, %v1736_v0  ;;  %v4951_v53 = vshll.u32 %v1721_v63, 8 }
 0x175   : > { %3476 = vsinq.f32 %v1593_v14  ;;  %vm1747_vm2 = vcmp.lt.s32.totalorder %v1726_v28, 3  ;;  %vm1748_vm0 = vcmp.lt.s32.totalorder %v1726_v28, 4  ;;  %v1820_v1 = vand.u32 2139095040, %v4941_v46 }
 0x176   : > { %v1675_v54 = vsub.s32 0, %v4949_v34  ;;  %vm1746_vm3 = vcmp.lt.s32.totalorder %v1726_v28, 2  ;;  %v1750_v62 = vsel %vm1748_vm0, %v1738_v57, 2102212464  ;;  %v1753_v60 = vsel %vm1745_vm15, %v1732_v20, %v1735_v56 }
 0x177   : > { %v1749_v11 = vsel %vm1745_vm15, %v1729_v5, %v1732_v20  ;;  %v1751_v61 = vsel %vm1747_vm2, %v1735_v56, %v1750_v62  ;;  %v1754_v40 = vsel %vm1748_vm0, %v1741_v4, 920167782  ;;  %v1758_v52 = vsel %vm1748_vm0, %v1744_v49, 1326507024  ;;  %v2270_v49 = vld [vmem:[%s5430_s3 + $0x20] sm:$0xff] }
 0x178   : > { %v2995_v63 = vmin.u32 %v1675_v54, %v4949_v34  ;;  %v1755_v33 = vsel %vm1747_vm2, %v1738_v57, %v1754_v40  ;;  %v1757_v22 = vsel %vm1745_vm15, %v1735_v56, %v1738_v57  ;;  %vm1597_vm4 = vweird.f32 %v4669_v32  ;;  %v2271_v57 = vld [vmem:[%s5430_s3 + $0x28] sm:$0xff] }
 0x179   : > { %v1756_v44 = vsel %vm1746_vm3, %v1753_v60, %v1755_v33  ;;  %v1759_v48 = vsel %vm1747_vm2, %v1741_v4, %v1758_v52  ;;  %v1821_v36 = vshrl.u32 %v1820_v1, 23  ;;  %vm1600_vm5 = vcmp.lt.s32.totalorder %v4936_v43, 2 }
 0x17a   : > { %vm1601_vm6 = vcmp.eq.s32.totalorder %v4936_v43, 0  ;;  %v1677_v30 = vclz %v2995_v63  ;;  %v1752_v8 = vsel %vm1746_vm3, %v1749_v11, %v1751_v61  ;;  %v1760_v0 = vsel %vm1746_vm3, %v1757_v22, %v1759_v48 }
 0x17b   : > { %v4975_v18 = vmul.u32.u64.low %v4951_v53, %v1756_v44  ;;  %v4976_v15 = vmul.u32.u64.high %v4951_v53, %v1756_v44, %v4975_v18  ;;  %v3002_v47 = vadd.s32 4294967169, %v1821_v36  ;;  %vm1604_vm7 = vcmp.eq.s32.totalorder %v4936_v43, 2 }
 0x17c   : > { %v2996_v24 = vadd.s32 4294967294, %v1677_v30  ;;  %v4987_v28 = vmul.u32.u64.low %v4951_v53, %v1760_v0  ;;  %v4988_v41 = vmul.u32.u64.high %v4951_v53, %v1760_v0, %v4987_v28  ;;  %v1665_v5 = vadd.s32 %v4890_v39, %v4887_v45 }
 0x17d   : > { %v1817_v2 = vand.u32 2147483647, %v4941_v46  ;;  %v1827_v58 = vadd.s32 1, %v3002_v47  ;;  %v3275_v51 = vpack.c.bf16 %v2267_v29, %v2266_v7  ;;  %v1695_v56 = vsub.s32 4, %v4932_v31 }
 0x17e   : > { %v3475_v20 = vpop.eup %3474  ;;  %vm2997_vm9 = vcmp.lt.s32.totalorder %v2996_v24, 0  ;;  %v1768_v14 = vmul.u32 %v4951_v53, %v1752_v8  ;;  %v3279_v4 = vpack.c.bf16 %v2269_v26, %v2268_v13  ;;  %v1771_v54 = vadd.s32 1, %v4976_v15 }
 0x17f   : > { %v3477_v45 = vpop.eup %3476  ;;  %v1605_v39 = vxor.u32 2147483648, %v3475_v20  ;;  %v1680_v1 = vsel %vm2997_vm9, 0, %v2996_v24  ;;  %vm1828_vm8 = vcmp.gt.s32.totalorder %v1827_v58, 0  ;;  %3276 = vmatprep.subr.bf16.mxu1 %v3275_v51  ;;  %vm1770_vm12 = vc.u32 %v4988_v41, %v4975_v18 }
 0x180   : > { %v1602_v62 = vxor.u32 2147483648, %v3477_v45  ;;  %v1681_v60 = vsub.s32 32, %v1680_v1  ;;  %v1682_v53 = vshll.u32 %v4949_v34, %v1680_v1  ;;  %v1685_v11 = vsub.s32 4294967266, %v1680_v1  ;;  %3278 = vmatpush3.bf16.msra.mxu1 %v3275_v51 }
 0x181   : > { %v1606_v61 = vsel %vm1604_vm7, %v1605_v39, %v3477_v45  ;;  %v1829_v40 = vsel %vm1828_vm8, %v1827_v58, 0  ;;  %3280 = vmatprep.subr.bf16.mxu1 %v3279_v4  ;;  %v3283_v52 = vpack.c.bf16 %v2271_v57, %v2270_v49  ;;  %v1772_v44 = vsel %vm1770_vm12, %v1771_v54, %v4976_v15 }
 0x182   : > { %v1603_v63 = vsel %vm1601_vm6, %v3475_v20, %v1602_v62  ;;  %v1683_v33 = vshrl.u32 %v1665_v5, %v1681_v60  ;;  %v1686_v22 = vadd.s32 127, %v1685_v11  ;;  %vm1611_vm14 = vcmp.lt.s32.totalorder %v4749_v50, 0 }
 0x183   : > { %v1607_v34 = vsel %vm1600_vm5, %v1603_v63, %v1606_v61  ;;  %v1773_v48 = vadd.s32 %v1772_v44, %v1768_v14  ;;  %v1831_v36 = vand.u32 31, %v1829_v40  ;;  %v1696_v29 = vsel %vm1611_vm14, %v1695_v56, %v4932_v31  ;;  %v5027_v31 = vld [vmem:[%s3769_s19 + $0x78] sm:$0xff] }
 0x184   : > { %v1608_v30 = vsel %vm1597_vm4, nan, %v1607_v34  ;;  %v1684_v8 = vor.u32 %v1683_v33, %v1682_v53  ;;  %v1687_v7 = vshll.u32 %v1686_v22, 23  ;;  %3282 = vmatpush3.bf16.msra.mxu1 %v3279_v4  ;;  %v1824_v15 = vand.u32 8388607, %v1817_v2 }
 0x185   : > { %v2036_v43 = vsel %vm299_vm1, %v1608_v30, %v4636_v12  ;;  %v1774_v0 = vadd.s32 536870912, %v1773_v48  ;;  %v1832_v47 = vsub.s32 32, %v1831_v36  ;;  %3284 = vmatprep.subr.bf16.mxu1 %v3283_v52  ;;  %v1834_v26 = vshll.u32 %v3629_v17, %v1831_v36 }
 0x186   : > { %3171 = vmatmul.mubr.msk.f32.gmra.mrb[2].mxu1 %vm2056_vm13, %v2036_v43  ;;  %v1688_v32 = vor.u32 4788187, %v1687_v7  ;;  %v1691_v13 = vcvt.s32.f32 %v1684_v8  ;;  %v1837_v24 = vshll.u32 %v3630_v19, %v1831_v36  ;;  %v1840_v58 = vshll.u32 %v3631_v21, %v1831_v36 }
 0x187   : > { %v5029_v28 = vshrl.u32 %v1774_v0, 30  ;;  %v1835_v12 = vshrl.u32 %v3630_v19, %v1832_v47  ;;  %v1838_v5 = vshrl.u32 %v3631_v21, %v1832_v47  ;;  %v1841_v20 = vshrl.u32 %v3632_v23, %v1832_v47 }
 0x188   : > { %v1689_v51 = vand.u32 2147483647, %v1688_v32  ;;  %v1843_v56 = vshll.u32 %v3632_v23, %v1831_v36  ;;  %v1844_v14 = vshrl.u32 %v3633_v25, %v1832_v47  ;;  %3286 = vmatpush3.bf16.msra.mxu1 %v3283_v52  ;;  %vm5039_vm10 = vcmp.le.f32.partialorder %v1609_v59, 0.7853982 }
 0x189   : > { %v1776_v49 = vshll.u32 %v5029_v28, 30  ;;  %v1830_v57 = vshrl.u32 %v1829_v40, 5  ;;  %v344_v45 = vmul.f32 %v3781_v35, %v5027_v31  ;;  %v1698_v1 = vsel %vm5039_vm10, 0, %v1696_v29 }
 0x18a   : > { %v1692_v39 = vmul.f32 %v1691_v13, %v1689_v51  ;;  %v1825_v54 = vor.u32 8388608, %v1824_v15  ;;  %v1846_v62 = vshll.u32 %v3633_v25, %v1831_v36  ;;  %v1833_v59 = vshrl.u32 %v3629_v17, %v1832_v47 }
 0x18b   : > { %v5049_v60 = vsub.s32 %v1773_v48, %v1776_v49  ;;  %v1836_v53 = vor.u32 %v1835_v12, %v1834_v26  ;;  %v1847_v11 = vshrl.u32 %v3634_v38, %v1832_v47  ;;  %v1839_v52 = vor.u32 %v1838_v5, %v1837_v24 }
 0x18c   : > { %v1693_v61 = vxor.u32 2147483648, %v1692_v39  ;;  %v1842_v40 = vor.u32 %v1841_v20, %v1840_v58  ;;  %v1845_v63 = vor.u32 %v1844_v14, %v1843_v56  ;;  %v1702_v33 = vadd.s32 3, %v1698_v1 }
 0x18d   : > { %v1779_v35 = vsub.s32 0, %v5049_v60  ;;  %vm1849_vm11 = vcmp.lt.s32.totalorder %v1830_v57, 1  ;;  %vm1852_vm15 = vcmp.lt.s32.totalorder %v1830_v57, 4  ;;  %v1848_v34 = vor.u32 %v1847_v11, %v1846_v62 }
 0x18e   : > { %v1694_v44 = vsel %vm1611_vm14, %v1693_v61, %v1692_v39  ;;  %v1854_v48 = vsel %vm1852_vm15, %v1842_v40, 2102212464  ;;  %v1865_v36 = vshll.u32 %v1825_v54, 8  ;;  %vm1850_vm2 = vcmp.lt.s32.totalorder %v1830_v57, 2 }
 0x18f   : > { %v5054_v22 = vpop.f32.mrb[2].mxu0  ;;  %v1697_v8 = vsel %vm5039_vm10, %v4749_v50, %v1694_v44  ;;  %v2999_v7 = vmin.u32 %v1779_v35, %v5049_v60  ;;  %vm1851_vm0 = vcmp.lt.s32.totalorder %v1830_v57, 3  ;;  %v1853_v29 = vsel %vm1849_vm11, %v1833_v59, %v1836_v53 }
 0x190   : > { %v5059_v30 = vpop.f32.mrb[3].mxu0  ;;  %3478 = vcosq.f32 %v1697_v8  ;;  %v1857_v43 = vsel %vm1849_vm11, %v1836_v53, %v1839_v52  ;;  %v1858_v0 = vsel %vm1852_vm15, %v1845_v63, 920167782  ;;  %v1855_v47 = vsel %vm1851_vm0, %v1839_v52, %v1854_v48 }
 0x191   : > { %3480 = vsinq.f32 %v1697_v8  ;;  %v1781_v15 = vclz %v2999_v7  ;;  %v1861_v32 = vsel %vm1849_vm11, %v1839_v52, %v1842_v40  ;;  %v1859_v13 = vsel %vm1851_vm0, %v1842_v40, %v1858_v0 }
 0x192   : > { %v1862_v26 = vsel %vm1852_vm15, %v1848_v34, 1326507024  ;;  %v5071_v24 = vadd.f32 %v344_v45, %v3783_v37  ;;  %v1703_v12 = vand.u32 3, %v1702_v33  ;;  %v1860_v58 = vsel %vm1850_vm2, %v1857_v43, %v1859_v13 }
 0x193   : > { %v3000_v5 = vadd.s32 4294967294, %v1781_v15  ;;  %v1863_v51 = vsel %vm1851_vm0, %v1845_v63, %v1862_v26  ;;  %v1856_v20 = vsel %vm1850_vm2, %v1853_v29, %v1855_v47  ;;  %vm1701_vm3 = vweird.f32 %v4749_v50 }
 0x194   : > { %v1864_v56 = vsel %vm1850_vm2, %v1861_v32, %v1863_v51  ;;  %v5076_v14 = vmul.u32.u64.low %v1865_v36, %v1860_v58  ;;  %v5077_v4 = vmul.u32.u64.high %v1865_v36, %v1860_v58, %v5076_v14  ;;  %v1769_v49 = vadd.s32 %v4975_v18, %v4988_v41 }
 0x195   : > { %vm3001_vm4 = vcmp.lt.s32.totalorder %v3000_v5, 0  ;;  %v5083_v37 = vmul.u32.u64.low %v1865_v36, %v1864_v56  ;;  %v5084_v45 = vmul.u32.u64.high %v1865_v36, %v1864_v56, %v5083_v37  ;;  %vm1715_vm5 = vcmp.lt.s32.totalorder %v4831_v6, 0 }
 0x196   : > { %v1784_v39 = vsel %vm3001_vm4, 0, %v3000_v5  ;;  %v1799_v1 = vsub.s32 4, %v5029_v28  ;;  %v1924_v57 = vand.u32 2139095040, %v5071_v24  ;;  %v1872_v53 = vmul.u32 %v1865_v36, %v1856_v20  ;;  %v3562_v37 = vld [vmem:[%s3769_s19 + $0x60] sm:$0xff] }
 0x197   : > { %v1785_v54 = vsub.s32 32, %v1784_v39  ;;  %v1786_v62 = vshll.u32 %v5049_v60, %v1784_v39  ;;  %v1789_v59 = vsub.s32 4294967266, %v1784_v39  ;;  %vm1704_vm6 = vcmp.lt.s32.totalorder %v1703_v12, 2  ;;  %v2272_v60 = vld [vmem:[%s5430_s3 + $0x30] sm:$0xff] }
 0x198   : > { %vm5092_vm7 = vcmp.le.f32.partialorder %v1713_v55, 0.7853982  ;;  %v1875_v41 = vadd.s32 1, %v5077_v4  ;;  %v1925_v11 = vshrl.u32 %v1924_v57, 23  ;;  %vm1705_vm9 = vcmp.eq.s32.totalorder %v1703_v12, 0  ;;  %v2273_v55 = vld [vmem:[%s5430_s3 + $0x38] sm:$0xff] }
 0x199   : > { %v1787_v61 = vshrl.u32 %v1769_v49, %v1785_v54  ;;  %v1790_v52 = vadd.s32 127, %v1789_v59  ;;  %vm1874_vm8 = vc.u32 %v5084_v45, %v5076_v14  ;;  %vm1708_vm12 = vcmp.eq.s32.totalorder %v1703_v12, 2 }
 0x19a   : > { %v3479_v40 = vpop.eup %3478  ;;  %v1800_v63 = vsel %vm1715_vm5, %v1799_v1, %v5029_v28  ;;  %v1876_v33 = vsel %vm1874_vm8, %v1875_v41, %v5077_v4  ;;  %v3006_v35 = vadd.s32 4294967169, %v1925_v11  ;;  %v1921_v29 = vand.u32 2147483647, %v5071_v24 }
 0x19b   : > { %v3481_v44 = vpop.eup %3480  ;;  %v1709_v34 = vxor.u32 2147483648, %v3479_v40  ;;  %v1788_v48 = vor.u32 %v1787_v61, %v1786_v62  ;;  %v1791_v36 = vshll.u32 %v1790_v52, 23  ;;  %v1877_v8 = vadd.s32 %v1876_v33, %v1872_v53 }
 0x19c   : > { %v1706_v7 = vxor.u32 2147483648, %v3481_v44  ;;  %v1931_v43 = vadd.s32 1, %v3006_v35  ;;  %v3287_v0 = vpack.c.bf16 %v2273_v55, %v2272_v60  ;;  %v1802_v26 = vsel %vm5092_vm7, 0, %v1800_v63 }
 0x19d   : > { %v1710_v15 = vsel %vm1708_vm12, %v1709_v34, %v3481_v44  ;;  %v1792_v47 = vor.u32 4788187, %v1791_v36  ;;  %v1795_v32 = vcvt.s32.f32 %v1788_v48  ;;  %v1878_v13 = vadd.s32 536870912, %v1877_v8 }
 0x19e   : > { %v1707_v28 = vsel %vm1705_vm9, %v3479_v40, %v1706_v7  ;;  %vm1932_vm14 = vcmp.gt.s32.totalorder %v1931_v43, 0  ;;  %3288 = vmatprep.subr.bf16.mxu1 %v3287_v0  ;;  %v1928_v4 = vand.u32 8388607, %v1921_v29  ;;  %v1806_v57 = vadd.s32 3, %v1802_v26 }
 0x19f   : > { %v1711_v5 = vsel %vm1704_vm6, %v1707_v28, %v1710_v15  ;;  %v1793_v58 = vand.u32 2147483647, %v1792_v47  ;;  %v5114_v51 = vshrl.u32 %v1878_v13, 30  ;;  %v1933_v20 = vsel %vm1932_vm14, %v1931_v43, 0  ;;  %3290 = vmatpush3.bf16.msra.mxu1 %v3287_v0 }
 0x1a0   : > { %v1712_v56 = vsel %vm1701_vm3, nan, %v1711_v5  ;;  %v1935_v49 = vand.u32 31, %v1933_v20  ;;  %v1929_v11 = vor.u32 8388608, %v1928_v4  ;;  %v1934_v63 = vshrl.u32 %v1933_v20, 5 }
 0x1a1   : > { %v2037_v39 = vsel %vm299_vm1, %v1712_v56, %v3562_v37  ;;  %v1796_v1 = vmul.f32 %v1795_v32, %v1793_v58  ;;  %v1880_v12 = vshll.u32 %v5114_v51, 30  ;;  %v1807_v43 = vand.u32 3, %v1806_v57 }
 0x1a2   : > { %3173 = vmatprep.mubr.msk.f32.mxu1 %vm2056_vm13, %v2037_v39  ;;  %v1936_v54 = vsub.s32 32, %v1935_v49  ;;  %v1938_v62 = vshll.u32 %v3629_v17, %v1935_v49  ;;  %v1941_v53 = vshll.u32 %v3630_v19, %v1935_v49  ;;  %v1944_v41 = vshll.u32 %v3631_v21, %v1935_v49 }
 0x1a3   : > { %v1797_v59 = vxor.u32 2147483648, %v1796_v1  ;;  %v5126_v50 = vsub.s32 %v1877_v8, %v1880_v12  ;;  %v1947_v60 = vshll.u32 %v3632_v23, %v1935_v49  ;;  %v1950_v7 = vshll.u32 %v3633_v25, %v1935_v49 }
 0x1a4   : > { %v1939_v61 = vshrl.u32 %v3630_v19, %v1936_v54  ;;  %v1942_v52 = vshrl.u32 %v3631_v21, %v1936_v54  ;;  %v1945_v33 = vshrl.u32 %v3632_v23, %v1936_v54  ;;  %v1937_v44 = vshrl.u32 %v3629_v17, %v1936_v54 }
 0x1a5   : > { %v1798_v55 = vsel %vm1715_vm5, %v1797_v59, %v1796_v1  ;;  %v1883_v40 = vsub.s32 0, %v5126_v50  ;;  %v1948_v19 = vshrl.u32 %v3633_v25, %v1936_v54  ;;  %v1951_v23 = vshrl.u32 %v3634_v38, %v1936_v54 }
 0x1a6   : > { %v1801_v35 = vsel %vm5092_vm7, %v4831_v6, %v1798_v55  ;;  %v1940_v34 = vor.u32 %v1939_v61, %v1938_v62  ;;  %v1943_v48 = vor.u32 %v1942_v52, %v1941_v53  ;;  %v1946_v36 = vor.u32 %v1945_v33, %v1944_v41 }
 0x1a7   : > { %3482 = vcosq.f32 %v1801_v35  ;;  %v3003_v21 = vmin.u32 %v1883_v40, %v5126_v50  ;;  %v1949_v8 = vor.u32 %v1948_v19, %v1947_v60  ;;  %v1873_v18 = vadd.s32 %v5076_v14, %v5084_v45 }
 0x1a8   : > { %3484 = vsinq.f32 %v1801_v35  ;;  %v1969_v17 = vshll.u32 %v1929_v11, 8  ;;  %v1952_v15 = vor.u32 %v1951_v23, %v1950_v7  ;;  %vm1953_vm10 = vcmp.lt.s32.totalorder %v1934_v63, 1 }
 0x1a9   : > { %v1885_v0 = vclz %v3003_v21  ;;  %vm1954_vm11 = vcmp.lt.s32.totalorder %v1934_v63, 2  ;;  %vm1955_vm15 = vcmp.lt.s32.totalorder %v1934_v63, 3  ;;  %vm1956_vm2 = vcmp.lt.s32.totalorder %v1934_v63, 4 }
 0x1aa   : > { %v1957_v32 = vsel %vm1953_vm10, %v1937_v44, %v1940_v34  ;;  %v1961_v13 = vsel %vm1953_vm10, %v1940_v34, %v1943_v48  ;;  %v1958_v28 = vsel %vm1956_vm2, %v1946_v36, 2102212464  ;;  %v1962_v26 = vsel %vm1956_vm2, %v1949_v8, 920167782 }
 0x1ab   : > { %v3004_v47 = vadd.s32 4294967294, %v1885_v0  ;;  %v1965_v5 = vsel %vm1953_vm10, %v1943_v48, %v1946_v36  ;;  %v1966_v25 = vsel %vm1956_vm2, %v1952_v15, 1326507024  ;;  %v1959_v38 = vsel %vm1955_vm15, %v1943_v48, %v1958_v28 }
 0x1ac   : > { %v1963_v58 = vsel %vm1955_vm15, %v1946_v36, %v1962_v26  ;;  %v1967_v20 = vsel %vm1955_vm15, %v1949_v8, %v1966_v25  ;;  %v1960_v39 = vsel %vm1954_vm11, %v1957_v32, %v1959_v38  ;;  %vm1812_vm3 = vcmp.eq.s32.totalorder %v1807_v43, 2 }
 0x1ad   : > { %vm3005_vm0 = vcmp.lt.s32.totalorder %v3004_v47, 0  ;;  %v1964_v14 = vsel %vm1954_vm11, %v1961_v13, %v1963_v58  ;;  %v1968_v45 = vsel %vm1954_vm11, %v1965_v5, %v1967_v20  ;;  %vm1808_vm4 = vcmp.lt.s32.totalorder %v1807_v43, 2 }
 0x1ae   : > { %v1888_v56 = vsel %vm3005_vm0, 0, %v3004_v47  ;;  %v5151_v1 = vmul.u32.u64.low %v1969_v17, %v1968_v45  ;;  %v5152_v12 = vmul.u32.u64.high %v1969_v17, %v1968_v45, %v5151_v1  ;;  %vm1809_vm5 = vcmp.eq.s32.totalorder %v1807_v43, 0 }
 0x1af   : > { %v1889_v4 = vsub.s32 32, %v1888_v56  ;;  %v1890_v49 = vshll.u32 %v5126_v50, %v1888_v56  ;;  %v1893_v37 = vsub.s32 4294967266, %v1888_v56  ;;  %v1976_v60 = vmul.u32 %v1969_v17, %v1960_v39 }
 0x1b0   : > { %v5154_v57 = vmul.u32.u64.low %v1969_v17, %v1964_v14  ;;  %v5155_v54 = vmul.u32.u64.high %v1969_v17, %v1964_v14, %v5154_v57  ;;  %vm1805_vm6 = vweird.f32 %v4831_v6  ;;  %v1903_v48 = vsub.s32 4, %v5114_v51 }
 0x1b1   : > { %v3483_v62 = vpop.eup %3482  ;;  %v1891_v59 = vshrl.u32 %v1873_v18, %v1889_v4  ;;  %v1894_v53 = vadd.s32 127, %v1893_v37  ;;  %vm1819_vm9 = vcmp.lt.s32.totalorder %v4941_v46, 0  ;;  %vm1818_vm8 = vcmp.le.f32.partialorder %v1817_v2, 0.7853982 }
 0x1b2   : > { %v3485_v41 = vpop.eup %3484  ;;  %v1813_v11 = vxor.u32 2147483648, %v3483_v62  ;;  %vm1978_vm7 = vc.u32 %v5152_v12, %v5154_v57  ;;  %v1979_v40 = vadd.s32 1, %v5155_v54  ;;  %v1904_v43 = vsel %vm1819_vm9, %v1903_v48, %v5114_v51 }
 0x1b3   : > { %v1810_v61 = vxor.u32 2147483648, %v3485_v41  ;;  %v1892_v52 = vor.u32 %v1891_v59, %v1890_v49  ;;  %v1895_v50 = vshll.u32 %v1894_v53, 23  ;;  %v1906_v47 = vsel %vm1818_vm8, 0, %v1904_v43 }
 0x1b4   : > { %v1814_v55 = vsel %vm1812_vm3, %v1813_v11, %v3485_v41  ;;  %v1980_v34 = vsel %vm1978_vm7, %v1979_v40, %v5155_v54  ;;  %v1910_v28 = vadd.s32 3, %v1906_v47  ;;  %v1977_v58 = vadd.s32 %v5154_v57, %v5152_v12 }
 0x1b5   : > { %v1811_v63 = vsel %vm1809_vm5, %v3483_v62, %v1810_v61  ;;  %v1896_v33 = vor.u32 4788187, %v1895_v50  ;;  %v1899_v35 = vcvt.s32.f32 %v1892_v52  ;;  %v1981_v36 = vadd.s32 %v1980_v34, %v1976_v60 }
 0x1b6   : > { %v1815_v44 = vsel %vm1808_vm4, %v1811_v63, %v1814_v55  ;;  %v1911_v2 = vand.u32 3, %v1910_v28  ;;  %vm1909_vm15 = vweird.f32 %v4941_v46  ;;  %vm1923_vm2 = vcmp.lt.s32.totalorder %v5071_v24, 0 }
 0x1b7   : > { %v1816_v19 = vsel %vm1805_vm6, nan, %v1815_v44  ;;  %v1897_v21 = vand.u32 2147483647, %v1896_v33  ;;  %v1982_v7 = vadd.s32 536870912, %v1981_v36  ;;  %vm1922_vm0 = vcmp.le.f32.partialorder %v1921_v29, 0.7853982 }
 0x1b8   : > { %v2038_v6 = vsel %vm299_vm1, %v1816_v19, %v4807_v42  ;;  %vm1916_vm12 = vcmp.eq.s32.totalorder %v1911_v2, 2  ;;  %vm1912_vm10 = vcmp.lt.s32.totalorder %v1911_v2, 2  ;;  %vm1913_vm11 = vcmp.eq.s32.totalorder %v1911_v2, 0  ;;  %v5189_v44 = vld [vmem:[%s5429_s2] ss:$0 sm:$0xff] }
 0x1b9   : > { %3174 = vmatmul.mubr.msk.f32.gmra.mrb[4].mxu1 %vm2056_vm13, %v2038_v6  ;;  %v1900_v8 = vmul.f32 %v1899_v35, %v1897_v21  ;;  %v1983_v18 = vshrl.u32 %v1982_v7, 30  ;;  %v2172_v21 = vadd.f32 %v5189_v44, %v4926_v27  ;;  %vm2013_vm6 = vweird.f32 %v5071_v24 }
 0x1bb   : > { %v1901_v23 = vxor.u32 2147483648, %v1900_v8  ;;  %v1984_v17 = vshll.u32 %v1983_v18, 30  ;;  %v2007_v50 = vsub.s32 4, %v1983_v18  ;;  %v2250_v7 = vmax.f32 %v2172_v21, 0.0 }
 0x1bd   : > { %v1902_v0 = vsel %vm1819_vm9, %v1901_v23, %v1900_v8  ;;  %v1985_v42 = vsub.s32 %v1981_v36, %v1984_v17  ;;  %v2008_v55 = vsel %vm1923_vm2, %v2007_v50, %v1983_v18  ;;  %v2182_v23 = vadd.f32 %v5189_v44, %v5059_v30 }
 0x1be   : > { %v1905_v15 = vsel %vm1818_vm8, %v4941_v46, %v1902_v0  ;;  %v2010_v33 = vsel %vm1922_vm0, 0, %v2008_v55  ;;  %v2177_v18 = vadd.f32 %v4921_v3, %v5189_v44  ;;  %v2187_v30 = vadd.f32 %v5054_v22, %v5189_v44 }
 0x1bf   : > { %3486 = vcosq.f32 %v1905_v15  ;;  %v1987_v26 = vsub.s32 0, %v1985_v42  ;;  %v2252_v27 = vmax.f32 %v2182_v23, 0.0 }
 0x1c0   : > { %v5172_v32 = vpop.f32.mrb[4].mxu0  ;;  %3488 = vsinq.f32 %v1905_v15  ;;  %v2251_v17 = vmax.f32 %v2177_v18, 0.0  ;;  %v2253_v3 = vmax.f32 %v2187_v30, 0.0 }
 0x1c1   : > { %v5174_v13 = vpop.f32.mrb[5].mxu0  ;;  %v3007_v5 = vmin.u32 %v1987_v26, %v1985_v42  ;;  %v2197_v10 = vadd.f32 %v5172_v32, %v5189_v44 }
 0x1c3   : > { %v1989_v25 = vclz %v3007_v5  ;;  %v2255_v47 = vmax.f32 %v2197_v10, 0.0 }
 0x1c5   : > { %v3008_v38 = vadd.s32 4294967294, %v1989_v25 }
 0x1c7   : > { %vm3009_vm14 = vcmp.lt.s32.totalorder %v3008_v38, 0 }
 0x1c8   : > { %v1992_v14 = vsel %vm3009_vm14, 0, %v3008_v38 }
 0x1c9   : > { %v3487_v51 = vpop.eup %3486  ;;  %v1993_v4 = vsub.s32 32, %v1992_v14  ;;  %v1994_v49 = vshll.u32 %v1985_v42, %v1992_v14  ;;  %v1997_v37 = vsub.s32 4294967266, %v1992_v14 }
 0x1ca   : > { %v3489_v20 = vpop.eup %3488  ;;  %v1917_v56 = vxor.u32 2147483648, %v3487_v51 }
 0x1cb   : > { %v1914_v45 = vxor.u32 2147483648, %v3489_v20  ;;  %v1995_v54 = vshrl.u32 %v1977_v58, %v1993_v4  ;;  %v1998_v62 = vadd.s32 127, %v1997_v37  ;;  %v2490_v58 = vld [vmem:[%s5432_s5] sm:$0xff]  ;;  %v2495_v37 = vld [vmem:[%s5432_s5 + $0x28] sm:$0xff] }
 0x1cc   : > { %v1918_v39 = vsel %vm1916_vm12, %v1917_v56, %v3489_v20  ;;  %v2491_v20 = vld [vmem:[%s5432_s5 + $0x8] sm:$0xff]  ;;  %v2492_v56 = vld [vmem:[%s5432_s5 + $0x10] sm:$0xff] }
 0x1cd   : > { %v1915_v1 = vsel %vm1913_vm11, %v3487_v51, %v1914_v45  ;;  %v1996_v41 = vor.u32 %v1995_v54, %v1994_v49  ;;  %v1999_v12 = vshll.u32 %v1998_v62, 23  ;;  %v3291_v14 = vpack.c.bf16 %v2491_v20, %v2490_v58  ;;  %v2493_v45 = vld [vmem:[%s5432_s5 + $0x18] sm:$0xff]  ;;  %v2494_v49 = vld [vmem:[%s5432_s5 + $0x20] sm:$0xff] }
 0x1ce   : > { %v1919_v59 = vsel %vm1912_vm10, %v1915_v1, %v1918_v39  ;;  %v3295_v4 = vpack.c.bf16 %v2493_v45, %v2492_v56  ;;  %v3299_v39 = vpack.c.bf16 %v2495_v37, %v2494_v49  ;;  %v2496_v1 = vld [vmem:[%s5432_s5 + $0x30] sm:$0xff]  ;;  %v2497_v54 = vld [vmem:[%s5432_s5 + $0x38] sm:$0xff] }
 0x1cf   : > { %v1920_v53 = vsel %vm1909_vm15, nan, %v1919_v59  ;;  %v2000_v11 = vor.u32 4788187, %v1999_v12  ;;  %v2003_v61 = vcvt.s32.f32 %v1996_v41  ;;  %3292 = vmatprep.subr.bf16.mxu0 %v3291_v14  ;;  %v3303_v62 = vpack.c.bf16 %v2497_v54, %v2496_v1 }
 0x1d0   : > { %v2039_v57 = vsel %vm299_vm1, %v1920_v53, %v4883_v16  ;;  %v2014_v16 = vadd.s32 3, %v2010_v33  ;;  %3294 = vmatpush3.bf16.msra.mxu0 %v3291_v14 }
 0x1d1   : > { %3176 = vmatprep.mubr.msk.f32.mxu1 %vm2056_vm13, %v2039_v57  ;;  %v2001_v52 = vand.u32 2147483647, %v2000_v11  ;;  %3296 = vmatprep.subr.bf16.mxu0 %v3295_v4 }
 0x1d2   : > { %v2015_v35 = vand.u32 3, %v2014_v16 }
 0x1d3   : > { %v2004_v60 = vmul.f32 %v2003_v61, %v2001_v52 }
 0x1d4   : > { %vm2020_vm3 = vcmp.eq.s32.totalorder %v2015_v35, 2  ;;  %vm2017_vm4 = vcmp.eq.s32.totalorder %v2015_v35, 0  ;;  %vm2016_vm5 = vcmp.lt.s32.totalorder %v2015_v35, 2  ;;  %3298 = vmatpush3.bf16.msra.mxu0 %v3295_v4  ;;  %v5259_v35 = vld [vmem:[%s5431_s4] ss:$0 sm:$0xff] }
 0x1d5   : > { %v2005_v46 = vxor.u32 2147483648, %v2004_v60  ;;  %3300 = vmatprep.subr.bf16.mxu0 %v3299_v39 }
 0x1d7   : > { %v2006_v40 = vsel %vm1923_vm2, %v2005_v46, %v2004_v60 }
 0x1d8   : > { %v2009_v63 = vsel %vm1922_vm0, %v5071_v24, %v2006_v40  ;;  %v2192_v24 = vadd.f32 %v5189_v44, %v5174_v13  ;;  %3302 = vmatpush3.bf16.msra.mxu0 %v3299_v39 }
 0x1d9   : > { %3490 = vcosq.f32 %v2009_v63  ;;  %3304 = vmatprep.subr.bf16.mxu0 %v3303_v62 }
 0x1da   : > { %3492 = vsinq.f32 %v2009_v63  ;;  %v2254_v15 = vmax.f32 %v2192_v24, 0.0 }
 0x1dc   : > { %3306 = vmatpush3.bf16.msra.mxu0 %v3303_v62 }
 0x1e3   : > { %v3491_v34 = vpop.eup %3490 }
 0x1e4   : > { %v3493_v19 = vpop.eup %3492  ;;  %v2021_v29 = vxor.u32 2147483648, %v3491_v34 }
 0x1e5   : > { %v2018_v48 = vxor.u32 2147483648, %v3493_v19 }
 0x1e6   : > { %v2022_v36 = vsel %vm2020_vm3, %v2021_v29, %v3493_v19 }
 0x1e7   : > { %v2019_v6 = vsel %vm2017_vm4, %v3491_v34, %v2018_v48 }
 0x1e8   : > { %v2023_v8 = vsel %vm2016_vm5, %v2019_v6, %v2022_v36 }
 0x1e9   : > { %v2024_v43 = vsel %vm2013_vm6, nan, %v2023_v8 }
 0x1ea   : > { %v2040_v0 = vsel %vm299_vm1, %v2024_v43, %v5027_v31  ;;  %vm2794_vm1 = vcmp.ge.s32.totalorder %v3744_v9, 7 }
 0x1eb   : > { %3177 = vmatmul.mubr.msk.f32.gmra.mrb[6].mxu1 %vm2056_vm13, %v2040_v0 }
 0x1ec   : > { %3195 = vmatprep.mubr.msk.f32.mxu1 %vm2056_vm13, %v2250_v7 }
 0x1ef   : > { %3196 = vmatmul.mubr.msk.f32.vlgmr.msra.gmra.mrb[8].mxu1 %vm2056_vm13, %v2251_v17 }
 0x1f0   : > { %3198 = vmatprep.mubr.msk.f32.mxu1 %vm2056_vm13, %v2252_v27 }
 0x1f3   : > { %3199 = vmatmul.mubr.msk.f32.gmra.mrb[10].mxu1 %vm2056_vm13, %v2253_v3 }
 0x1f4   : > { %3201 = vmatprep.mubr.msk.f32.mxu1 %vm2056_vm13, %v2254_v15 }
 0x1f6   : > { %v3166_v31 = vpop.f32.mrb[6].mxu0 }
 0x1f7   : > { %v2207_v42 = vadd.f32 %v3166_v31, %v5189_v44  ;;  %v2201_v13 = vpop.f32.mrb[7].mxu0  ;;  %3202 = vmatmul.mubr.msk.f32.gmra.mrb[12].mxu1 %vm2056_vm13, %v2255_v47 }
 0x1f8   : > { %v2202_v22 = vadd.f32 %v5189_v44, %v2201_v13 }
 0x1f9   : > { %v2257_v26 = vmax.f32 %v2207_v42, 0.0 }
 0x1fa   : > { %v2256_v28 = vmax.f32 %v2202_v22, 0.0 }
 0x1fc   : > { %3204 = vmatprep.mubr.msk.f32.mxu1 %vm2056_vm13, %v2256_v28 }
 0x1fd   : > { %3205 = vmatmul.mubr.msk.f32.gmra.mrb[14].mxu1 %vm2056_vm13, %v2257_v26 }
 0x227   : > { %v3169_v32 = vpop.f32.mrb[0].mxu1 }
 0x228   : > { %v2217_v5 = vadd.f32 %v3169_v32, %v5189_v44  ;;  %v2211_v2 = vpop.f32.mrb[1].mxu1 }
 0x229   : > { %v2212_v25 = vadd.f32 %v5189_v44, %v2211_v2 }
 0x22a   : > { %v2259_v51 = vmax.f32 %v2217_v5, 0.0 }
 0x22b   : > { %v2258_v38 = vmax.f32 %v2212_v25, 0.0 }
 0x22d   : > { %3207 = vmatprep.mubr.msk.f32.mxu1 %vm2056_vm13, %v2258_v38 }
 0x22e   : > { %3208 = vmatmul.mubr.msk.f32.gmra.mrb[16].mxu1 %vm2056_vm13, %v2259_v51 }
 0x259   : > { %v3172_v59 = vpop.f32.mrb[2].mxu1 }
 0x25a   : > { %v2227_v53 = vadd.f32 %v3172_v59, %v5189_v44  ;;  %v2221_v41 = vpop.f32.mrb[3].mxu1 }
 0x25b   : > { %v2222_v12 = vadd.f32 %v5189_v44, %v2221_v41  ;;  %v5296_v41 = vld [vmem:[%s5433_s6] ss:$0 sm:$0xff] }
 0x25c   : > { %v2261_v11 = vmax.f32 %v2227_v53, 0.0 }
 0x25d   : > { %v2260_v57 = vmax.f32 %v2222_v12, 0.0 }
 0x25f   : > { %3210 = vmatprep.mubr.msk.f32.mxu1 %vm2056_vm13, %v2260_v57 }
 0x260   : > { %3211 = vmatmul.mubr.msk.f32.gmra.mrb[18].mxu1 %vm2056_vm13, %v2261_v11 }
 0x28c   : > { %v3175_v61 = vpop.f32.mrb[4].mxu1 }
 0x28d   : > { %v2237_v52 = vadd.f32 %v3175_v61, %v5189_v44  ;;  %v2231_v50 = vpop.f32.mrb[5].mxu1 }
 0x28e   : > { %v2232_v60 = vadd.f32 %v5189_v44, %v2231_v50 }
 0x28f   : > { %v2263_v55 = vmax.f32 %v2237_v52, 0.0 }
 0x290   : > { %v2262_v46 = vmax.f32 %v2232_v60, 0.0 }
 0x292   : > { %3213 = vmatprep.mubr.msk.f32.mxu1 %vm2056_vm13, %v2262_v46 }
 0x293   : > { %3214 = vmatmul.mubr.msk.f32.gmra.mrb[20].mxu1 %vm2056_vm13, %v2263_v55 }
 0x2be   : > { %v3178_v40 = vpop.f32.mrb[6].mxu1 }
 0x2bf   : > { %v2247_v63 = vadd.f32 %v3178_v40, %v5189_v44  ;;  %v2241_v33 = vpop.f32.mrb[7].mxu1 }
 0x2c0   : > { %v2242_v16 = vadd.f32 %v5189_v44, %v2241_v33 }
 0x2c1   : > { %v2265_v29 = vmax.f32 %v2247_v63, 0.0 }
 0x2c2   : > { %v2264_v34 = vmax.f32 %v2242_v16, 0.0  ;;  %v3197_v19 = vpop.f32.mrb[8].mxu1 }
 0x2c3   : > { %v2401_v21 = vadd.f32 %v3197_v19, %v5259_v35  ;;  %v2395_v48 = vpop.f32.mrb[9].mxu1 }
 0x2c4   : > { %3216 = vmatprep.mubr.msk.f32.mxu1 %vm2056_vm13, %v2264_v34  ;;  %v2396_v36 = vadd.f32 %v5259_v35, %v2395_v48 }
 0x2c5   : > { %3217 = vmatmul.mubr.msk.f32.gmra.mrb[22].mxu1 %vm2056_vm13, %v2265_v29  ;;  %v2475_v44 = vmax.f32 %v2401_v21, 0.0 }
 0x2c6   : > { %v2474_v6 = vmax.f32 %v2396_v36, 0.0  ;;  %v3200_v8 = vpop.f32.mrb[10].mxu1 }
 0x2c7   : > { %v2411_v7 = vadd.f32 %v3200_v8, %v5259_v35  ;;  %v2405_v23 = vpop.f32.mrb[11].mxu1 }
 0x2c8   : > { %v2406_v43 = vadd.f32 %v5259_v35, %v2405_v23  ;;  %3235 = vmatprep.mubr.msk.f32.mxu0 %vm2056_vm13, %v2474_v6 }
 0x2c9   : > { %3236 = vmatmul.mubr.msk.f32.vlgmr.msra.gmra.mrb[8].mxu0 %vm2056_vm13, %v2475_v44  ;;  %v2477_v27 = vmax.f32 %v2411_v7, 0.0 }
 0x2ca   : > { %v2476_v18 = vmax.f32 %v2406_v43, 0.0  ;;  %v3203_v0 = vpop.f32.mrb[12].mxu1 }
 0x2cb   : > { %v2421_v24 = vadd.f32 %v3203_v0, %v5259_v35  ;;  %v2415_v17 = vpop.f32.mrb[13].mxu1 }
 0x2cc   : > { %v2416_v30 = vadd.f32 %v5259_v35, %v2415_v17  ;;  %3238 = vmatprep.mubr.msk.f32.mxu0 %vm2056_vm13, %v2476_v18 }
 0x2cd   : > { %3239 = vmatmul.mubr.msk.f32.gmra.mrb[10].mxu0 %vm2056_vm13, %v2477_v27  ;;  %v2479_v10 = vmax.f32 %v2421_v24, 0.0 }
 0x2ce   : > { %v2478_v15 = vmax.f32 %v2416_v30, 0.0 }
 0x2d0   : > { %v3206_v3 = vpop.f32.mrb[14].mxu1  ;;  %3241 = vmatprep.mubr.msk.f32.mxu0 %vm2056_vm13, %v2478_v15 }
 0x2d1   : > { %v2431_v31 = vadd.f32 %v3206_v3, %v5259_v35  ;;  %v2425_v47 = vpop.f32.mrb[15].mxu1  ;;  %3242 = vmatmul.mubr.msk.f32.gmra.mrb[12].mxu0 %vm2056_vm13, %v2479_v10 }
 0x2d2   : > { %v2426_v42 = vadd.f32 %v5259_v35, %v2425_v47 }
 0x2d3   : > { %v2481_v22 = vmax.f32 %v2431_v31, 0.0 }
 0x2d4   : > { %v2480_v13 = vmax.f32 %v2426_v42, 0.0 }
 0x2d6   : > { %3244 = vmatprep.mubr.msk.f32.mxu0 %vm2056_vm13, %v2480_v13 }
 0x2d7   : > { %3245 = vmatmul.mubr.msk.f32.gmra.mrb[14].mxu0 %vm2056_vm13, %v2481_v22 }
 0x301   : > { %v3209_v28 = vpop.f32.mrb[16].mxu1 }
 0x302   : > { %v2441_v26 = vadd.f32 %v3209_v28, %v5259_v35  ;;  %v2435_v32 = vpop.f32.mrb[17].mxu1 }
 0x303   : > { %v2436_v5 = vadd.f32 %v5259_v35, %v2435_v32 }
 0x304   : > { %v2483_v25 = vmax.f32 %v2441_v26, 0.0 }
 0x305   : > { %v2482_v2 = vmax.f32 %v2436_v5, 0.0 }
 0x307   : > { %3247 = vmatprep.mubr.msk.f32.mxu0 %vm2056_vm13, %v2482_v2 }
 0x308   : > { %3248 = vmatmul.mubr.msk.f32.gmra.mrb[16].mxu0 %vm2056_vm13, %v2483_v25 }
 0x333   : > { %v3212_v38 = vpop.f32.mrb[18].mxu1 }
 0x334   : > { %v2451_v51 = vadd.f32 %v3212_v38, %v5259_v35  ;;  %v2445_v58 = vpop.f32.mrb[19].mxu1 }
 0x335   : > { %v2446_v20 = vadd.f32 %v5259_v35, %v2445_v58 }
 0x336   : > { %v2485_v14 = vmax.f32 %v2451_v51, 0.0 }
 0x337   : > { %v2484_v56 = vmax.f32 %v2446_v20, 0.0 }
 0x339   : > { %3250 = vmatprep.mubr.msk.f32.mxu0 %vm2056_vm13, %v2484_v56 }
 0x33a   : > { %3251 = vmatmul.mubr.msk.f32.gmra.mrb[18].mxu0 %vm2056_vm13, %v2485_v14 }
 0x366   : > { %v3215_v45 = vpop.f32.mrb[20].mxu1 }
 0x367   : > { %v2461_v4 = vadd.f32 %v3215_v45, %v5259_v35  ;;  %v2455_v49 = vpop.f32.mrb[21].mxu1 }
 0x368   : > { %v2456_v37 = vadd.f32 %v5259_v35, %v2455_v49 }
 0x369   : > { %v2487_v1 = vmax.f32 %v2461_v4, 0.0 }
 0x36a   : > { %v2486_v39 = vmax.f32 %v2456_v37, 0.0 }
 0x36c   : > { %3253 = vmatprep.mubr.msk.f32.mxu0 %vm2056_vm13, %v2486_v39 }
 0x36d   : > { %3254 = vmatmul.mubr.msk.f32.gmra.mrb[20].mxu0 %vm2056_vm13, %v2487_v1 }
 0x398   : > { %v3218_v54 = vpop.f32.mrb[22].mxu1 }
 0x399   : > { %v2471_v62 = vadd.f32 %v3218_v54, %v5259_v35  ;;  %v2465_v59 = vpop.f32.mrb[23].mxu1 }
 0x39a   : > { %v2466_v53 = vadd.f32 %v5259_v35, %v2465_v59 }
 0x39b   : > { %v2489_v11 = vmax.f32 %v2471_v62, 0.0 }
 0x39c   : > { %v2488_v12 = vmax.f32 %v2466_v53, 0.0  ;;  %v3237_v57 = vpop.f32.mrb[8].mxu0 }
 0x39d   : > { %v2625_v61 = vadd.f32 %v3237_v57, %v5296_v41  ;;  %v2619_v52 = vpop.f32.mrb[9].mxu0 }
 0x39e   : > { %3256 = vmatprep.mubr.msk.f32.mxu0 %vm2056_vm13, %v2488_v12  ;;  %v2620_v50 = vadd.f32 %v5296_v41, %v2619_v52 }
 0x39f   : > { %3257 = vmatmul.mubr.msk.f32.gmra.mrb[22].mxu0 %vm2056_vm13, %v2489_v11  ;;  %v2699_v60 = vsub.f32 0.0, %v2625_v61  ;;  %vm2795_vm13 = vcmp.le.s32.totalorder %v3744_v9, 9 }
 0x3a0   : > { %v2698_v46 = vsub.f32 0.0, %v2620_v50  ;;  %v3240_v55 = vpop.f32.mrb[10].mxu0  ;;  %vm5313_vm7 = vmand %vm2794_vm1, %vm2795_vm13 }
 0x3a1   : > { %v2716_v40 = vmul.f32 1.442695, %v2699_v60  ;;  %v2635_v63 = vadd.f32 %v3240_v55, %v5296_v41  ;;  %v2629_v33 = vpop.f32.mrb[11].mxu0 }
 0x3a2   : > { %v2714_v16 = vmul.f32 1.442695, %v2698_v46  ;;  %v2630_v35 = vadd.f32 %v5296_v41, %v2629_v33 }
 0x3a3   : > { %3494 = vpow2.f32 %v2716_v40  ;;  %v2701_v34 = vsub.f32 0.0, %v2635_v63 }
 0x3a4   : > { %3496 = vpow2.f32 %v2714_v16  ;;  %v2700_v19 = vsub.f32 0.0, %v2630_v35  ;;  %v3243_v29 = vpop.f32.mrb[12].mxu0 }
 0x3a5   : > { %v2720_v21 = vmul.f32 1.442695, %v2701_v34  ;;  %v2645_v48 = vadd.f32 %v3243_v29, %v5296_v41  ;;  %v2639_v36 = vpop.f32.mrb[13].mxu0 }
 0x3a6   : > { %v2718_v6 = vmul.f32 1.442695, %v2700_v19  ;;  %v2640_v8 = vadd.f32 %v5296_v41, %v2639_v36 }
 0x3a7   : > { %3498 = vpow2.f32 %v2720_v21  ;;  %v2703_v44 = vsub.f32 0.0, %v2645_v48 }
 0x3a8   : > { %3500 = vpow2.f32 %v2718_v6  ;;  %v2702_v7 = vsub.f32 0.0, %v2640_v8 }
 0x3a9   : > { %v2724_v43 = vmul.f32 1.442695, %v2703_v44 }
 0x3aa   : > { %v3246_v23 = vpop.f32.mrb[14].mxu0  ;;  %v2722_v27 = vmul.f32 1.442695, %v2702_v7 }
 0x3ab   : > { %v2655_v18 = vadd.f32 %v3246_v23, %v5296_v41  ;;  %v2649_v0 = vpop.f32.mrb[15].mxu0  ;;  %3502 = vpow2.f32 %v2724_v43 }
 0x3ac   : > { %v2650_v24 = vadd.f32 %v5296_v41, %v2649_v0  ;;  %3504 = vpow2.f32 %v2722_v27 }
 0x3ad   : > { %v2705_v17 = vsub.f32 0.0, %v2655_v18  ;;  %v3495_v15 = vpop.eup %3494 }
 0x3ae   : > { %v2704_v30 = vsub.f32 0.0, %v2650_v24  ;;  %v3497_v10 = vpop.eup %3496  ;;  %v2747_v31 = vadd.f32 1.0, %v3495_v15 }
 0x3af   : > { %v2728_v3 = vmul.f32 1.442695, %v2705_v17  ;;  %v2746_v42 = vadd.f32 1.0, %v3497_v10 }
 0x3b0   : > { %v2726_v47 = vmul.f32 1.442695, %v2704_v30 }
 0x3b1   : > { %3506 = vpow2.f32 %v2728_v3  ;;  %v3499_v13 = vpop.eup %3498 }
 0x3b2   : > { %3508 = vrcp.f32 %v2747_v31  ;;  %v3501_v22 = vpop.eup %3500  ;;  %v2749_v28 = vadd.f32 1.0, %v3499_v13 }
 0x3b3   : > { %3510 = vrcp.f32 %v2746_v42  ;;  %v2748_v26 = vadd.f32 1.0, %v3501_v22 }
 0x3b4   : > { %3512 = vpow2.f32 %v2726_v47 }
 0x3b5   : > { %3514 = vrcp.f32 %v2749_v28  ;;  %v3503_v32 = vpop.eup %3502 }
 0x3b6   : > { %3516 = vrcp.f32 %v2748_v26  ;;  %v3505_v5 = vpop.eup %3504  ;;  %v2751_v2 = vadd.f32 1.0, %v3503_v32 }
 0x3b7   : > { %v2750_v25 = vadd.f32 1.0, %v3505_v5 }
 0x3b8   : > { %3518 = vrcp.f32 %v2751_v2 }
 0x3b9   : > { %3520 = vrcp.f32 %v2750_v25 }
 0x3bb   : > { %v3507_v38 = vpop.eup %3506 }
 0x3bc   : > { %v3509_v51 = vpop.eup %3508  ;;  %v2753_v58 = vadd.f32 1.0, %v3507_v38 }
 0x3bd   : > { %v3511_v20 = vpop.eup %3510  ;;  %v2798_v56 = vmul.f32 0.999, %v3509_v51 }
 0x3be   : > { %v3513_v14 = vpop.eup %3512  ;;  %v2797_v4 = vmul.f32 0.999, %v3511_v20  ;;  %3522 = vrcp.f32 %v2753_v58 }
 0x3bf   : > { %v2814_v49 = vadd.f32 0.001, %v2798_v56  ;;  %v2752_v37 = vadd.f32 1.0, %v3513_v14  ;;  %v3515_v39 = vpop.eup %3514 }
 0x3c0   : > { %v2813_v1 = vadd.f32 0.001, %v2797_v4  ;;  %v3517_v54 = vpop.eup %3516  ;;  %v2800_v62 = vmul.f32 0.999, %v3515_v39 }
 0x3c1   : > { %v2830_v9 = vsel %vm5313_vm7, %v2814_v49, %v3509_v51  ;;  %3524 = vrcp.f32 %v2752_v37  ;;  %v2799_v53 = vmul.f32 0.999, %v3517_v54 }
 0x3c2   : > { %2846 = vst [vmem:[%s5319_s18 + $0x8] sm:$0xff] %v2830_v9  ;;  %v2829_v59 = vsel %vm5313_vm7, %v2813_v1, %v3511_v20  ;;  %v2816_v12 = vadd.f32 0.001, %v2800_v62  ;;  %v3519_v57 = vpop.eup %3518 }
 0x3c3   : > { %2845 = vst [vmem:[%s5319_s18] sm:$0xff] %v2829_v59  ;;  %v2815_v11 = vadd.f32 0.001, %v2799_v53  ;;  %v3521_v61 = vpop.eup %3520  ;;  %v2802_v50 = vmul.f32 0.999, %v3519_v57 }
 0x3c4   : > { %v2832_v52 = vsel %vm5313_vm7, %v2816_v12, %v3515_v39  ;;  %v2801_v46 = vmul.f32 0.999, %v3521_v61 }
 0x3c5   : > { %2848 = vst [vmem:[%s5319_s18 + $0x18] sm:$0xff] %v2832_v52  ;;  %v2831_v60 = vsel %vm5313_vm7, %v2815_v11, %v3517_v54  ;;  %v2818_v55 = vadd.f32 0.001, %v2802_v50 }
 0x3c6   : > { %2847 = vst [vmem:[%s5319_s18 + $0x10] sm:$0xff] %v2831_v60  ;;  %v2817_v63 = vadd.f32 0.001, %v2801_v46 }
 0x3c7   : > { %v2834_v33 = vsel %vm5313_vm7, %v2818_v55, %v3519_v57 }
 0x3c8   : > { %v3523_v40 = vpop.eup %3522  ;;  %2850 = vst [vmem:[%s5319_s18 + $0x28] sm:$0xff] %v2834_v33  ;;  %v2833_v35 = vsel %vm5313_vm7, %v2817_v63, %v3521_v61 }
 0x3c9   : > { %v2804_v16 = vmul.f32 0.999, %v3523_v40  ;;  %2849 = vst [vmem:[%s5319_s18 + $0x20] sm:$0xff] %v2833_v35 }
 0x3cb   : > { %v3525_v34 = vpop.eup %3524  ;;  %v2820_v19 = vadd.f32 0.001, %v2804_v16 }
 0x3cc   : > { %v2803_v29 = vmul.f32 0.999, %v3525_v34 }
 0x3cd   : > { %v2836_v21 = vsel %vm5313_vm7, %v2820_v19, %v3523_v40 }
 0x3ce   : > { %2852 = vst [vmem:[%s5319_s18 + $0x38] sm:$0xff] %v2836_v21  ;;  %v2819_v48 = vadd.f32 0.001, %v2803_v29 }
 0x3d0   : > { %v2835_v36 = vsel %vm5313_vm7, %v2819_v48, %v3525_v34 }
 0x3d1   : > { %2851 = vst [vmem:[%s5319_s18 + $0x30] sm:$0xff] %v2835_v36 }
 0x3db   : > { %v3249_v6 = vpop.f32.mrb[16].mxu0 }
 0x3dc   : > { %v2665_v8 = vadd.f32 %v3249_v6, %v5296_v41  ;;  %v2659_v44 = vpop.f32.mrb[17].mxu0 }
 0x3dd   : > { %v2660_v7 = vadd.f32 %v5296_v41, %v2659_v44 }
 0x3de   : > { %v2707_v23 = vsub.f32 0.0, %v2665_v8 }
 0x3df   : > { %v2706_v43 = vsub.f32 0.0, %v2660_v7 }
 0x3e0   : > { %v2732_v18 = vmul.f32 1.442695, %v2707_v23 }
 0x3e1   : > { %v2730_v0 = vmul.f32 1.442695, %v2706_v43 }
 0x3e2   : > { %3526 = vpow2.f32 %v2732_v18 }
 0x3e3   : > { %3528 = vpow2.f32 %v2730_v0 }
 0x3ec   : > { %v3527_v27 = vpop.eup %3526 }
 0x3ed   : > { %v3529_v24 = vpop.eup %3528  ;;  %v2755_v17 = vadd.f32 1.0, %v3527_v27 }
 0x3ee   : > { %v2754_v30 = vadd.f32 1.0, %v3529_v24 }
 0x3ef   : > { %3530 = vrcp.f32 %v2755_v17 }
 0x3f0   : > { %3532 = vrcp.f32 %v2754_v30 }
 0x3f9   : > { %v3531_v15 = vpop.eup %3530 }
 0x3fa   : > { %v3533_v3 = vpop.eup %3532  ;;  %v2806_v10 = vmul.f32 0.999, %v3531_v15 }
 0x3fb   : > { %v2805_v31 = vmul.f32 0.999, %v3533_v3 }
 0x3fc   : > { %v2822_v47 = vadd.f32 0.001, %v2806_v10 }
 0x3fd   : > { %v2821_v42 = vadd.f32 0.001, %v2805_v31 }
 0x3fe   : > { %v2838_v13 = vsel %vm5313_vm7, %v2822_v47, %v3531_v15 }
 0x3ff   : > { %2854 = vst [vmem:[%s5319_s18 + $0x48] sm:$0xff] %v2838_v13  ;;  %v2837_v22 = vsel %vm5313_vm7, %v2821_v42, %v3533_v3 }
 0x400   : > { %2853 = vst [vmem:[%s5319_s18 + $0x40] sm:$0xff] %v2837_v22 }
 0x40d   : > { %v3252_v28 = vpop.f32.mrb[18].mxu0 }
 0x40e   : > { %v2675_v26 = vadd.f32 %v3252_v28, %v5296_v41  ;;  %v2669_v32 = vpop.f32.mrb[19].mxu0 }
 0x40f   : > { %v2670_v5 = vadd.f32 %v5296_v41, %v2669_v32 }
 0x410   : > { %v2709_v2 = vsub.f32 0.0, %v2675_v26 }
 0x411   : > { %v2708_v25 = vsub.f32 0.0, %v2670_v5 }
 0x412   : > { %v2736_v38 = vmul.f32 1.442695, %v2709_v2 }
 0x413   : > { %v2734_v51 = vmul.f32 1.442695, %v2708_v25 }
 0x414   : > { %3534 = vpow2.f32 %v2736_v38 }
 0x415   : > { %3536 = vpow2.f32 %v2734_v51 }
 0x41e   : > { %v3535_v58 = vpop.eup %3534 }
 0x41f   : > { %v3537_v20 = vpop.eup %3536  ;;  %v2757_v56 = vadd.f32 1.0, %v3535_v58 }
 0x420   : > { %v2756_v14 = vadd.f32 1.0, %v3537_v20 }
 0x421   : > { %3538 = vrcp.f32 %v2757_v56 }
 0x422   : > { %3540 = vrcp.f32 %v2756_v14 }
 0x42b   : > { %v3539_v4 = vpop.eup %3538 }
 0x42c   : > { %v3541_v49 = vpop.eup %3540  ;;  %v2808_v37 = vmul.f32 0.999, %v3539_v4 }
 0x42d   : > { %v2807_v39 = vmul.f32 0.999, %v3541_v49 }
 0x42e   : > { %v2824_v1 = vadd.f32 0.001, %v2808_v37 }
 0x42f   : > { %v2823_v54 = vadd.f32 0.001, %v2807_v39 }
 0x430   : > { %v2840_v9 = vsel %vm5313_vm7, %v2824_v1, %v3539_v4 }
 0x431   : > { %2856 = vst [vmem:[%s5319_s18 + $0x58] sm:$0xff] %v2840_v9  ;;  %v2839_v62 = vsel %vm5313_vm7, %v2823_v54, %v3541_v49 }
 0x432   : > { %2855 = vst [vmem:[%s5319_s18 + $0x50] sm:$0xff] %v2839_v62 }
 0x440   : > { %v3255_v59 = vpop.f32.mrb[20].mxu0 }
 0x441   : > { %v2685_v53 = vadd.f32 %v3255_v59, %v5296_v41  ;;  %v2679_v12 = vpop.f32.mrb[21].mxu0 }
 0x442   : > { %v2680_v57 = vadd.f32 %v5296_v41, %v2679_v12 }
 0x443   : > { %v2711_v11 = vsub.f32 0.0, %v2685_v53 }
 0x444   : > { %v2710_v61 = vsub.f32 0.0, %v2680_v57 }
 0x445   : > { %v2740_v52 = vmul.f32 1.442695, %v2711_v11 }
 0x446   : > { %v2738_v50 = vmul.f32 1.442695, %v2710_v61 }
 0x447   : > { %3542 = vpow2.f32 %v2740_v52 }
 0x448   : > { %3544 = vpow2.f32 %v2738_v50 }
 0x451   : > { %v3543_v60 = vpop.eup %3542 }
 0x452   : > { %v3545_v46 = vpop.eup %3544  ;;  %v2759_v55 = vadd.f32 1.0, %v3543_v60 }
 0x453   : > { %v2758_v40 = vadd.f32 1.0, %v3545_v46 }
 0x454   : > { %3546 = vrcp.f32 %v2759_v55 }
 0x455   : > { %3548 = vrcp.f32 %v2758_v40 }
 0x45e   : > { %v3547_v63 = vpop.eup %3546 }
 0x45f   : > { %v3549_v33 = vpop.eup %3548  ;;  %v2810_v16 = vmul.f32 0.999, %v3547_v63 }
 0x460   : > { %v2809_v35 = vmul.f32 0.999, %v3549_v33 }
 0x461   : > { %v2826_v34 = vadd.f32 0.001, %v2810_v16 }
 0x462   : > { %v2825_v19 = vadd.f32 0.001, %v2809_v35 }
 0x463   : > { %v2842_v29 = vsel %vm5313_vm7, %v2826_v34, %v3547_v63 }
 0x464   : > { %2858 = vst [vmem:[%s5319_s18 + $0x68] sm:$0xff] %v2842_v29  ;;  %v2841_v21 = vsel %vm5313_vm7, %v2825_v19, %v3549_v33 }
 0x465   : > { %2857 = vst [vmem:[%s5319_s18 + $0x60] sm:$0xff] %v2841_v21 }
 0x472   : > { %v3258_v48 = vpop.f32.mrb[22].mxu0 }
 0x473   : > { %v2695_v36 = vadd.f32 %v3258_v48, %v5296_v41  ;;  %v2689_v6 = vpop.f32.mrb[23].mxu0 }
 0x474   : > { %v2690_v8 = vadd.f32 %v5296_v41, %v2689_v6 }
 0x475   : > { %v2713_v44 = vsub.f32 0.0, %v2695_v36 }
 0x476   : > { %v2712_v7 = vsub.f32 0.0, %v2690_v8 }
 0x477   : > { %v2744_v23 = vmul.f32 1.442695, %v2713_v44 }
 0x478   : > { %v2742_v43 = vmul.f32 1.442695, %v2712_v7 }
 0x479   : > { %3550 = vpow2.f32 %v2744_v23 }
 0x47a   : > { %3552 = vpow2.f32 %v2742_v43 }
 0x483   : > { %v3551_v18 = vpop.eup %3550 }
 0x484   : > { %v3553_v0 = vpop.eup %3552  ;;  %v2761_v27 = vadd.f32 1.0, %v3551_v18 }
 0x485   : > { %v2760_v24 = vadd.f32 1.0, %v3553_v0 }
 0x486   : > { %3554 = vrcp.f32 %v2761_v27 }
 0x487   : > { %3556 = vrcp.f32 %v2760_v24 }
 0x490   : > { %v3555_v17 = vpop.eup %3554 }
 0x491   : > { %v3557_v30 = vpop.eup %3556  ;;  %v2812_v41 = vmul.f32 0.999, %v3555_v17 }
 0x492   : > { %v2811_v15 = vmul.f32 0.999, %v3557_v30 }
 0x493   : > { %v2828_v3 = vadd.f32 0.001, %v2812_v41 }
 0x494   : > { %v2827_v10 = vadd.f32 0.001, %v2811_v15 }
 0x495   : > { %v2844_v31 = vsel %vm5313_vm7, %v2828_v3, %v3555_v17 }
 0x496   : > { %2860 = vst [vmem:[%s5319_s18 + $0x78] sm:$0xff] %v2844_v31  ;;  %v2843_v47 = vsel %vm5313_vm7, %v2827_v10, %v3557_v30 }
 0x497   : > { %2859 = vst [vmem:[%s5319_s18 + $0x70] sm:$0xff] %v2843_v47 }
 0x498   : > { %3576 = shalt.err (!%p3573_p3)
}
 0x499   : > { %s3577_s14 = scalar_lea.hbm %s5374_s23, 2048  ;;  %s3581_s17 = scalar_lea.hbm %s5434_s7, 8192 }
 0x49a   : > { %p3578_p4 = scmp.ne.s32.totalorder %s5374_s23, %s3577_s14  ;;  %p3582_p9 = scmp.lt.u32.totalorder %s5374_s23, %s5434_s7 }
 0x49b   : > { %p3583_p10 = scmp.lt.u32.totalorder %s3581_s17, %s3577_s14  ;;  %p3585_p12 = scmp.lt.u32.totalorder %s3577_s14, %s5374_s23 }
 0x49c   : > { %p3579_p7 = pnand %p3578_p4, %p3716_p5 }
 0x49d   : > { %p3584_p11 = por %p3583_p10, %p3582_p9 }
 0x49e   : > { %p3580_p8 = pneg %p3579_p7 }
 0x49f   : > { %p3586_p13 = por %p3585_p12, %p3584_p11 }
 0x4a1   : > { %p3587_p0 = pnand %p3586_p13, %p3580_p8 }
 0x4a3   : > { %3590 = shalt.err (!%p3587_p0)
}
 0x4a4   : > { %s3636_s22 = smov 128   ;;  %s3637_s19 = smov 8  }
 0x4a5   : > { %3381 = dma.vmem_to_hbm [thread:$0]  (%p3716_p5), %s5376_s21, 2048, %s5374_s23, %s5386_s28, %s3636_s22, %s3636_s22, %s3637_s19  }
 0x4a6 PF: > { %p3387_p1 = scmp.ge.s32.totalorder %s3625_s27, 2  ;;  %s2890_s29 = sand.u32 1, %s3613_s24  }
 0x4a7   : > { %s2891_s8 = scalar_lea.sflag [#allocation3], %s2890_s29 }
 0x4a8   : > { %p3384_p2 = pnand %p3387_p1, %p3720_p6 }
 0x4aa   : > { %3608 = dma.done.wait (!%p3384_p2), %s2891_s8, 2048  }
 0x4ab   : > { %3610 = vsyncadd (!%p3384_p2), %s2891_s8, 4294965248  ;;  %p17_p3 = scmp.ge.s32.totalorder %s3703_s30, 6   ;;  %s5467_s24 = smov %s3617_s25 }
 0x4ac   : > { %s5468_s25 = smov %s3621_s26  ;;  %s5469_s26 = smov %s3714_s10 }
 0x4ad   : > { %s5470_s27 = smov %s3703_s30  ;;  %19 = sbr.rel (!%p17_p3) target bundleno = 3 (0x3), region = 83 }
 0x4b4   :  { %2896 = vsyncpa [#allocation3], 1 }
 0x4b5   :  { %2898 = vsyncpa [#allocation3 + $0x1], 1 }

</bundles_post_ra>
